<compile_context>
chip_gen: v7x
topology: tpu7x:2x2x1
jax: 0.10.0
libtpu: 0.0.40
codegen_flags: <defaults>
</compile_context>

<pallas_src>
import jax
import jax.numpy as jnp
import numpy as np
from jax.experimental import pallas as pl
from jax.experimental.pallas import tpu as pltpu

# ---- small, TPU-friendly config (module defaults scaled down) ------------------
HIDDEN = 128          # hidden_size
NUM_HEADS = 4         # num_attention_heads
HEAD_DIM = HIDDEN // NUM_HEADS
NUM_LAYERS = 2        # num_hidden_layers
FFN = 4 * HIDDEN      # dim_feedforward
VOCAB = 22            # aa_embeddings vocab
MAX_POS = 1024        # position_embeddings table size
LN_EPS = 1e-5
NUM_HEAD_OUT = 15     # 2 (start) + 2 (end) + 10 (type) + 1 (confidence)
HEADS_PAD = 128       # lane-dense padded head-output width


# ------------------------------- kernel ------------------------------------------
def _layer_norm(x, w, b, eps=LN_EPS):
    mu = jnp.mean(x, axis=-1, keepdims=True)
    var = jnp.mean((x - mu) ** 2, axis=-1, keepdims=True)
    return (x - mu) * jax.lax.rsqrt(var + eps) * w + b


def fused_kernel(tok_ref, coords_ref, kb_ref, sw_ref, sb_ref,
                 wqkv_ref, bqkv_ref, wo_ref, bo_ref,
                 ln1w_ref, ln1b_ref, w1_ref, b1_ref, w2_ref, b2_ref,
                 ln2w_ref, ln2b_ref, hw_ref, hb_ref,
                 hidden_ref, heads_ref, attn_scr):
    """One grid step == one batch element (S rows), all layers + fused heads."""
    bf16 = jnp.bfloat16

    # ---- embeddings: tok (= aa + pos, gathered outside) + Linear(coords) -------
    c = coords_ref[0]                                    # (S, 3) f32
    sw = sw_ref[...]                                     # (3, H) f32
    struct = (c[:, 0:1] * sw[0:1, :]
              + c[:, 1:2] * sw[1:2, :]
              + c[:, 2:3] * sw[2:3, :]
              + sb_ref[...])                             # VPU FMAs, no MXU
    x = tok_ref[0] + struct                              # (S, H) f32

    key_bias = kb_ref[0]                                 # (1, S): 0 / -1e9

    for li in range(NUM_LAYERS):                         # static unroll (2 layers)
        # fused Q/K/V projection; 1/sqrt(HEAD_DIM) already folded into Q weights
        qkv = (jnp.dot(x.astype(bf16), wqkv_ref[li],
                       preferred_element_type=jnp.float32) + bqkv_ref[li])
        qkv = qkv.astype(bf16)                           # single cast per layer
        q = qkv[:, :HIDDEN]                              # lane-aligned 128-wide thirds
        k = qkv[:, HIDDEN:2 * HIDDEN]
        v = qkv[:, 2 * HIDDEN:3 * HIDDEN]

        for h in range(NUM_HEADS):                       # static unroll
            lo = h * HEAD_DIM
            qh = q[:, lo:lo + HEAD_DIM]
            kh = k[:, lo:lo + HEAD_DIM]
            vh = v[:, lo:lo + HEAD_DIM]
            s = jax.lax.dot_general(qh, kh, (((1,), (1,)), ((), ())),
                                    preferred_element_type=jnp.float32)   # (S, S)
            s = s + key_bias
            m = jnp.max(s, axis=-1, keepdims=True)
            p = jnp.exp(s - m)
            denom = jnp.sum(p, axis=-1, keepdims=True)
            p = p * pl.reciprocal(denom, approx=True)    # EUP divide
            hv = jnp.dot(p.astype(bf16), vh,
                         preferred_element_type=jnp.float32)              # (S, D)
            attn_scr[:, lo:lo + HEAD_DIM] = hv.astype(bf16)  # head slot in scratch

        # one K=128 output projection instead of four K=32 matmuls
        attn = jnp.dot(attn_scr[...], wo_ref[li],
                       preferred_element_type=jnp.float32) + bo_ref[li]

        # post-norm residual blocks (PyTorch norm_first=False); dropout = identity
        x = _layer_norm(x + attn, ln1w_ref[li], ln1b_ref[li])
        h1 = jnp.dot(x.astype(bf16), w1_ref[li],
                     preferred_element_type=jnp.float32) + b1_ref[li]
        h1 = jnp.maximum(h1, 0.0)
        ffn = jnp.dot(h1.astype(bf16), w2_ref[li],
                      preferred_element_type=jnp.float32) + b2_ref[li]
        x = _layer_norm(x + ffn, ln2w_ref[li], ln2b_ref[li])

    hidden_ref[0] = x
    # fused, lane-dense (128-wide, zero-padded) prediction heads, bf16 writeback
    heads_ref[0] = (jnp.dot(x.astype(bf16), hw_ref[...],
                            preferred_element_type=jnp.float32)
                    + hb_ref[...]).astype(heads_ref.dtype)


# --------------------------- pallas_call wrapper ----------------------------------
def _resident(arr):
    nd = arr.ndim
    return pl.BlockSpec(arr.shape, lambda b, nd=nd: (0,) * nd)


def _per_batch(shape):
    nd = len(shape)
    return pl.BlockSpec((1,) + tuple(shape[1:]),
                        lambda b, nd=nd: (b,) + (0,) * (nd - 1))


def fused_forward_call(tok, coords, key_bias, sw, sb, pk):
    B, S, H = tok.shape
    args = (tok, coords, key_bias, sw, sb,
            pk['wqkv'], pk['bqkv'], pk['wo'], pk['bo'],
            pk['ln1w'], pk['ln1b'], pk['w1'], pk['b1'], pk['w2'], pk['b2'],
            pk['ln2w'], pk['ln2b'], pk['heads_w'], pk['heads_b'])
    in_specs = ([_per_batch(tok.shape), _per_batch(coords.shape),
                 _per_batch(key_bias.shape)]
                + [_resident(a) for a in args[3:]])
    return pl.pallas_call(
        fused_kernel,
        out_shape=(jax.ShapeDtypeStruct((B, S, H), jnp.float32),
                   jax.ShapeDtypeStruct((B, S, HEADS_PAD), jnp.bfloat16)),
        grid=(B,),
        in_specs=in_specs,
        out_specs=(_per_batch((B, S, H)), _per_batch((B, S, HEADS_PAD))),
        scratch_shapes=[pltpu.VMEM((S, HIDDEN), jnp.bfloat16)],
        compiler_params=pltpu.CompilerParams(dimension_semantics=("parallel",)),
    )(*args)


# ------------------------------- parameters ---------------------------------------
def init_params(key):
    def dense(k, i, o, scale=0.02):
        return (scale * jax.random.normal(k, (i, o))).astype(jnp.float32)

    ks = jax.random.split(key, 4 + NUM_LAYERS)
    params = {
        'pos_emb': (0.02 * jax.random.normal(ks[0], (MAX_POS, HIDDEN))).astype(jnp.float32),
        'aa_emb': (0.02 * jax.random.normal(ks[1], (VOCAB, HIDDEN))).astype(jnp.float32),
        'struct_w': dense(ks[2], 3, HIDDEN),
        'struct_b': jnp.zeros((1, HIDDEN), jnp.float32),
        'heads_w': dense(ks[3], HIDDEN, NUM_HEAD_OUT),   # fused 2|2|10|1 heads
        'heads_b': jnp.zeros((1, NUM_HEAD_OUT), jnp.float32),
        'layers': [],
    }
    for l in range(NUM_LAYERS):
        lk = jax.random.split(ks[4 + l], 6)
        params['layers'].append(dict(
            wq=dense(lk[0], HIDDEN, HIDDEN), bq=jnp.zeros((1, HIDDEN), jnp.float32),
            wk=dense(lk[1], HIDDEN, HIDDEN), bk=jnp.zeros((1, HIDDEN), jnp.float32),
            wv=dense(lk[2], HIDDEN, HIDDEN), bv=jnp.zeros((1, HIDDEN), jnp.float32),
            wo=dense(lk[3], HIDDEN, HIDDEN), bo=jnp.zeros((1, HIDDEN), jnp.float32),
            ln1w=jnp.ones((1, HIDDEN), jnp.float32), ln1b=jnp.zeros((1, HIDDEN), jnp.float32),
            w1=dense(lk[4], HIDDEN, FFN), b1=jnp.zeros((1, FFN), jnp.float32),
            w2=dense(lk[5], FFN, HIDDEN), b2=jnp.zeros((1, HIDDEN), jnp.float32),
            ln2w=jnp.ones((1, HIDDEN), jnp.float32), ln2b=jnp.zeros((1, HIDDEN), jnp.float32),
        ))
    return params


def pack_params(params):
    """Pack ONCE (call at init, not per forward): stack per-layer weights with a
    leading NUM_LAYERS dim, fuse QKV, fold 1/sqrt(HEAD_DIM) into the Q columns
    (weight + bias), cast matmul weights to bf16, zero-pad heads to 128 lanes."""
    L = params['layers']
    bf = jnp.bfloat16
    qscale = 1.0 / np.sqrt(HEAD_DIM)
    return dict(
        wqkv=jnp.stack([jnp.concatenate([l['wq'] * qscale, l['wk'], l['wv']], axis=1)
                        for l in L]).astype(bf),
        bqkv=jnp.stack([jnp.concatenate([l['bq'] * qscale, l['bk'], l['bv']], axis=1)
                        for l in L]),
        wo=jnp.stack([l['wo'] for l in L]).astype(bf),
        bo=jnp.stack([l['bo'] for l in L]),
        ln1w=jnp.stack([l['ln1w'] for l in L]),
        ln1b=jnp.stack([l['ln1b'] for l in L]),
        w1=jnp.stack([l['w1'] for l in L]).astype(bf),
        b1=jnp.stack([l['b1'] for l in L]),
        w2=jnp.stack([l['w2'] for l in L]).astype(bf),
        b2=jnp.stack([l['b2'] for l in L]),
        ln2w=jnp.stack([l['ln2w'] for l in L]),
        ln2b=jnp.stack([l['ln2b'] for l in L]),
        heads_w=jnp.pad(params['heads_w'],
                        ((0, 0), (0, HEADS_PAD - NUM_HEAD_OUT))).astype(bf),
        heads_b=jnp.pad(params['heads_b'], ((0, 0), (0, HEADS_PAD - NUM_HEAD_OUT))),
    )


# ------------------------------- forward -------------------------------------------
def domain_predictor_forward(params, packed, sequence_ids, structure_coords=None,
                             attention_mask=None):
    B, S = sequence_ids.shape
    assert S <= MAX_POS, "sequence length exceeds position-embedding table"

    # embedding gathers are glue; positional add fused with the gather in XLA
    tok = (jnp.take(params['aa_emb'], sequence_ids, axis=0)
           + params['pos_emb'][:S][None, :, :]).astype(jnp.float32)       # (B,S,H)

    if structure_coords is None:
        coords = jnp.zeros((B, S, 3), jnp.float32)
        sw = jnp.zeros_like(params['struct_w'])
        sb = jnp.zeros_like(params['struct_b'])
    else:
        coords = structure_coords.astype(jnp.float32)
        sw, sb = params['struct_w'], params['struct_b']

    # per-batch key-padding bias (PyTorch src_key_padding_mask = ~attention_mask)
    if attention_mask is None:
        key_bias = jnp.zeros((B, 1, S), jnp.float32)
    else:
        key_bias = jnp.where(attention_mask[:, None, :], 0.0, -1e9).astype(jnp.float32)

    hidden, head_raw = fused_forward_call(tok, coords, key_bias, sw, sb, packed)

    ho = head_raw.astype(jnp.float32)                    # (B, S, 128) padded slab
    return {
        'start_logits': ho[..., 0:2],
        'end_logits': ho[..., 2:4],
        'type_logits': ho[..., 4:14],
        'confidence_scores': ho[..., 14],                # == squeeze(-1)
        'hidden_states': hidden,
    }


# --------------------------- pure-JAX reference -------------------------------------
def reference_forward(params, sequence_ids, structure_coords, attention_mask):
    B, S = sequence_ids.shape
    x = jnp.take(params['aa_emb'], sequence_ids, axis=0) + params['pos_emb'][:S][None]
    if structure_coords is not None:
        x = x + structure_coords @ params['struct_w'] + params['struct_b']
    mb = jnp.where(attention_mask, 0.0, -1e9).astype(jnp.float32)

    def ln(t, w, b):
        mu = t.mean(-1, keepdims=True)
        var = ((t - mu) ** 2).mean(-1, keepdims=True)
        return (t - mu) * jax.lax.rsqrt(var + LN_EPS) * w + b

    for p in params['layers']:
        q = x @ p['wq'] + p['bq']
        k = x @ p['wk'] + p['bk']
        v = x @ p['wv'] + p['bv']
        sp = lambda t: t.reshape(B, S, NUM_HEADS, HEAD_DIM).transpose(0, 2, 1, 3)
        qh, kh, vh = sp(q), sp(k), sp(v)
        s = jnp.einsum('bhqd,bhkd->bhqk', qh, kh) / np.sqrt(HEAD_DIM)
        s = s + mb[:, None, None, :]
        a = jax.nn.softmax(s, axis=-1)
        o = jnp.einsum('bhqk,bhkd->bhqd', a, vh).transpose(0, 2, 1, 3).reshape(B, S, HIDDEN)
        x = ln(x + (o @ p['wo'] + p['bo']), p['ln1w'], p['ln1b'])
        f = jnp.maximum(x @ p['w1'] + p['b1'], 0.0) @ p['w2'] + p['b2']
        x = ln(x + f, p['ln2w'], p['ln2b'])

    ho = x @ params['heads_w'] + params['heads_b']
    return {
        'start_logits': ho[..., 0:2],
        'end_logits': ho[..., 2:4],
        'type_logits': ho[..., 4:14],
        'confidence_scores': ho[..., 14],
        'hidden_states': x,
    }


# ---------------------------------- main ---------------------------------------------
if __name__ == "__main__":
    B, S = 2, 16
    key = jax.random.PRNGKey(0)
    k_ids, k_coords, k_params = jax.random.split(key, 3)

    sequence_ids = jax.random.randint(k_ids, (B, S), 0, VOCAB, dtype=jnp.int32)
    structure_coords = jax.random.normal(k_coords, (B, S, 3), jnp.float32)
    # last 4 positions of the 2nd sequence are padding
    attention_mask = (jnp.arange(S)[None, :] < jnp.array([[S], [S - 4]])).astype(bool)

    params = init_params(k_params)
    packed = pack_params(params)          # pack ONCE, outside the forward pass

    outputs = domain_predictor_forward(params, packed, sequence_ids,
                                       structure_coords, attention_mask)
    outputs = jax.block_until_ready(outputs)

    ref = reference_forward(params, sequence_ids, structure_coords, attention_mask)
    for name in ('start_logits', 'end_logits', 'type_logits',
                 'confidence_scores', 'hidden_states'):
        np.testing.assert_allclose(np.asarray(outputs[name]), np.asarray(ref[name]),
                                   rtol=2e-2, atol=2e-2)

    print("KERNEL_OK")
</pallas_src>

<mosaic_0001>
module attributes {stable_mosaic.version = 11 : i64} {
  func.func @fused_kernel(%arg0: i32, %arg1: memref<1x16x128xf32, #tpu.memory_space<vmem>>, %arg2: memref<1x16x3xf32, #tpu.memory_space<vmem>>, %arg3: memref<1x1x16xf32, #tpu.memory_space<vmem>>, %arg4: memref<3x128xf32, #tpu.memory_space<vmem>>, %arg5: memref<1x128xf32, #tpu.memory_space<vmem>>, %arg6: memref<2x128x384xbf16, #tpu.memory_space<vmem>>, %arg7: memref<2x1x384xf32, #tpu.memory_space<vmem>>, %arg8: memref<2x128x128xbf16, #tpu.memory_space<vmem>>, %arg9: memref<2x1x128xf32, #tpu.memory_space<vmem>>, %arg10: memref<2x1x128xf32, #tpu.memory_space<vmem>>, %arg11: memref<2x1x128xf32, #tpu.memory_space<vmem>>, %arg12: memref<2x128x512xbf16, #tpu.memory_space<vmem>>, %arg13: memref<2x1x512xf32, #tpu.memory_space<vmem>>, %arg14: memref<2x512x128xbf16, #tpu.memory_space<vmem>>, %arg15: memref<2x1x128xf32, #tpu.memory_space<vmem>>, %arg16: memref<2x1x128xf32, #tpu.memory_space<vmem>>, %arg17: memref<2x1x128xf32, #tpu.memory_space<vmem>>, %arg18: memref<128x128xbf16, #tpu.memory_space<vmem>>, %arg19: memref<1x128xf32, #tpu.memory_space<vmem>>, %arg20: memref<1x16x128xf32, #tpu.memory_space<vmem>>, %arg21: memref<1x16x128xbf16, #tpu.memory_space<vmem>>, %arg22: memref<16x128xbf16, #tpu.memory_space<vmem>>) attributes {dimension_semantics = [#tpu.dimension_semantics<parallel>], iteration_bounds = array<i64: 2>, scalar_prefetch = 0 : i64, scratch_operands = 1 : i64, tpu.core_type = #tpu.core_type<tc>, window_params = [{transform_indices = @transform_0, window_bounds = array<i64: 1, 16, 128>}, {transform_indices = @transform_1, window_bounds = array<i64: 1, 16, 3>}, {transform_indices = @transform_2, window_bounds = array<i64: 1, 1, 16>}, {pipeline_mode = #tpu.pipeline_mode<synchronous>, transform_indices = @transform_3, window_bounds = array<i64: 3, 128>}, {pipeline_mode = #tpu.pipeline_mode<synchronous>, transform_indices = @transform_4, window_bounds = array<i64: 1, 128>}, {pipeline_mode = #tpu.pipeline_mode<synchronous>, transform_indices = @transform_5, window_bounds = array<i64: 2, 128, 384>}, {pipeline_mode = #tpu.pipeline_mode<synchronous>, transform_indices = @transform_6, window_bounds = array<i64: 2, 1, 384>}, {pipeline_mode = #tpu.pipeline_mode<synchronous>, transform_indices = @transform_7, window_bounds = array<i64: 2, 128, 128>}, {pipeline_mode = #tpu.pipeline_mode<synchronous>, transform_indices = @transform_8, window_bounds = array<i64: 2, 1, 128>}, {pipeline_mode = #tpu.pipeline_mode<synchronous>, transform_indices = @transform_9, window_bounds = array<i64: 2, 1, 128>}, {pipeline_mode = #tpu.pipeline_mode<synchronous>, transform_indices = @transform_10, window_bounds = array<i64: 2, 1, 128>}, {pipeline_mode = #tpu.pipeline_mode<synchronous>, transform_indices = @transform_11, window_bounds = array<i64: 2, 128, 512>}, {pipeline_mode = #tpu.pipeline_mode<synchronous>, transform_indices = @transform_12, window_bounds = array<i64: 2, 1, 512>}, {pipeline_mode = #tpu.pipeline_mode<synchronous>, transform_indices = @transform_13, window_bounds = array<i64: 2, 512, 128>}, {pipeline_mode = #tpu.pipeline_mode<synchronous>, transform_indices = @transform_14, window_bounds = array<i64: 2, 1, 128>}, {pipeline_mode = #tpu.pipeline_mode<synchronous>, transform_indices = @transform_15, window_bounds = array<i64: 2, 1, 128>}, {pipeline_mode = #tpu.pipeline_mode<synchronous>, transform_indices = @transform_16, window_bounds = array<i64: 2, 1, 128>}, {pipeline_mode = #tpu.pipeline_mode<synchronous>, transform_indices = @transform_17, window_bounds = array<i64: 128, 128>}, {pipeline_mode = #tpu.pipeline_mode<synchronous>, transform_indices = @transform_18, window_bounds = array<i64: 1, 128>}, {transform_indices = @transform_19, window_bounds = array<i64: 1, 16, 128>}, {transform_indices = @transform_20, window_bounds = array<i64: 1, 16, 128>}]} {
    %c0 = arith.constant 0 : index
    %c0_0 = arith.constant 0 : index
    %c0_1 = arith.constant 0 : index
    %0 = vector.load %arg2[%c0, %c0_0, %c0_1] : memref<1x16x3xf32, #tpu.memory_space<vmem>>, vector<1x16x3xf32>
    %1 = vector.shape_cast %0 : vector<1x16x3xf32> to vector<16x3xf32>
    %c0_2 = arith.constant 0 : index
    %c0_3 = arith.constant 0 : index
    %2 = vector.load %arg4[%c0_2, %c0_3] : memref<3x128xf32, #tpu.memory_space<vmem>>, vector<3x128xf32>
    %3 = vector.extract_strided_slice %1 {offsets = [0, 0], sizes = [16, 1], strides = [1, 1]} : vector<16x3xf32> to vector<16x1xf32>
    %4 = vector.extract_strided_slice %2 {offsets = [0, 0], sizes = [1, 128], strides = [1, 1]} : vector<3x128xf32> to vector<1x128xf32>
    %5 = vector.broadcast %3 : vector<16x1xf32> to vector<16x128xf32>
    %6 = vector.broadcast %4 : vector<1x128xf32> to vector<16x128xf32>
    %7 = arith.mulf %5, %6 : vector<16x128xf32>
    %8 = vector.extract_strided_slice %1 {offsets = [0, 1], sizes = [16, 1], strides = [1, 1]} : vector<16x3xf32> to vector<16x1xf32>
    %9 = vector.extract_strided_slice %2 {offsets = [1, 0], sizes = [1, 128], strides = [1, 1]} : vector<3x128xf32> to vector<1x128xf32>
    %10 = vector.broadcast %8 : vector<16x1xf32> to vector<16x128xf32>
    %11 = vector.broadcast %9 : vector<1x128xf32> to vector<16x128xf32>
    %12 = arith.mulf %10, %11 : vector<16x128xf32>
    %13 = arith.addf %7, %12 : vector<16x128xf32>
    %14 = vector.extract_strided_slice %1 {offsets = [0, 2], sizes = [16, 1], strides = [1, 1]} : vector<16x3xf32> to vector<16x1xf32>
    %15 = vector.extract_strided_slice %2 {offsets = [2, 0], sizes = [1, 128], strides = [1, 1]} : vector<3x128xf32> to vector<1x128xf32>
    %16 = vector.broadcast %14 : vector<16x1xf32> to vector<16x128xf32>
    %17 = vector.broadcast %15 : vector<1x128xf32> to vector<16x128xf32>
    %18 = arith.mulf %16, %17 : vector<16x128xf32>
    %19 = arith.addf %13, %18 : vector<16x128xf32>
    %c0_4 = arith.constant 0 : index
    %c0_5 = arith.constant 0 : index
    %20 = vector.load %arg5[%c0_4, %c0_5] : memref<1x128xf32, #tpu.memory_space<vmem>>, vector<1x128xf32>
    %21 = vector.broadcast %20 : vector<1x128xf32> to vector<16x128xf32>
    %22 = arith.addf %19, %21 : vector<16x128xf32>
    %c0_6 = arith.constant 0 : index
    %c0_7 = arith.constant 0 : index
    %c0_8 = arith.constant 0 : index
    %23 = vector.load %arg1[%c0_6, %c0_7, %c0_8] : memref<1x16x128xf32, #tpu.memory_space<vmem>>, vector<1x16x128xf32>
    %24 = vector.shape_cast %23 : vector<1x16x128xf32> to vector<16x128xf32>
    %25 = arith.addf %24, %22 : vector<16x128xf32>
    %c0_9 = arith.constant 0 : index
    %c0_10 = arith.constant 0 : index
    %c0_11 = arith.constant 0 : index
    %26 = vector.load %arg3[%c0_9, %c0_10, %c0_11] : memref<1x1x16xf32, #tpu.memory_space<vmem>>, vector<1x1x16xf32>
    %27 = vector.shape_cast %26 : vector<1x1x16xf32> to vector<1x16xf32>
    %28 = arith.truncf %25 : vector<16x128xf32> to vector<16x128xbf16>
    %c0_12 = arith.constant 0 : index
    %c0_13 = arith.constant 0 : index
    %c0_14 = arith.constant 0 : index
    %29 = vector.load %arg6[%c0_12, %c0_13, %c0_14] : memref<2x128x384xbf16, #tpu.memory_space<vmem>>, vector<1x128x384xbf16>
    %30 = vector.shape_cast %29 : vector<1x128x384xbf16> to vector<128x384xbf16>
    %cst = arith.constant dense<0.000000e+00> : vector<16x384xf32>
    %31 = tpu.matmul %28, %30, %cst {dimension_numbers = #tpu.dot_dimension_numbers<[1], [0], [0], [1], [0, 0, 1, 1], [], []>} : vector<16x128xbf16>, vector<128x384xbf16>, vector<16x384xf32> -> vector<16x384xf32>
    %c0_15 = arith.constant 0 : index
    %c0_16 = arith.constant 0 : index
    %c0_17 = arith.constant 0 : index
    %32 = vector.load %arg7[%c0_15, %c0_16, %c0_17] : memref<2x1x384xf32, #tpu.memory_space<vmem>>, vector<1x1x384xf32>
    %33 = vector.shape_cast %32 : vector<1x1x384xf32> to vector<1x384xf32>
    %34 = vector.broadcast %33 : vector<1x384xf32> to vector<16x384xf32>
    %35 = arith.addf %31, %34 : vector<16x384xf32>
    %36 = arith.truncf %35 : vector<16x384xf32> to vector<16x384xbf16>
    %37 = vector.extract_strided_slice %36 {offsets = [0, 0], sizes = [16, 128], strides = [1, 1]} : vector<16x384xbf16> to vector<16x128xbf16>
    %38 = vector.extract_strided_slice %36 {offsets = [0, 128], sizes = [16, 128], strides = [1, 1]} : vector<16x384xbf16> to vector<16x128xbf16>
    %39 = vector.extract_strided_slice %36 {offsets = [0, 256], sizes = [16, 128], strides = [1, 1]} : vector<16x384xbf16> to vector<16x128xbf16>
    %40 = vector.extract_strided_slice %37 {offsets = [0, 0], sizes = [16, 32], strides = [1, 1]} : vector<16x128xbf16> to vector<16x32xbf16>
    %41 = vector.extract_strided_slice %38 {offsets = [0, 0], sizes = [16, 32], strides = [1, 1]} : vector<16x128xbf16> to vector<16x32xbf16>
    %42 = vector.extract_strided_slice %39 {offsets = [0, 0], sizes = [16, 32], strides = [1, 1]} : vector<16x128xbf16> to vector<16x32xbf16>
    %cst_18 = arith.constant dense<0.000000e+00> : vector<16x16xf32>
    %43 = tpu.matmul %40, %41, %cst_18 {dimension_numbers = #tpu.dot_dimension_numbers<[1], [1], [0], [0], [0, 0, 1, 0], [], []>} : vector<16x32xbf16>, vector<16x32xbf16>, vector<16x16xf32> -> vector<16x16xf32>
    %44 = vector.broadcast %27 : vector<1x16xf32> to vector<16x16xf32>
    %45 = arith.addf %43, %44 : vector<16x16xf32>
    %cst_19 = arith.constant dense<0xFF800000> : vector<16xf32>
    %46 = vector.multi_reduction <maximumf>, %45, %cst_19 [1] : vector<16x16xf32> to vector<16xf32>
    %47 = vector.shape_cast %46 : vector<16xf32> to vector<16x1xf32>
    %48 = vector.broadcast %47 : vector<16x1xf32> to vector<16x16xf32>
    %49 = arith.subf %45, %48 : vector<16x16xf32>
    %50 = math.exp %49 : vector<16x16xf32>
    %cst_20 = arith.constant dense<0.000000e+00> : vector<16xf32>
    %51 = vector.multi_reduction <add>, %50, %cst_20 [1] : vector<16x16xf32> to vector<16xf32>
    %52 = vector.shape_cast %51 : vector<16xf32> to vector<16x1xf32>
    %53 = tpu.reciprocal %52 {approx = true} : vector<16x1xf32> -> vector<16x1xf32>
    %54 = vector.broadcast %53 : vector<16x1xf32> to vector<16x16xf32>
    %55 = arith.mulf %50, %54 : vector<16x16xf32>
    %56 = arith.truncf %55 : vector<16x16xf32> to vector<16x16xbf16>
    %cst_21 = arith.constant dense<0.000000e+00> : vector<16x32xf32>
    %57 = tpu.matmul %56, %42, %cst_21 {dimension_numbers = #tpu.dot_dimension_numbers<[1], [0], [0], [1], [0, 0, 1, 1], [], []>} : vector<16x16xbf16>, vector<16x32xbf16>, vector<16x32xf32> -> vector<16x32xf32>
    %58 = arith.truncf %57 : vector<16x32xf32> to vector<16x32xbf16>
    %c0_22 = arith.constant 0 : index
    %c0_23 = arith.constant 0 : index
    %59 = vector.load %arg22[%c0_22, %c0_23] : memref<16x128xbf16, #tpu.memory_space<vmem>>, vector<16x32xbf16>
    tpu.vector_store %arg22[%c0_22, %c0_23], %58 {strides = array<i32>} : memref<16x128xbf16, #tpu.memory_space<vmem>>, vector<16x32xbf16>,
    %60 = vector.extract_strided_slice %37 {offsets = [0, 32], sizes = [16, 32], strides = [1, 1]} : vector<16x128xbf16> to vector<16x32xbf16>
    %61 = vector.extract_strided_slice %38 {offsets = [0, 32], sizes = [16, 32], strides = [1, 1]} : vector<16x128xbf16> to vector<16x32xbf16>
    %62 = vector.extract_strided_slice %39 {offsets = [0, 32], sizes = [16, 32], strides = [1, 1]} : vector<16x128xbf16> to vector<16x32xbf16>
    %cst_24 = arith.constant dense<0.000000e+00> : vector<16x16xf32>
    %63 = tpu.matmul %60, %61, %cst_24 {dimension_numbers = #tpu.dot_dimension_numbers<[1], [1], [0], [0], [0, 0, 1, 0], [], []>} : vector<16x32xbf16>, vector<16x32xbf16>, vector<16x16xf32> -> vector<16x16xf32>
    %64 = vector.broadcast %27 : vector<1x16xf32> to vector<16x16xf32>
    %65 = arith.addf %63, %64 : vector<16x16xf32>
    %cst_25 = arith.constant dense<0xFF800000> : vector<16xf32>
    %66 = vector.multi_reduction <maximumf>, %65, %cst_25 [1] : vector<16x16xf32> to vector<16xf32>
    %67 = vector.shape_cast %66 : vector<16xf32> to vector<16x1xf32>
    %68 = vector.broadcast %67 : vector<16x1xf32> to vector<16x16xf32>
    %69 = arith.subf %65, %68 : vector<16x16xf32>
    %70 = math.exp %69 : vector<16x16xf32>
    %cst_26 = arith.constant dense<0.000000e+00> : vector<16xf32>
    %71 = vector.multi_reduction <add>, %70, %cst_26 [1] : vector<16x16xf32> to vector<16xf32>
    %72 = vector.shape_cast %71 : vector<16xf32> to vector<16x1xf32>
    %73 = tpu.reciprocal %72 {approx = true} : vector<16x1xf32> -> vector<16x1xf32>
    %74 = vector.broadcast %73 : vector<16x1xf32> to vector<16x16xf32>
    %75 = arith.mulf %70, %74 : vector<16x16xf32>
    %76 = arith.truncf %75 : vector<16x16xf32> to vector<16x16xbf16>
    %cst_27 = arith.constant dense<0.000000e+00> : vector<16x32xf32>
    %77 = tpu.matmul %76, %62, %cst_27 {dimension_numbers = #tpu.dot_dimension_numbers<[1], [0], [0], [1], [0, 0, 1, 1], [], []>} : vector<16x16xbf16>, vector<16x32xbf16>, vector<16x32xf32> -> vector<16x32xf32>
    %78 = arith.truncf %77 : vector<16x32xf32> to vector<16x32xbf16>
    %c0_28 = arith.constant 0 : index
    %c32 = arith.constant 32 : index
    %79 = vector.load %arg22[%c0_28, %c32] : memref<16x128xbf16, #tpu.memory_space<vmem>>, vector<16x32xbf16>
    tpu.vector_store %arg22[%c0_28, %c32], %78 {strides = array<i32>} : memref<16x128xbf16, #tpu.memory_space<vmem>>, vector<16x32xbf16>,
    %80 = vector.extract_strided_slice %37 {offsets = [0, 64], sizes = [16, 32], strides = [1, 1]} : vector<16x128xbf16> to vector<16x32xbf16>
    %81 = vector.extract_strided_slice %38 {offsets = [0, 64], sizes = [16, 32], strides = [1, 1]} : vector<16x128xbf16> to vector<16x32xbf16>
    %82 = vector.extract_strided_slice %39 {offsets = [0, 64], sizes = [16, 32], strides = [1, 1]} : vector<16x128xbf16> to vector<16x32xbf16>
    %cst_29 = arith.constant dense<0.000000e+00> : vector<16x16xf32>
    %83 = tpu.matmul %80, %81, %cst_29 {dimension_numbers = #tpu.dot_dimension_numbers<[1], [1], [0], [0], [0, 0, 1, 0], [], []>} : vector<16x32xbf16>, vector<16x32xbf16>, vector<16x16xf32> -> vector<16x16xf32>
    %84 = vector.broadcast %27 : vector<1x16xf32> to vector<16x16xf32>
    %85 = arith.addf %83, %84 : vector<16x16xf32>
    %cst_30 = arith.constant dense<0xFF800000> : vector<16xf32>
    %86 = vector.multi_reduction <maximumf>, %85, %cst_30 [1] : vector<16x16xf32> to vector<16xf32>
    %87 = vector.shape_cast %86 : vector<16xf32> to vector<16x1xf32>
    %88 = vector.broadcast %87 : vector<16x1xf32> to vector<16x16xf32>
    %89 = arith.subf %85, %88 : vector<16x16xf32>
    %90 = math.exp %89 : vector<16x16xf32>
    %cst_31 = arith.constant dense<0.000000e+00> : vector<16xf32>
    %91 = vector.multi_reduction <add>, %90, %cst_31 [1] : vector<16x16xf32> to vector<16xf32>
    %92 = vector.shape_cast %91 : vector<16xf32> to vector<16x1xf32>
    %93 = tpu.reciprocal %92 {approx = true} : vector<16x1xf32> -> vector<16x1xf32>
    %94 = vector.broadcast %93 : vector<16x1xf32> to vector<16x16xf32>
    %95 = arith.mulf %90, %94 : vector<16x16xf32>
    %96 = arith.truncf %95 : vector<16x16xf32> to vector<16x16xbf16>
    %cst_32 = arith.constant dense<0.000000e+00> : vector<16x32xf32>
    %97 = tpu.matmul %96, %82, %cst_32 {dimension_numbers = #tpu.dot_dimension_numbers<[1], [0], [0], [1], [0, 0, 1, 1], [], []>} : vector<16x16xbf16>, vector<16x32xbf16>, vector<16x32xf32> -> vector<16x32xf32>
    %98 = arith.truncf %97 : vector<16x32xf32> to vector<16x32xbf16>
    %c0_33 = arith.constant 0 : index
    %c64 = arith.constant 64 : index
    %99 = vector.load %arg22[%c0_33, %c64] : memref<16x128xbf16, #tpu.memory_space<vmem>>, vector<16x32xbf16>
    tpu.vector_store %arg22[%c0_33, %c64], %98 {strides = array<i32>} : memref<16x128xbf16, #tpu.memory_space<vmem>>, vector<16x32xbf16>,
    %100 = vector.extract_strided_slice %37 {offsets = [0, 96], sizes = [16, 32], strides = [1, 1]} : vector<16x128xbf16> to vector<16x32xbf16>
    %101 = vector.extract_strided_slice %38 {offsets = [0, 96], sizes = [16, 32], strides = [1, 1]} : vector<16x128xbf16> to vector<16x32xbf16>
    %102 = vector.extract_strided_slice %39 {offsets = [0, 96], sizes = [16, 32], strides = [1, 1]} : vector<16x128xbf16> to vector<16x32xbf16>
    %cst_34 = arith.constant dense<0.000000e+00> : vector<16x16xf32>
    %103 = tpu.matmul %100, %101, %cst_34 {dimension_numbers = #tpu.dot_dimension_numbers<[1], [1], [0], [0], [0, 0, 1, 0], [], []>} : vector<16x32xbf16>, vector<16x32xbf16>, vector<16x16xf32> -> vector<16x16xf32>
    %104 = vector.broadcast %27 : vector<1x16xf32> to vector<16x16xf32>
    %105 = arith.addf %103, %104 : vector<16x16xf32>
    %cst_35 = arith.constant dense<0xFF800000> : vector<16xf32>
    %106 = vector.multi_reduction <maximumf>, %105, %cst_35 [1] : vector<16x16xf32> to vector<16xf32>
    %107 = vector.shape_cast %106 : vector<16xf32> to vector<16x1xf32>
    %108 = vector.broadcast %107 : vector<16x1xf32> to vector<16x16xf32>
    %109 = arith.subf %105, %108 : vector<16x16xf32>
    %110 = math.exp %109 : vector<16x16xf32>
    %cst_36 = arith.constant dense<0.000000e+00> : vector<16xf32>
    %111 = vector.multi_reduction <add>, %110, %cst_36 [1] : vector<16x16xf32> to vector<16xf32>
    %112 = vector.shape_cast %111 : vector<16xf32> to vector<16x1xf32>
    %113 = tpu.reciprocal %112 {approx = true} : vector<16x1xf32> -> vector<16x1xf32>
    %114 = vector.broadcast %113 : vector<16x1xf32> to vector<16x16xf32>
    %115 = arith.mulf %110, %114 : vector<16x16xf32>
    %116 = arith.truncf %115 : vector<16x16xf32> to vector<16x16xbf16>
    %cst_37 = arith.constant dense<0.000000e+00> : vector<16x32xf32>
    %117 = tpu.matmul %116, %102, %cst_37 {dimension_numbers = #tpu.dot_dimension_numbers<[1], [0], [0], [1], [0, 0, 1, 1], [], []>} : vector<16x16xbf16>, vector<16x32xbf16>, vector<16x32xf32> -> vector<16x32xf32>
    %118 = arith.truncf %117 : vector<16x32xf32> to vector<16x32xbf16>
    %c0_38 = arith.constant 0 : index
    %c96 = arith.constant 96 : index
    %119 = vector.load %arg22[%c0_38, %c96] : memref<16x128xbf16, #tpu.memory_space<vmem>>, vector<16x32xbf16>
    tpu.vector_store %arg22[%c0_38, %c96], %118 {strides = array<i32>} : memref<16x128xbf16, #tpu.memory_space<vmem>>, vector<16x32xbf16>,
    %c0_39 = arith.constant 0 : index
    %c0_40 = arith.constant 0 : index
    %120 = vector.load %arg22[%c0_39, %c0_40] : memref<16x128xbf16, #tpu.memory_space<vmem>>, vector<16x128xbf16>
    %c0_41 = arith.constant 0 : index
    %c0_42 = arith.constant 0 : index
    %c0_43 = arith.constant 0 : index
    %121 = vector.load %arg8[%c0_41, %c0_42, %c0_43] : memref<2x128x128xbf16, #tpu.memory_space<vmem>>, vector<1x128x128xbf16>
    %122 = vector.shape_cast %121 : vector<1x128x128xbf16> to vector<128x128xbf16>
    %cst_44 = arith.constant dense<0.000000e+00> : vector<16x128xf32>
    %123 = tpu.matmul %120, %122, %cst_44 {dimension_numbers = #tpu.dot_dimension_numbers<[1], [0], [0], [1], [0, 0, 1, 1], [], []>} : vector<16x128xbf16>, vector<128x128xbf16>, vector<16x128xf32> -> vector<16x128xf32>
    %c0_45 = arith.constant 0 : index
    %c0_46 = arith.constant 0 : index
    %c0_47 = arith.constant 0 : index
    %124 = vector.load %arg9[%c0_45, %c0_46, %c0_47] : memref<2x1x128xf32, #tpu.memory_space<vmem>>, vector<1x1x128xf32>
    %125 = vector.shape_cast %124 : vector<1x1x128xf32> to vector<1x128xf32>
    %126 = vector.broadcast %125 : vector<1x128xf32> to vector<16x128xf32>
    %127 = arith.addf %123, %126 : vector<16x128xf32>
    %128 = arith.addf %25, %127 : vector<16x128xf32>
    %c0_48 = arith.constant 0 : index
    %c0_49 = arith.constant 0 : index
    %c0_50 = arith.constant 0 : index
    %129 = vector.load %arg10[%c0_48, %c0_49, %c0_50] : memref<2x1x128xf32, #tpu.memory_space<vmem>>, vector<1x1x128xf32>
    %130 = vector.shape_cast %129 : vector<1x1x128xf32> to vector<1x128xf32>
    %c0_51 = arith.constant 0 : index
    %c0_52 = arith.constant 0 : index
    %c0_53 = arith.constant 0 : index
    %131 = vector.load %arg11[%c0_51, %c0_52, %c0_53] : memref<2x1x128xf32, #tpu.memory_space<vmem>>, vector<1x1x128xf32>
    %132 = vector.shape_cast %131 : vector<1x1x128xf32> to vector<1x128xf32>
    %cst_54 = arith.constant dense<0.000000e+00> : vector<16xf32>
    %133 = vector.multi_reduction <add>, %128, %cst_54 [1] : vector<16x128xf32> to vector<16xf32>
    %134 = vector.shape_cast %133 : vector<16xf32> to vector<16x1xf32>
    %cst_55 = arith.constant 1.280000e+02 : f32
    %135 = vector.broadcast %cst_55 : f32 to vector<16x1xf32>
    %136 = arith.divf %134, %135 : vector<16x1xf32>
    %137 = vector.broadcast %136 : vector<16x1xf32> to vector<16x128xf32>
    %138 = arith.subf %128, %137 : vector<16x128xf32>
    %139 = arith.mulf %138, %138 : vector<16x128xf32>
    %cst_56 = arith.constant dense<0.000000e+00> : vector<16xf32>
    %140 = vector.multi_reduction <add>, %139, %cst_56 [1] : vector<16x128xf32> to vector<16xf32>
    %141 = vector.shape_cast %140 : vector<16xf32> to vector<16x1xf32>
    %cst_57 = arith.constant 1.280000e+02 : f32
    %142 = vector.broadcast %cst_57 : f32 to vector<16x1xf32>
    %143 = arith.divf %141, %142 : vector<16x1xf32>
    %144 = vector.broadcast %136 : vector<16x1xf32> to vector<16x128xf32>
    %145 = arith.subf %128, %144 : vector<16x128xf32>
    %cst_58 = arith.constant 9.99999974E-6 : f32
    %146 = vector.broadcast %cst_58 : f32 to vector<16x1xf32>
    %147 = arith.addf %143, %146 : vector<16x1xf32>
    %148 = math.rsqrt %147 : vector<16x1xf32>
    %149 = vector.broadcast %148 : vector<16x1xf32> to vector<16x128xf32>
    %150 = arith.mulf %145, %149 : vector<16x128xf32>
    %151 = vector.broadcast %130 : vector<1x128xf32> to vector<16x128xf32>
    %152 = arith.mulf %150, %151 : vector<16x128xf32>
    %153 = vector.broadcast %132 : vector<1x128xf32> to vector<16x128xf32>
    %154 = arith.addf %152, %153 : vector<16x128xf32>
    %155 = arith.truncf %154 : vector<16x128xf32> to vector<16x128xbf16>
    %c0_59 = arith.constant 0 : index
    %c0_60 = arith.constant 0 : index
    %c0_61 = arith.constant 0 : index
    %156 = vector.load %arg12[%c0_59, %c0_60, %c0_61] : memref<2x128x512xbf16, #tpu.memory_space<vmem>>, vector<1x128x512xbf16>
    %157 = vector.shape_cast %156 : vector<1x128x512xbf16> to vector<128x512xbf16>
    %cst_62 = arith.constant dense<0.000000e+00> : vector<16x512xf32>
    %158 = tpu.matmul %155, %157, %cst_62 {dimension_numbers = #tpu.dot_dimension_numbers<[1], [0], [0], [1], [0, 0, 1, 1], [], []>} : vector<16x128xbf16>, vector<128x512xbf16>, vector<16x512xf32> -> vector<16x512xf32>
    %c0_63 = arith.constant 0 : index
    %c0_64 = arith.constant 0 : index
    %c0_65 = arith.constant 0 : index
    %159 = vector.load %arg13[%c0_63, %c0_64, %c0_65] : memref<2x1x512xf32, #tpu.memory_space<vmem>>, vector<1x1x512xf32>
    %160 = vector.shape_cast %159 : vector<1x1x512xf32> to vector<1x512xf32>
    %161 = vector.broadcast %160 : vector<1x512xf32> to vector<16x512xf32>
    %162 = arith.addf %158, %161 : vector<16x512xf32>
    %cst_66 = arith.constant 0.000000e+00 : f32
    %163 = vector.broadcast %cst_66 : f32 to vector<16x512xf32>
    %164 = arith.maximumf %162, %163 : vector<16x512xf32>
    %165 = arith.truncf %164 : vector<16x512xf32> to vector<16x512xbf16>
    %c0_67 = arith.constant 0 : index
    %c0_68 = arith.constant 0 : index
    %c0_69 = arith.constant 0 : index
    %166 = vector.load %arg14[%c0_67, %c0_68, %c0_69] : memref<2x512x128xbf16, #tpu.memory_space<vmem>>, vector<1x512x128xbf16>
    %167 = vector.shape_cast %166 : vector<1x512x128xbf16> to vector<512x128xbf16>
    %cst_70 = arith.constant dense<0.000000e+00> : vector<16x128xf32>
    %168 = tpu.matmul %165, %167, %cst_70 {dimension_numbers = #tpu.dot_dimension_numbers<[1], [0], [0], [1], [0, 0, 1, 1], [], []>} : vector<16x512xbf16>, vector<512x128xbf16>, vector<16x128xf32> -> vector<16x128xf32>
    %c0_71 = arith.constant 0 : index
    %c0_72 = arith.constant 0 : index
    %c0_73 = arith.constant 0 : index
    %169 = vector.load %arg15[%c0_71, %c0_72, %c0_73] : memref<2x1x128xf32, #tpu.memory_space<vmem>>, vector<1x1x128xf32>
    %170 = vector.shape_cast %169 : vector<1x1x128xf32> to vector<1x128xf32>
    %171 = vector.broadcast %170 : vector<1x128xf32> to vector<16x128xf32>
    %172 = arith.addf %168, %171 : vector<16x128xf32>
    %173 = arith.addf %154, %172 : vector<16x128xf32>
    %c0_74 = arith.constant 0 : index
    %c0_75 = arith.constant 0 : index
    %c0_76 = arith.constant 0 : index
    %174 = vector.load %arg16[%c0_74, %c0_75, %c0_76] : memref<2x1x128xf32, #tpu.memory_space<vmem>>, vector<1x1x128xf32>
    %175 = vector.shape_cast %174 : vector<1x1x128xf32> to vector<1x128xf32>
    %c0_77 = arith.constant 0 : index
    %c0_78 = arith.constant 0 : index
    %c0_79 = arith.constant 0 : index
    %176 = vector.load %arg17[%c0_77, %c0_78, %c0_79] : memref<2x1x128xf32, #tpu.memory_space<vmem>>, vector<1x1x128xf32>
    %177 = vector.shape_cast %176 : vector<1x1x128xf32> to vector<1x128xf32>
    %cst_80 = arith.constant dense<0.000000e+00> : vector<16xf32>
    %178 = vector.multi_reduction <add>, %173, %cst_80 [1] : vector<16x128xf32> to vector<16xf32>
    %179 = vector.shape_cast %178 : vector<16xf32> to vector<16x1xf32>
    %cst_81 = arith.constant 1.280000e+02 : f32
    %180 = vector.broadcast %cst_81 : f32 to vector<16x1xf32>
    %181 = arith.divf %179, %180 : vector<16x1xf32>
    %182 = vector.broadcast %181 : vector<16x1xf32> to vector<16x128xf32>
    %183 = arith.subf %173, %182 : vector<16x128xf32>
    %184 = arith.mulf %183, %183 : vector<16x128xf32>
    %cst_82 = arith.constant dense<0.000000e+00> : vector<16xf32>
    %185 = vector.multi_reduction <add>, %184, %cst_82 [1] : vector<16x128xf32> to vector<16xf32>
    %186 = vector.shape_cast %185 : vector<16xf32> to vector<16x1xf32>
    %cst_83 = arith.constant 1.280000e+02 : f32
    %187 = vector.broadcast %cst_83 : f32 to vector<16x1xf32>
    %188 = arith.divf %186, %187 : vector<16x1xf32>
    %189 = vector.broadcast %181 : vector<16x1xf32> to vector<16x128xf32>
    %190 = arith.subf %173, %189 : vector<16x128xf32>
    %cst_84 = arith.constant 9.99999974E-6 : f32
    %191 = vector.broadcast %cst_84 : f32 to vector<16x1xf32>
    %192 = arith.addf %188, %191 : vector<16x1xf32>
    %193 = math.rsqrt %192 : vector<16x1xf32>
    %194 = vector.broadcast %193 : vector<16x1xf32> to vector<16x128xf32>
    %195 = arith.mulf %190, %194 : vector<16x128xf32>
    %196 = vector.broadcast %175 : vector<1x128xf32> to vector<16x128xf32>
    %197 = arith.mulf %195, %196 : vector<16x128xf32>
    %198 = vector.broadcast %177 : vector<1x128xf32> to vector<16x128xf32>
    %199 = arith.addf %197, %198 : vector<16x128xf32>
    %200 = arith.truncf %199 : vector<16x128xf32> to vector<16x128xbf16>
    %c1 = arith.constant 1 : index
    %c0_85 = arith.constant 0 : index
    %c0_86 = arith.constant 0 : index
    %201 = vector.load %arg6[%c1, %c0_85, %c0_86] : memref<2x128x384xbf16, #tpu.memory_space<vmem>>, vector<1x128x384xbf16>
    %202 = vector.shape_cast %201 : vector<1x128x384xbf16> to vector<128x384xbf16>
    %cst_87 = arith.constant dense<0.000000e+00> : vector<16x384xf32>
    %203 = tpu.matmul %200, %202, %cst_87 {dimension_numbers = #tpu.dot_dimension_numbers<[1], [0], [0], [1], [0, 0, 1, 1], [], []>} : vector<16x128xbf16>, vector<128x384xbf16>, vector<16x384xf32> -> vector<16x384xf32>
    %c1_88 = arith.constant 1 : index
    %c0_89 = arith.constant 0 : index
    %c0_90 = arith.constant 0 : index
    %204 = vector.load %arg7[%c1_88, %c0_89, %c0_90] : memref<2x1x384xf32, #tpu.memory_space<vmem>>, vector<1x1x384xf32>
    %205 = vector.shape_cast %204 : vector<1x1x384xf32> to vector<1x384xf32>
    %206 = vector.broadcast %205 : vector<1x384xf32> to vector<16x384xf32>
    %207 = arith.addf %203, %206 : vector<16x384xf32>
    %208 = arith.truncf %207 : vector<16x384xf32> to vector<16x384xbf16>
    %209 = vector.extract_strided_slice %208 {offsets = [0, 0], sizes = [16, 128], strides = [1, 1]} : vector<16x384xbf16> to vector<16x128xbf16>
    %210 = vector.extract_strided_slice %208 {offsets = [0, 128], sizes = [16, 128], strides = [1, 1]} : vector<16x384xbf16> to vector<16x128xbf16>
    %211 = vector.extract_strided_slice %208 {offsets = [0, 256], sizes = [16, 128], strides = [1, 1]} : vector<16x384xbf16> to vector<16x128xbf16>
    %212 = vector.extract_strided_slice %209 {offsets = [0, 0], sizes = [16, 32], strides = [1, 1]} : vector<16x128xbf16> to vector<16x32xbf16>
    %213 = vector.extract_strided_slice %210 {offsets = [0, 0], sizes = [16, 32], strides = [1, 1]} : vector<16x128xbf16> to vector<16x32xbf16>
    %214 = vector.extract_strided_slice %211 {offsets = [0, 0], sizes = [16, 32], strides = [1, 1]} : vector<16x128xbf16> to vector<16x32xbf16>
    %cst_91 = arith.constant dense<0.000000e+00> : vector<16x16xf32>
    %215 = tpu.matmul %212, %213, %cst_91 {dimension_numbers = #tpu.dot_dimension_numbers<[1], [1], [0], [0], [0, 0, 1, 0], [], []>} : vector<16x32xbf16>, vector<16x32xbf16>, vector<16x16xf32> -> vector<16x16xf32>
    %216 = vector.broadcast %27 : vector<1x16xf32> to vector<16x16xf32>
    %217 = arith.addf %215, %216 : vector<16x16xf32>
    %cst_92 = arith.constant dense<0xFF800000> : vector<16xf32>
    %218 = vector.multi_reduction <maximumf>, %217, %cst_92 [1] : vector<16x16xf32> to vector<16xf32>
    %219 = vector.shape_cast %218 : vector<16xf32> to vector<16x1xf32>
    %220 = vector.broadcast %219 : vector<16x1xf32> to vector<16x16xf32>
    %221 = arith.subf %217, %220 : vector<16x16xf32>
    %222 = math.exp %221 : vector<16x16xf32>
    %cst_93 = arith.constant dense<0.000000e+00> : vector<16xf32>
    %223 = vector.multi_reduction <add>, %222, %cst_93 [1] : vector<16x16xf32> to vector<16xf32>
    %224 = vector.shape_cast %223 : vector<16xf32> to vector<16x1xf32>
    %225 = tpu.reciprocal %224 {approx = true} : vector<16x1xf32> -> vector<16x1xf32>
    %226 = vector.broadcast %225 : vector<16x1xf32> to vector<16x16xf32>
    %227 = arith.mulf %222, %226 : vector<16x16xf32>
    %228 = arith.truncf %227 : vector<16x16xf32> to vector<16x16xbf16>
    %cst_94 = arith.constant dense<0.000000e+00> : vector<16x32xf32>
    %229 = tpu.matmul %228, %214, %cst_94 {dimension_numbers = #tpu.dot_dimension_numbers<[1], [0], [0], [1], [0, 0, 1, 1], [], []>} : vector<16x16xbf16>, vector<16x32xbf16>, vector<16x32xf32> -> vector<16x32xf32>
    %230 = arith.truncf %229 : vector<16x32xf32> to vector<16x32xbf16>
    %c0_95 = arith.constant 0 : index
    %c0_96 = arith.constant 0 : index
    %231 = vector.load %arg22[%c0_95, %c0_96] : memref<16x128xbf16, #tpu.memory_space<vmem>>, vector<16x32xbf16>
    tpu.vector_store %arg22[%c0_95, %c0_96], %230 {strides = array<i32>} : memref<16x128xbf16, #tpu.memory_space<vmem>>, vector<16x32xbf16>,
    %232 = vector.extract_strided_slice %209 {offsets = [0, 32], sizes = [16, 32], strides = [1, 1]} : vector<16x128xbf16> to vector<16x32xbf16>
    %233 = vector.extract_strided_slice %210 {offsets = [0, 32], sizes = [16, 32], strides = [1, 1]} : vector<16x128xbf16> to vector<16x32xbf16>
    %234 = vector.extract_strided_slice %211 {offsets = [0, 32], sizes = [16, 32], strides = [1, 1]} : vector<16x128xbf16> to vector<16x32xbf16>
    %cst_97 = arith.constant dense<0.000000e+00> : vector<16x16xf32>
    %235 = tpu.matmul %232, %233, %cst_97 {dimension_numbers = #tpu.dot_dimension_numbers<[1], [1], [0], [0], [0, 0, 1, 0], [], []>} : vector<16x32xbf16>, vector<16x32xbf16>, vector<16x16xf32> -> vector<16x16xf32>
    %236 = vector.broadcast %27 : vector<1x16xf32> to vector<16x16xf32>
    %237 = arith.addf %235, %236 : vector<16x16xf32>
    %cst_98 = arith.constant dense<0xFF800000> : vector<16xf32>
    %238 = vector.multi_reduction <maximumf>, %237, %cst_98 [1] : vector<16x16xf32> to vector<16xf32>
    %239 = vector.shape_cast %238 : vector<16xf32> to vector<16x1xf32>
    %240 = vector.broadcast %239 : vector<16x1xf32> to vector<16x16xf32>
    %241 = arith.subf %237, %240 : vector<16x16xf32>
    %242 = math.exp %241 : vector<16x16xf32>
    %cst_99 = arith.constant dense<0.000000e+00> : vector<16xf32>
    %243 = vector.multi_reduction <add>, %242, %cst_99 [1] : vector<16x16xf32> to vector<16xf32>
    %244 = vector.shape_cast %243 : vector<16xf32> to vector<16x1xf32>
    %245 = tpu.reciprocal %244 {approx = true} : vector<16x1xf32> -> vector<16x1xf32>
    %246 = vector.broadcast %245 : vector<16x1xf32> to vector<16x16xf32>
    %247 = arith.mulf %242, %246 : vector<16x16xf32>
    %248 = arith.truncf %247 : vector<16x16xf32> to vector<16x16xbf16>
    %cst_100 = arith.constant dense<0.000000e+00> : vector<16x32xf32>
    %249 = tpu.matmul %248, %234, %cst_100 {dimension_numbers = #tpu.dot_dimension_numbers<[1], [0], [0], [1], [0, 0, 1, 1], [], []>} : vector<16x16xbf16>, vector<16x32xbf16>, vector<16x32xf32> -> vector<16x32xf32>
    %250 = arith.truncf %249 : vector<16x32xf32> to vector<16x32xbf16>
    %c0_101 = arith.constant 0 : index
    %c32_102 = arith.constant 32 : index
    %251 = vector.load %arg22[%c0_101, %c32_102] : memref<16x128xbf16, #tpu.memory_space<vmem>>, vector<16x32xbf16>
    tpu.vector_store %arg22[%c0_101, %c32_102], %250 {strides = array<i32>} : memref<16x128xbf16, #tpu.memory_space<vmem>>, vector<16x32xbf16>,
    %252 = vector.extract_strided_slice %209 {offsets = [0, 64], sizes = [16, 32], strides = [1, 1]} : vector<16x128xbf16> to vector<16x32xbf16>
    %253 = vector.extract_strided_slice %210 {offsets = [0, 64], sizes = [16, 32], strides = [1, 1]} : vector<16x128xbf16> to vector<16x32xbf16>
    %254 = vector.extract_strided_slice %211 {offsets = [0, 64], sizes = [16, 32], strides = [1, 1]} : vector<16x128xbf16> to vector<16x32xbf16>
    %cst_103 = arith.constant dense<0.000000e+00> : vector<16x16xf32>
    %255 = tpu.matmul %252, %253, %cst_103 {dimension_numbers = #tpu.dot_dimension_numbers<[1], [1], [0], [0], [0, 0, 1, 0], [], []>} : vector<16x32xbf16>, vector<16x32xbf16>, vector<16x16xf32> -> vector<16x16xf32>
    %256 = vector.broadcast %27 : vector<1x16xf32> to vector<16x16xf32>
    %257 = arith.addf %255, %256 : vector<16x16xf32>
    %cst_104 = arith.constant dense<0xFF800000> : vector<16xf32>
    %258 = vector.multi_reduction <maximumf>, %257, %cst_104 [1] : vector<16x16xf32> to vector<16xf32>
    %259 = vector.shape_cast %258 : vector<16xf32> to vector<16x1xf32>
    %260 = vector.broadcast %259 : vector<16x1xf32> to vector<16x16xf32>
    %261 = arith.subf %257, %260 : vector<16x16xf32>
    %262 = math.exp %261 : vector<16x16xf32>
    %cst_105 = arith.constant dense<0.000000e+00> : vector<16xf32>
    %263 = vector.multi_reduction <add>, %262, %cst_105 [1] : vector<16x16xf32> to vector<16xf32>
    %264 = vector.shape_cast %263 : vector<16xf32> to vector<16x1xf32>
    %265 = tpu.reciprocal %264 {approx = true} : vector<16x1xf32> -> vector<16x1xf32>
    %266 = vector.broadcast %265 : vector<16x1xf32> to vector<16x16xf32>
    %267 = arith.mulf %262, %266 : vector<16x16xf32>
    %268 = arith.truncf %267 : vector<16x16xf32> to vector<16x16xbf16>
    %cst_106 = arith.constant dense<0.000000e+00> : vector<16x32xf32>
    %269 = tpu.matmul %268, %254, %cst_106 {dimension_numbers = #tpu.dot_dimension_numbers<[1], [0], [0], [1], [0, 0, 1, 1], [], []>} : vector<16x16xbf16>, vector<16x32xbf16>, vector<16x32xf32> -> vector<16x32xf32>
    %270 = arith.truncf %269 : vector<16x32xf32> to vector<16x32xbf16>
    %c0_107 = arith.constant 0 : index
    %c64_108 = arith.constant 64 : index
    %271 = vector.load %arg22[%c0_107, %c64_108] : memref<16x128xbf16, #tpu.memory_space<vmem>>, vector<16x32xbf16>
    tpu.vector_store %arg22[%c0_107, %c64_108], %270 {strides = array<i32>} : memref<16x128xbf16, #tpu.memory_space<vmem>>, vector<16x32xbf16>,
    %272 = vector.extract_strided_slice %209 {offsets = [0, 96], sizes = [16, 32], strides = [1, 1]} : vector<16x128xbf16> to vector<16x32xbf16>
    %273 = vector.extract_strided_slice %210 {offsets = [0, 96], sizes = [16, 32], strides = [1, 1]} : vector<16x128xbf16> to vector<16x32xbf16>
    %274 = vector.extract_strided_slice %211 {offsets = [0, 96], sizes = [16, 32], strides = [1, 1]} : vector<16x128xbf16> to vector<16x32xbf16>
    %cst_109 = arith.constant dense<0.000000e+00> : vector<16x16xf32>
    %275 = tpu.matmul %272, %273, %cst_109 {dimension_numbers = #tpu.dot_dimension_numbers<[1], [1], [0], [0], [0, 0, 1, 0], [], []>} : vector<16x32xbf16>, vector<16x32xbf16>, vector<16x16xf32> -> vector<16x16xf32>
    %276 = vector.broadcast %27 : vector<1x16xf32> to vector<16x16xf32>
    %277 = arith.addf %275, %276 : vector<16x16xf32>
    %cst_110 = arith.constant dense<0xFF800000> : vector<16xf32>
    %278 = vector.multi_reduction <maximumf>, %277, %cst_110 [1] : vector<16x16xf32> to vector<16xf32>
    %279 = vector.shape_cast %278 : vector<16xf32> to vector<16x1xf32>
    %280 = vector.broadcast %279 : vector<16x1xf32> to vector<16x16xf32>
    %281 = arith.subf %277, %280 : vector<16x16xf32>
    %282 = math.exp %281 : vector<16x16xf32>
    %cst_111 = arith.constant dense<0.000000e+00> : vector<16xf32>
    %283 = vector.multi_reduction <add>, %282, %cst_111 [1] : vector<16x16xf32> to vector<16xf32>
    %284 = vector.shape_cast %283 : vector<16xf32> to vector<16x1xf32>
    %285 = tpu.reciprocal %284 {approx = true} : vector<16x1xf32> -> vector<16x1xf32>
    %286 = vector.broadcast %285 : vector<16x1xf32> to vector<16x16xf32>
    %287 = arith.mulf %282, %286 : vector<16x16xf32>
    %288 = arith.truncf %287 : vector<16x16xf32> to vector<16x16xbf16>
    %cst_112 = arith.constant dense<0.000000e+00> : vector<16x32xf32>
    %289 = tpu.matmul %288, %274, %cst_112 {dimension_numbers = #tpu.dot_dimension_numbers<[1], [0], [0], [1], [0, 0, 1, 1], [], []>} : vector<16x16xbf16>, vector<16x32xbf16>, vector<16x32xf32> -> vector<16x32xf32>
    %290 = arith.truncf %289 : vector<16x32xf32> to vector<16x32xbf16>
    %c0_113 = arith.constant 0 : index
    %c96_114 = arith.constant 96 : index
    %291 = vector.load %arg22[%c0_113, %c96_114] : memref<16x128xbf16, #tpu.memory_space<vmem>>, vector<16x32xbf16>
    tpu.vector_store %arg22[%c0_113, %c96_114], %290 {strides = array<i32>} : memref<16x128xbf16, #tpu.memory_space<vmem>>, vector<16x32xbf16>,
    %c0_115 = arith.constant 0 : index
    %c0_116 = arith.constant 0 : index
    %292 = vector.load %arg22[%c0_115, %c0_116] : memref<16x128xbf16, #tpu.memory_space<vmem>>, vector<16x128xbf16>
    %c1_117 = arith.constant 1 : index
    %c0_118 = arith.constant 0 : index
    %c0_119 = arith.constant 0 : index
    %293 = vector.load %arg8[%c1_117, %c0_118, %c0_119] : memref<2x128x128xbf16, #tpu.memory_space<vmem>>, vector<1x128x128xbf16>
    %294 = vector.shape_cast %293 : vector<1x128x128xbf16> to vector<128x128xbf16>
    %cst_120 = arith.constant dense<0.000000e+00> : vector<16x128xf32>
    %295 = tpu.matmul %292, %294, %cst_120 {dimension_numbers = #tpu.dot_dimension_numbers<[1], [0], [0], [1], [0, 0, 1, 1], [], []>} : vector<16x128xbf16>, vector<128x128xbf16>, vector<16x128xf32> -> vector<16x128xf32>
    %c1_121 = arith.constant 1 : index
    %c0_122 = arith.constant 0 : index
    %c0_123 = arith.constant 0 : index
    %296 = vector.load %arg9[%c1_121, %c0_122, %c0_123] : memref<2x1x128xf32, #tpu.memory_space<vmem>>, vector<1x1x128xf32>
    %297 = vector.shape_cast %296 : vector<1x1x128xf32> to vector<1x128xf32>
    %298 = vector.broadcast %297 : vector<1x128xf32> to vector<16x128xf32>
    %299 = arith.addf %295, %298 : vector<16x128xf32>
    %300 = arith.addf %199, %299 : vector<16x128xf32>
    %c1_124 = arith.constant 1 : index
    %c0_125 = arith.constant 0 : index
    %c0_126 = arith.constant 0 : index
    %301 = vector.load %arg10[%c1_124, %c0_125, %c0_126] : memref<2x1x128xf32, #tpu.memory_space<vmem>>, vector<1x1x128xf32>
    %302 = vector.shape_cast %301 : vector<1x1x128xf32> to vector<1x128xf32>
    %c1_127 = arith.constant 1 : index
    %c0_128 = arith.constant 0 : index
    %c0_129 = arith.constant 0 : index
    %303 = vector.load %arg11[%c1_127, %c0_128, %c0_129] : memref<2x1x128xf32, #tpu.memory_space<vmem>>, vector<1x1x128xf32>
    %304 = vector.shape_cast %303 : vector<1x1x128xf32> to vector<1x128xf32>
    %cst_130 = arith.constant dense<0.000000e+00> : vector<16xf32>
    %305 = vector.multi_reduction <add>, %300, %cst_130 [1] : vector<16x128xf32> to vector<16xf32>
    %306 = vector.shape_cast %305 : vector<16xf32> to vector<16x1xf32>
    %cst_131 = arith.constant 1.280000e+02 : f32
    %307 = vector.broadcast %cst_131 : f32 to vector<16x1xf32>
    %308 = arith.divf %306, %307 : vector<16x1xf32>
    %309 = vector.broadcast %308 : vector<16x1xf32> to vector<16x128xf32>
    %310 = arith.subf %300, %309 : vector<16x128xf32>
    %311 = arith.mulf %310, %310 : vector<16x128xf32>
    %cst_132 = arith.constant dense<0.000000e+00> : vector<16xf32>
    %312 = vector.multi_reduction <add>, %311, %cst_132 [1] : vector<16x128xf32> to vector<16xf32>
    %313 = vector.shape_cast %312 : vector<16xf32> to vector<16x1xf32>
    %cst_133 = arith.constant 1.280000e+02 : f32
    %314 = vector.broadcast %cst_133 : f32 to vector<16x1xf32>
    %315 = arith.divf %313, %314 : vector<16x1xf32>
    %316 = vector.broadcast %308 : vector<16x1xf32> to vector<16x128xf32>
    %317 = arith.subf %300, %316 : vector<16x128xf32>
    %cst_134 = arith.constant 9.99999974E-6 : f32
    %318 = vector.broadcast %cst_134 : f32 to vector<16x1xf32>
    %319 = arith.addf %315, %318 : vector<16x1xf32>
    %320 = math.rsqrt %319 : vector<16x1xf32>
    %321 = vector.broadcast %320 : vector<16x1xf32> to vector<16x128xf32>
    %322 = arith.mulf %317, %321 : vector<16x128xf32>
    %323 = vector.broadcast %302 : vector<1x128xf32> to vector<16x128xf32>
    %324 = arith.mulf %322, %323 : vector<16x128xf32>
    %325 = vector.broadcast %304 : vector<1x128xf32> to vector<16x128xf32>
    %326 = arith.addf %324, %325 : vector<16x128xf32>
    %327 = arith.truncf %326 : vector<16x128xf32> to vector<16x128xbf16>
    %c1_135 = arith.constant 1 : index
    %c0_136 = arith.constant 0 : index
    %c0_137 = arith.constant 0 : index
    %328 = vector.load %arg12[%c1_135, %c0_136, %c0_137] : memref<2x128x512xbf16, #tpu.memory_space<vmem>>, vector<1x128x512xbf16>
    %329 = vector.shape_cast %328 : vector<1x128x512xbf16> to vector<128x512xbf16>
    %cst_138 = arith.constant dense<0.000000e+00> : vector<16x512xf32>
    %330 = tpu.matmul %327, %329, %cst_138 {dimension_numbers = #tpu.dot_dimension_numbers<[1], [0], [0], [1], [0, 0, 1, 1], [], []>} : vector<16x128xbf16>, vector<128x512xbf16>, vector<16x512xf32> -> vector<16x512xf32>
    %c1_139 = arith.constant 1 : index
    %c0_140 = arith.constant 0 : index
    %c0_141 = arith.constant 0 : index
    %331 = vector.load %arg13[%c1_139, %c0_140, %c0_141] : memref<2x1x512xf32, #tpu.memory_space<vmem>>, vector<1x1x512xf32>
    %332 = vector.shape_cast %331 : vector<1x1x512xf32> to vector<1x512xf32>
    %333 = vector.broadcast %332 : vector<1x512xf32> to vector<16x512xf32>
    %334 = arith.addf %330, %333 : vector<16x512xf32>
    %cst_142 = arith.constant 0.000000e+00 : f32
    %335 = vector.broadcast %cst_142 : f32 to vector<16x512xf32>
    %336 = arith.maximumf %334, %335 : vector<16x512xf32>
    %337 = arith.truncf %336 : vector<16x512xf32> to vector<16x512xbf16>
    %c1_143 = arith.constant 1 : index
    %c0_144 = arith.constant 0 : index
    %c0_145 = arith.constant 0 : index
    %338 = vector.load %arg14[%c1_143, %c0_144, %c0_145] : memref<2x512x128xbf16, #tpu.memory_space<vmem>>, vector<1x512x128xbf16>
    %339 = vector.shape_cast %338 : vector<1x512x128xbf16> to vector<512x128xbf16>
    %cst_146 = arith.constant dense<0.000000e+00> : vector<16x128xf32>
    %340 = tpu.matmul %337, %339, %cst_146 {dimension_numbers = #tpu.dot_dimension_numbers<[1], [0], [0], [1], [0, 0, 1, 1], [], []>} : vector<16x512xbf16>, vector<512x128xbf16>, vector<16x128xf32> -> vector<16x128xf32>
    %c1_147 = arith.constant 1 : index
    %c0_148 = arith.constant 0 : index
    %c0_149 = arith.constant 0 : index
    %341 = vector.load %arg15[%c1_147, %c0_148, %c0_149] : memref<2x1x128xf32, #tpu.memory_space<vmem>>, vector<1x1x128xf32>
    %342 = vector.shape_cast %341 : vector<1x1x128xf32> to vector<1x128xf32>
    %343 = vector.broadcast %342 : vector<1x128xf32> to vector<16x128xf32>
    %344 = arith.addf %340, %343 : vector<16x128xf32>
    %345 = arith.addf %326, %344 : vector<16x128xf32>
    %c1_150 = arith.constant 1 : index
    %c0_151 = arith.constant 0 : index
    %c0_152 = arith.constant 0 : index
    %346 = vector.load %arg16[%c1_150, %c0_151, %c0_152] : memref<2x1x128xf32, #tpu.memory_space<vmem>>, vector<1x1x128xf32>
    %347 = vector.shape_cast %346 : vector<1x1x128xf32> to vector<1x128xf32>
    %c1_153 = arith.constant 1 : index
    %c0_154 = arith.constant 0 : index
    %c0_155 = arith.constant 0 : index
    %348 = vector.load %arg17[%c1_153, %c0_154, %c0_155] : memref<2x1x128xf32, #tpu.memory_space<vmem>>, vector<1x1x128xf32>
    %349 = vector.shape_cast %348 : vector<1x1x128xf32> to vector<1x128xf32>
    %cst_156 = arith.constant dense<0.000000e+00> : vector<16xf32>
    %350 = vector.multi_reduction <add>, %345, %cst_156 [1] : vector<16x128xf32> to vector<16xf32>
    %351 = vector.shape_cast %350 : vector<16xf32> to vector<16x1xf32>
    %cst_157 = arith.constant 1.280000e+02 : f32
    %352 = vector.broadcast %cst_157 : f32 to vector<16x1xf32>
    %353 = arith.divf %351, %352 : vector<16x1xf32>
    %354 = vector.broadcast %353 : vector<16x1xf32> to vector<16x128xf32>
    %355 = arith.subf %345, %354 : vector<16x128xf32>
    %356 = arith.mulf %355, %355 : vector<16x128xf32>
    %cst_158 = arith.constant dense<0.000000e+00> : vector<16xf32>
    %357 = vector.multi_reduction <add>, %356, %cst_158 [1] : vector<16x128xf32> to vector<16xf32>
    %358 = vector.shape_cast %357 : vector<16xf32> to vector<16x1xf32>
    %cst_159 = arith.constant 1.280000e+02 : f32
    %359 = vector.broadcast %cst_159 : f32 to vector<16x1xf32>
    %360 = arith.divf %358, %359 : vector<16x1xf32>
    %361 = vector.broadcast %353 : vector<16x1xf32> to vector<16x128xf32>
    %362 = arith.subf %345, %361 : vector<16x128xf32>
    %cst_160 = arith.constant 9.99999974E-6 : f32
    %363 = vector.broadcast %cst_160 : f32 to vector<16x1xf32>
    %364 = arith.addf %360, %363 : vector<16x1xf32>
    %365 = math.rsqrt %364 : vector<16x1xf32>
    %366 = vector.broadcast %365 : vector<16x1xf32> to vector<16x128xf32>
    %367 = arith.mulf %362, %366 : vector<16x128xf32>
    %368 = vector.broadcast %347 : vector<1x128xf32> to vector<16x128xf32>
    %369 = arith.mulf %367, %368 : vector<16x128xf32>
    %370 = vector.broadcast %349 : vector<1x128xf32> to vector<16x128xf32>
    %371 = arith.addf %369, %370 : vector<16x128xf32>
    %c0_161 = arith.constant 0 : index
    %c0_162 = arith.constant 0 : index
    %c0_163 = arith.constant 0 : index
    %372 = vector.load %arg20[%c0_161, %c0_162, %c0_163] : memref<1x16x128xf32, #tpu.memory_space<vmem>>, vector<1x16x128xf32>
    %373 = vector.shape_cast %372 : vector<1x16x128xf32> to vector<16x128xf32>
    %374 = vector.shape_cast %371 : vector<16x128xf32> to vector<1x16x128xf32>
    tpu.vector_store %arg20[%c0_161, %c0_162, %c0_163], %374 {strides = array<i32>} : memref<1x16x128xf32, #tpu.memory_space<vmem>>, vector<1x16x128xf32>,
    %375 = arith.truncf %371 : vector<16x128xf32> to vector<16x128xbf16>
    %c0_164 = arith.constant 0 : index
    %c0_165 = arith.constant 0 : index
    %376 = vector.load %arg18[%c0_164, %c0_165] : memref<128x128xbf16, #tpu.memory_space<vmem>>, vector<128x128xbf16>
    %cst_166 = arith.constant dense<0.000000e+00> : vector<16x128xf32>
    %377 = tpu.matmul %375, %376, %cst_166 {dimension_numbers = #tpu.dot_dimension_numbers<[1], [0], [0], [1], [0, 0, 1, 1], [], []>} : vector<16x128xbf16>, vector<128x128xbf16>, vector<16x128xf32> -> vector<16x128xf32>
    %c0_167 = arith.constant 0 : index
    %c0_168 = arith.constant 0 : index
    %378 = vector.load %arg19[%c0_167, %c0_168] : memref<1x128xf32, #tpu.memory_space<vmem>>, vector<1x128xf32>
    %379 = vector.broadcast %378 : vector<1x128xf32> to vector<16x128xf32>
    %380 = arith.addf %377, %379 : vector<16x128xf32>
    %381 = arith.truncf %380 : vector<16x128xf32> to vector<16x128xbf16>
    %c0_169 = arith.constant 0 : index
    %c0_170 = arith.constant 0 : index
    %c0_171 = arith.constant 0 : index
    %382 = vector.load %arg21[%c0_169, %c0_170, %c0_171] : memref<1x16x128xbf16, #tpu.memory_space<vmem>>, vector<1x16x128xbf16>
    %383 = vector.shape_cast %382 : vector<1x16x128xbf16> to vector<16x128xbf16>
    %384 = vector.shape_cast %381 : vector<16x128xbf16> to vector<1x16x128xbf16>
    tpu.vector_store %arg21[%c0_169, %c0_170, %c0_171], %384 {strides = array<i32>} : memref<1x16x128xbf16, #tpu.memory_space<vmem>>, vector<1x16x128xbf16>,
    return
  }
  func.func @transform_0(%arg0: i32) -> (i32, i32, i32) {
    %c0_i32 = arith.constant 0 : i32
    %c0_i32_0 = arith.constant 0 : i32
    %c0_i32_1 = arith.constant 0 : i32
    return %arg0, %c0_i32, %c0_i32_0 : i32, i32, i32
  }
  func.func @transform_1(%arg0: i32) -> (i32, i32, i32) {
    %c0_i32 = arith.constant 0 : i32
    %c0_i32_0 = arith.constant 0 : i32
    %c0_i32_1 = arith.constant 0 : i32
    return %arg0, %c0_i32, %c0_i32_0 : i32, i32, i32
  }
  func.func @transform_2(%arg0: i32) -> (i32, i32, i32) {
    %c0_i32 = arith.constant 0 : i32
    %c0_i32_0 = arith.constant 0 : i32
    %c0_i32_1 = arith.constant 0 : i32
    return %arg0, %c0_i32, %c0_i32_0 : i32, i32, i32
  }
  func.func @transform_3(%arg0: i32) -> (i32, i32) {
    %c0_i32 = arith.constant 0 : i32
    %c0_i32_0 = arith.constant 0 : i32
    %c0_i32_1 = arith.constant 0 : i32
    return %c0_i32, %c0_i32_0 : i32, i32
  }
  func.func @transform_4(%arg0: i32) -> (i32, i32) {
    %c0_i32 = arith.constant 0 : i32
    %c0_i32_0 = arith.constant 0 : i32
    %c0_i32_1 = arith.constant 0 : i32
    return %c0_i32, %c0_i32_0 : i32, i32
  }
  func.func @transform_5(%arg0: i32) -> (i32, i32, i32) {
    %c0_i32 = arith.constant 0 : i32
    %c0_i32_0 = arith.constant 0 : i32
    %c0_i32_1 = arith.constant 0 : i32
    %c0_i32_2 = arith.constant 0 : i32
    return %c0_i32, %c0_i32_0, %c0_i32_1 : i32, i32, i32
  }
  func.func @transform_6(%arg0: i32) -> (i32, i32, i32) {
    %c0_i32 = arith.constant 0 : i32
    %c0_i32_0 = arith.constant 0 : i32
    %c0_i32_1 = arith.constant 0 : i32
    %c0_i32_2 = arith.constant 0 : i32
    return %c0_i32, %c0_i32_0, %c0_i32_1 : i32, i32, i32
  }
  func.func @transform_7(%arg0: i32) -> (i32, i32, i32) {
    %c0_i32 = arith.constant 0 : i32
    %c0_i32_0 = arith.constant 0 : i32
    %c0_i32_1 = arith.constant 0 : i32
    %c0_i32_2 = arith.constant 0 : i32
    return %c0_i32, %c0_i32_0, %c0_i32_1 : i32, i32, i32
  }
  func.func @transform_8(%arg0: i32) -> (i32, i32, i32) {
    %c0_i32 = arith.constant 0 : i32
    %c0_i32_0 = arith.constant 0 : i32
    %c0_i32_1 = arith.constant 0 : i32
    %c0_i32_2 = arith.constant 0 : i32
    return %c0_i32, %c0_i32_0, %c0_i32_1 : i32, i32, i32
  }
  func.func @transform_9(%arg0: i32) -> (i32, i32, i32) {
    %c0_i32 = arith.constant 0 : i32
    %c0_i32_0 = arith.constant 0 : i32
    %c0_i32_1 = arith.constant 0 : i32
    %c0_i32_2 = arith.constant 0 : i32
    return %c0_i32, %c0_i32_0, %c0_i32_1 : i32, i32, i32
  }
  func.func @transform_10(%arg0: i32) -> (i32, i32, i32) {
    %c0_i32 = arith.constant 0 : i32
    %c0_i32_0 = arith.constant 0 : i32
    %c0_i32_1 = arith.constant 0 : i32
    %c0_i32_2 = arith.constant 0 : i32
    return %c0_i32, %c0_i32_0, %c0_i32_1 : i32, i32, i32
  }
  func.func @transform_11(%arg0: i32) -> (i32, i32, i32) {
    %c0_i32 = arith.constant 0 : i32
    %c0_i32_0 = arith.constant 0 : i32
    %c0_i32_1 = arith.constant 0 : i32
    %c0_i32_2 = arith.constant 0 : i32
    return %c0_i32, %c0_i32_0, %c0_i32_1 : i32, i32, i32
  }
  func.func @transform_12(%arg0: i32) -> (i32, i32, i32) {
    %c0_i32 = arith.constant 0 : i32
    %c0_i32_0 = arith.constant 0 : i32
    %c0_i32_1 = arith.constant 0 : i32
    %c0_i32_2 = arith.constant 0 : i32
    return %c0_i32, %c0_i32_0, %c0_i32_1 : i32, i32, i32
  }
  func.func @transform_13(%arg0: i32) -> (i32, i32, i32) {
    %c0_i32 = arith.constant 0 : i32
    %c0_i32_0 = arith.constant 0 : i32
    %c0_i32_1 = arith.constant 0 : i32
    %c0_i32_2 = arith.constant 0 : i32
    return %c0_i32, %c0_i32_0, %c0_i32_1 : i32, i32, i32
  }
  func.func @transform_14(%arg0: i32) -> (i32, i32, i32) {
    %c0_i32 = arith.constant 0 : i32
    %c0_i32_0 = arith.constant 0 : i32
    %c0_i32_1 = arith.constant 0 : i32
    %c0_i32_2 = arith.constant 0 : i32
    return %c0_i32, %c0_i32_0, %c0_i32_1 : i32, i32, i32
  }
  func.func @transform_15(%arg0: i32) -> (i32, i32, i32) {
    %c0_i32 = arith.constant 0 : i32
    %c0_i32_0 = arith.constant 0 : i32
    %c0_i32_1 = arith.constant 0 : i32
    %c0_i32_2 = arith.constant 0 : i32
    return %c0_i32, %c0_i32_0, %c0_i32_1 : i32, i32, i32
  }
  func.func @transform_16(%arg0: i32) -> (i32, i32, i32) {
    %c0_i32 = arith.constant 0 : i32
    %c0_i32_0 = arith.constant 0 : i32
    %c0_i32_1 = arith.constant 0 : i32
    %c0_i32_2 = arith.constant 0 : i32
    return %c0_i32, %c0_i32_0, %c0_i32_1 : i32, i32, i32
  }
  func.func @transform_17(%arg0: i32) -> (i32, i32) {
    %c0_i32 = arith.constant 0 : i32
    %c0_i32_0 = arith.constant 0 : i32
    %c0_i32_1 = arith.constant 0 : i32
    return %c0_i32, %c0_i32_0 : i32, i32
  }
  func.func @transform_18(%arg0: i32) -> (i32, i32) {
    %c0_i32 = arith.constant 0 : i32
    %c0_i32_0 = arith.constant 0 : i32
    %c0_i32_1 = arith.constant 0 : i32
    return %c0_i32, %c0_i32_0 : i32, i32
  }
  func.func @transform_19(%arg0: i32) -> (i32, i32, i32) {
    %c0_i32 = arith.constant 0 : i32
    %c0_i32_0 = arith.constant 0 : i32
    %c0_i32_1 = arith.constant 0 : i32
    return %arg0, %c0_i32, %c0_i32_0 : i32, i32, i32
  }
  func.func @transform_20(%arg0: i32) -> (i32, i32, i32) {
    %c0_i32 = arith.constant 0 : i32
    %c0_i32_0 = arith.constant 0 : i32
    %c0_i32_1 = arith.constant 0 : i32
    return %arg0, %c0_i32, %c0_i32_0 : i32, i32, i32
  }
}

</mosaic_0001>

<bundles_post_ra>
// kernel: tpu_custom_call.1
= control target key start
LH: loop header
LB: loop body
LE: loop exit
PB: predicated region body
PF: predicated region fallthrough
CT: control target
= control target key end

     0   :  { %s7359_s0 = inlined_call_operand.vmem [shape: f32[2,16,128], index: 0, kind: input, shape index: {}]   ;;  %s7360_s1 = inlined_call_operand.vmem [shape: f32[2,16,3], index: 1, kind: input, shape index: {}]   ;;  %s7361_s2 = inlined_call_operand.hbm [shape: f32[2,1,16], index: 2, kind: input, shape index: {}]   ;;  %s7362_s3 = inlined_call_operand.hbm [shape: f32[3,128], index: 3, kind: input, shape index: {}]   ;;  %s7363_s4 = inlined_call_operand.hbm [shape: f32[1,128], index: 4, kind: input, shape index: {}]   ;;  %s7364_s5 = inlined_call_operand.hbm [shape: bf16[2,128,384], index: 5, kind: input, shape index: {}]   ;;  %s7365_s6 = inlined_call_operand.vmem [shape: f32[2,1,384], index: 6, kind: input, shape index: {}]   ;;  %s7366_s7 = inlined_call_operand.hbm [shape: bf16[2,128,128], index: 7, kind: input, shape index: {}]   ;;  %s7367_s8 = inlined_call_operand.hbm [shape: f32[2,1,128], index: 8, kind: input, shape index: {}]   ;;  %s7368_s9 = inlined_call_operand.hbm [shape: f32[2,1,128], index: 9, kind: input, shape index: {}]   ;;  %s7369_s10 = inlined_call_operand.hbm [shape: f32[2,1,128], index: 10, kind: input, shape index: {}]   ;;  %s7370_s11 = inlined_call_operand.hbm [shape: bf16[2,128,512], index: 11, kind: input, shape index: {}]   ;;  %s7371_s12 = inlined_call_operand.hbm [shape: f32[2,1,512], index: 12, kind: input, shape index: {}]   ;;  %s7372_s13 = inlined_call_operand.hbm [shape: bf16[2,512,128], index: 13, kind: input, shape index: {}]   ;;  %s7373_s14 = inlined_call_operand.hbm [shape: f32[2,1,128], index: 14, kind: input, shape index: {}]   ;;  %s7374_s15 = inlined_call_operand.hbm [shape: f32[2,1,128], index: 15, kind: input, shape index: {}]   ;;  %s7375_s16 = inlined_call_operand.hbm [shape: f32[2,1,128], index: 16, kind: input, shape index: {}]   ;;  %s7376_s17 = inlined_call_operand.vmem [shape: bf16[128,128], index: 17, kind: input, shape index: {}]   ;;  %s7377_s18 = inlined_call_operand.vmem [shape: f32[1,128], index: 18, kind: input, shape index: {}]   ;;  %s7378_s19 = inlined_call_operand.hbm [shape: f32[2,16,128], index: 19, kind: output, shape index: {0}]   ;;  %s7379_s20 = inlined_call_operand.hbm [shape: bf16[2,16,128], index: 20, kind: output, shape index: {1}]  }
   0x1   :  { %7401 = sst [smem:[#allocation40_spill]] %s7359_s0 }
   0x2   :  { %7402 = sst [smem:[#allocation41_spill]] %s7360_s1 }
   0x3   :  { %7403 = sst [smem:[#allocation42_spill]] %s7361_s2 }
   0x4   :  { %7404 = sst [smem:[#allocation43_spill]] %s7362_s3 }
   0x5   :  { %7405 = sst [smem:[#allocation44_spill]] %s7363_s4 }
   0x6   :  { %7406 = sst [smem:[#allocation45_spill]] %s7364_s5 }
   0x7   :  { %7407 = sst [smem:[#allocation46_spill]] %s7365_s6 }
   0x8   :  { %7408 = sst [smem:[#allocation47_spill]] %s7366_s7 }
   0x9   :  { %7409 = sst [smem:[#allocation48_spill]] %s7367_s8 }
   0xa   :  { %7410 = sst [smem:[#allocation49_spill]] %s7368_s9 }
   0xb   :  { %7411 = sst [smem:[#allocation50_spill]] %s7369_s10 }
   0xc   :  { %7412 = sst [smem:[#allocation51_spill]] %s7370_s11 }
   0xd   :  { %7413 = sst [smem:[#allocation52_spill]] %s7371_s12 }
   0xe   :  { %7414 = sst [smem:[#allocation53_spill]] %s7376_s17 }
   0xf   :  { %7415 = sst [smem:[#allocation54_spill]] %s7377_s18 }
  0x10   :  { %7416 = sst [smem:[#allocation55_spill]] %s7378_s19 }
  0x11   :  { %7417 = sst [smem:[#allocation56_spill]] %s7379_s20 }
  0x12   :  { %26 = vsyncpa [#allocation4], 0 }
  0x13   :  { %28 = vsyncpa [#allocation4 + $0x1], 0 }
  0x14   :  { %29 = vsyncpa [#allocation7], 0 }
  0x15   :  { %30 = vsyncpa [#allocation10], 0 }
  0x16   :  { %31 = vsyncpa [#allocation13], 0 }
  0x17   :  { %32 = vsyncpa [#allocation16], 0 }
  0x18   :  { %33 = vsyncpa [#allocation19], 0 }
  0x19   :  { %34 = vsyncpa [#allocation22], 0 }
  0x1a   :  { %35 = vsyncpa [#allocation25], 0 }
  0x1b   :  { %36 = vsyncpa [#allocation5], 0 }
  0x1c   :  { %38 = vsyncpa [#allocation5 + $0x1], 0 }
  0x1d   :  { %39 = vsyncpa [#allocation28], 0 }
  0x1e   :  { %41 = vsyncpa [#allocation28 + $0x1], 0  ;;  %s6463_s1 = smov 0   ;;  %s6465_s22 = smov 0  }
  0x1f   :  { %s6467_s23 = smov 0   ;;  %s6469_s24 = smov 0  }
  0x20 LB: > { %s6324_s2 = smov [#allocation6]   ;;  %s6484_s3 = sadd.s32 4294967295, %s6322_s24   ;;  %s6322_s24 = sphi %s6469_s24, %s7472_s24   ;;  %s6318_s23 = sphi %s6467_s23, %s7471_s23   ;;  %s6314_s22 = sphi %s6465_s22, %s7470_s22   ;;  %s6310_s1 = sphi %s6463_s1, %s7469_s1  }
  0x21   : > { %s531_s25 = sshll.u32 %s6324_s2, 4  ;;  %p4619_p0 = scmp.ge.s32.totalorder %s6322_s24, 1  ;;  %s532_s25 = int_to_ptr.vmem [resolvable:$true] %s531_s25 }
  0x22   : > { %p7386_p1 = scmp.eq.s32.totalorder %s6484_s3, 0  ;;  %p518_p2 = scmp.lt.s32.totalorder %s6322_s24, 3 }
  0x23   : > { %s6325_s27 = smov [#allocation9]   ;;  %s6326_s29 = smov [#allocation12]  }
  0x24   : > { %p6489_p3 = pnand %p4619_p0, %p518_p2  ;;  %s552_s28 = sshll.u32 %s6325_s27, 4  ;;  %s6496_s28 = int_to_ptr.vmem [resolvable:$true] %s552_s28 }
  0x25   : > { %s581_s30 = sshll.u32 %s6326_s29, 4  ;;  %s7421_s2 = sld [smem:[#allocation43_spill]]  ;;  %s6504_s30 = int_to_ptr.vmem [resolvable:$true] %s581_s30 }
  0x26   : > { %s7418_s26 = scalar_select %p6489_p3, 1, 0 }
  0x27   : > { %p5327_p5 = pneg %p6489_p3 }
  0x28   : > { %7419 = sst [smem:[#allocation39_spill]] %s7418_s26 }
  0x29   : > { %p6500_p6 = pnand %p5327_p5, %p7386_p1 }
  0x2b   : > { %s5802_s20 = scalar_lea.hbm %s7421_s2, 64  ;;  %p6514_p8 = pneg %p6500_p6 }
  0x2c   : > { %p5803_p7 = scmp.ne.s32.totalorder %s7421_s2, %s5802_s20  ;;  %p5809_p11 = scmp.lt.u32.totalorder %s5802_s20, %s7421_s2 }
  0x2e   : > { %p5805_p9 = pnand %p6514_p8, %p5803_p7 }
  0x30   : > { %p5806_p10 = pneg %p5805_p9 }
  0x32   : > { %p5811_p12 = pnand %p5809_p11, %p5806_p10 }
  0x34   : > { %5814 = shalt.err (!%p5811_p12)
}
  0x35   : > { %s5815_s0 = scalar_lea.vmem %s532_s25, 64  ;;  %p5823_p5 = scmp.lt.s32.totalorder %s532_s25, %s532_s25 }
  0x36   : > { %p5816_p13 = scmp.ne.s32.totalorder %s532_s25, %s5815_s0  ;;  %p5824_p4 = scmp.lt.s32.totalorder %s5815_s0, %s5815_s0 }
  0x38   : > { %p5818_p0 = pnand %p5816_p13, %p6514_p8  ;;  %p5825_p1 = por %p5824_p4, %p5823_p5 }
  0x3a   : > { %p5819_p2 = pneg %p5818_p0 }
  0x3c   : > { %p5826_p3 = pnand %p5825_p1, %p5819_p2 }
  0x3e   : > { %5829 = shalt.err (!%p5826_p3)
}
  0x3f   : > { %5330 = dma.hbm_to_vmem [thread:$0]  (!%p6500_p6), %s7421_s2, 64, %s532_s25, [#allocation7]  }
  0x40   : > { %s7423_s5 = sld [smem:[#allocation45_spill]] }
  0x46   : > { %s5830_s21 = scalar_lea.hbm %s7423_s5, 6144 }
  0x47   : > { %p5831_p7 = scmp.ne.s32.totalorder %s7423_s5, %s5830_s21  ;;  %p5837_p1 = scmp.lt.u32.totalorder %s5830_s21, %s7423_s5 }
  0x49   : > { %p5833_p9 = pnand %p5831_p7, %p6514_p8 }
  0x4b   : > { %p5834_p4 = pneg %p5833_p9 }
  0x4d   : > { %p5839_p3 = pnand %p5837_p1, %p5834_p4 }
  0x4f   : > { %5842 = shalt.err (!%p5839_p3)
}
  0x50   : > { %s5843_s25 = scalar_lea.vmem %s6496_s28, 6144  ;;  %p5851_p13 = scmp.lt.s32.totalorder %s6496_s28, %s6496_s28 }
  0x51   : > { %p5844_p10 = scmp.ne.s32.totalorder %s6496_s28, %s5843_s25  ;;  %p5852_p0 = scmp.lt.s32.totalorder %s5843_s25, %s5843_s25 }
  0x53   : > { %p5846_p11 = pnand %p5844_p10, %p6514_p8  ;;  %p5853_p2 = por %p5852_p0, %p5851_p13 }
  0x55   : > { %p5847_p12 = pneg %p5846_p11 }
  0x57   : > { %p5854_p5 = pnand %p5853_p2, %p5847_p12 }
  0x59   : > { %5857 = shalt.err (!%p5854_p5)
}
  0x5a   : > { %s6327_s6 = smov 192   ;;  %s6328_s26 = smov 12  }
  0x5b   : > { %5336 = dma.hbm_to_vmem [thread:$0]  (!%p6500_p6), %s7423_s5, 6144, %s6496_s28, [#allocation10], %s6327_s6, %s6327_s6, %s6328_s26  }
  0x5c   : > { %s7424_s8 = sld [smem:[#allocation48_spill]] }
  0x62   : > { %s5858_s21 = scalar_lea.hbm %s7424_s8, 32 }
  0x63   : > { %p5859_p7 = scmp.ne.s32.totalorder %s7424_s8, %s5858_s21  ;;  %p5865_p1 = scmp.lt.u32.totalorder %s5858_s21, %s7424_s8 }
  0x65   : > { %p5861_p9 = pnand %p5859_p7, %p6514_p8 }
  0x67   : > { %p5862_p4 = pneg %p5861_p9 }
  0x69   : > { %p5867_p3 = pnand %p5865_p1, %p5862_p4 }
  0x6b   : > { %5870 = shalt.err (!%p5867_p3)
}
  0x6c   : > { %s5871_s28 = scalar_lea.vmem %s6504_s30, 32  ;;  %p5879_p13 = scmp.lt.s32.totalorder %s6504_s30, %s6504_s30 }
  0x6d   : > { %p5872_p10 = scmp.ne.s32.totalorder %s6504_s30, %s5871_s28  ;;  %p5880_p0 = scmp.lt.s32.totalorder %s5871_s28, %s5871_s28 }
  0x6f   : > { %p5874_p11 = pnand %p5872_p10, %p6514_p8  ;;  %p5881_p2 = por %p5880_p0, %p5879_p13 }
  0x71   : > { %p5875_p12 = pneg %p5874_p11 }
  0x73   : > { %p5882_p5 = pnand %p5881_p2, %p5875_p12 }
  0x75   : > { %5885 = shalt.err (!%p5882_p5)
}
  0x76   : > { %s7391_s6 = smov 16   ;;  %s7397_s2 = smov 1  }
  0x77   : > { %5342 = dma.hbm_to_vmem [thread:$0]  (!%p6500_p6), %s7424_s8, 32, %s6504_s30, [#allocation13], %s7391_s6, %s7391_s6, %s7397_s2  }
  0x78   : > { %s6331_s19 = smov [#allocation15]   ;;  %s7425_s10 = sld [smem:[#allocation50_spill]] }
  0x79   : > { %s607_s17 = sshll.u32 %s6331_s19, 4  ;;  %s608_s17 = int_to_ptr.vmem [resolvable:$true] %s607_s17 }
  0x7e   : > { %s5886_s29 = scalar_lea.hbm %s7425_s10, 32 }
  0x7f   : > { %p5887_p7 = scmp.ne.s32.totalorder %s7425_s10, %s5886_s29  ;;  %p5893_p1 = scmp.lt.u32.totalorder %s5886_s29, %s7425_s10 }
  0x81   : > { %p5889_p9 = pnand %p5887_p7, %p6514_p8 }
  0x83   : > { %p5890_p4 = pneg %p5889_p9 }
  0x85   : > { %p5895_p3 = pnand %p5893_p1, %p5890_p4 }
  0x87   : > { %5898 = shalt.err (!%p5895_p3)
}
  0x88   : > { %s5899_s30 = scalar_lea.vmem %s608_s17, 32  ;;  %p5907_p13 = scmp.lt.s32.totalorder %s608_s17, %s608_s17 }
  0x89   : > { %p5900_p10 = scmp.ne.s32.totalorder %s608_s17, %s5899_s30  ;;  %p5908_p0 = scmp.lt.s32.totalorder %s5899_s30, %s5899_s30 }
  0x8b   : > { %p5902_p11 = pnand %p5900_p10, %p6514_p8  ;;  %p5909_p2 = por %p5908_p0, %p5907_p13 }
  0x8d   : > { %p5903_p12 = pneg %p5902_p11 }
  0x8f   : > { %p5910_p5 = pnand %p5909_p2, %p5903_p12 }
  0x91   : > { %5913 = shalt.err (!%p5910_p5)
}
  0x92   : > { %5348 = dma.hbm_to_vmem [thread:$0]  (!%p6500_p6), %s7425_s10, 32, %s608_s17, [#allocation16], %s7391_s6, %s7391_s6, %s7397_s2  }
  0x93   : > { %s6332_s18 = smov [#allocation18]   ;;  %s6333_s20 = smov [#allocation21]  }
  0x94   : > { %s633_s19 = sshll.u32 %s6332_s18, 4  ;;  %s659_s21 = sshll.u32 %s6333_s20, 4  ;;  %s634_s19 = int_to_ptr.vmem [resolvable:$true] %s633_s19  ;;  %s6600_s21 = int_to_ptr.vmem [resolvable:$true] %s659_s21 }
  0x95   : > { %s7426_s12 = sld [smem:[#allocation52_spill]] }
  0x9b   : > { %s5914_s25 = scalar_lea.hbm %s7426_s12, 128 }
  0x9c   : > { %p5915_p7 = scmp.ne.s32.totalorder %s7426_s12, %s5914_s25  ;;  %p5921_p1 = scmp.lt.u32.totalorder %s5914_s25, %s7426_s12 }
  0x9e   : > { %p5917_p9 = pnand %p5915_p7, %p6514_p8 }
  0xa0   : > { %p5918_p4 = pneg %p5917_p9 }
  0xa2   : > { %p5923_p3 = pnand %p5921_p1, %p5918_p4 }
  0xa4   : > { %5926 = shalt.err (!%p5923_p3)
}
  0xa5   : > { %s5927_s26 = scalar_lea.vmem %s634_s19, 128  ;;  %p5935_p13 = scmp.lt.s32.totalorder %s634_s19, %s634_s19 }
  0xa6   : > { %p5928_p10 = scmp.ne.s32.totalorder %s634_s19, %s5927_s26  ;;  %p5936_p0 = scmp.lt.s32.totalorder %s5927_s26, %s5927_s26 }
  0xa8   : > { %p5930_p11 = pnand %p5928_p10, %p6514_p8  ;;  %p5937_p2 = por %p5936_p0, %p5935_p13 }
  0xaa   : > { %p5931_p12 = pneg %p5930_p11 }
  0xac   : > { %p5938_p5 = pnand %p5937_p2, %p5931_p12 }
  0xae   : > { %5941 = shalt.err (!%p5938_p5)
}
  0xaf   : > { %s7393_s18 = smov 64   ;;  %s7395_s20 = smov 4  }
  0xb0   : > { %5354 = dma.hbm_to_vmem [thread:$0]  (!%p6500_p6), %s7426_s12, 128, %s634_s19, [#allocation19], %s7393_s18, %s7393_s18, %s7395_s20  }
  0xb1   : > { %s5942_s30 = scalar_lea.hbm %s7373_s14, 32 }
  0xb2   : > { %p5943_p7 = scmp.ne.s32.totalorder %s7373_s14, %s5942_s30  ;;  %p5949_p1 = scmp.lt.u32.totalorder %s5942_s30, %s7373_s14 }
  0xb4   : > { %p5945_p9 = pnand %p5943_p7, %p6514_p8 }
  0xb6   : > { %p5946_p4 = pneg %p5945_p9 }
  0xb8   : > { %p5951_p3 = pnand %p5949_p1, %p5946_p4 }
  0xba   : > { %5954 = shalt.err (!%p5951_p3)
}
  0xbb   : > { %s5955_s19 = scalar_lea.vmem %s6600_s21, 32  ;;  %p5963_p13 = scmp.lt.s32.totalorder %s6600_s21, %s6600_s21 }
  0xbc   : > { %p5956_p10 = scmp.ne.s32.totalorder %s6600_s21, %s5955_s19  ;;  %p5964_p0 = scmp.lt.s32.totalorder %s5955_s19, %s5955_s19 }
  0xbe   : > { %p5958_p11 = pnand %p5956_p10, %p6514_p8  ;;  %p5965_p2 = por %p5964_p0, %p5963_p13 }
  0xc0   : > { %p5959_p12 = pneg %p5958_p11 }
  0xc2   : > { %p5966_p5 = pnand %p5965_p2, %p5959_p12 }
  0xc4   : > { %5969 = shalt.err (!%p5966_p5)
}
  0xc5   : > { %s7427_s6 = smov 16   ;;  %s6336_s25 = smov [#allocation8]  }
  0xc6   : > { %5360 = dma.hbm_to_vmem [thread:$0]  (!%p6500_p6), %s7373_s14, 32, %s6600_s21, [#allocation22], %s7427_s6, %s7427_s6, %s7397_s2  }
  0xc7   : > { %s542_s28 = sshll.u32 %s6336_s25, 4  ;;  %s6337_s30 = smov [#allocation11]   ;;  %s543_s28 = int_to_ptr.vmem [resolvable:$true] %s542_s28 }
  0xc8   : > { %s568_s5 = sshll.u32 %s6337_s30, 4  ;;  %s7428_s19 = sld [smem:[#allocation44_spill]]  ;;  %s6649_s5 = int_to_ptr.vmem [resolvable:$true] %s568_s5 }
  0xce   : > { %s5970_s18 = scalar_lea.hbm %s7428_s19, 16 }
  0xcf   : > { %p5971_p7 = scmp.ne.s32.totalorder %s7428_s19, %s5970_s18  ;;  %p5977_p1 = scmp.lt.u32.totalorder %s5970_s18, %s7428_s19 }
  0xd1   : > { %p5973_p9 = pnand %p5971_p7, %p6514_p8 }
  0xd3   : > { %p5974_p4 = pneg %p5973_p9 }
  0xd5   : > { %p5979_p3 = pnand %p5977_p1, %p5974_p4 }
  0xd7   : > { %5982 = shalt.err (!%p5979_p3)
}
  0xd8   : > { %s5983_s0 = scalar_lea.vmem %s543_s28, 16  ;;  %s5990_s25 = scalar_lea.vmem %s543_s28, 32 }
  0xd9   : > { %p5984_p10 = scmp.ne.s32.totalorder %s543_s28, %s5983_s0  ;;  %p5991_p13 = scmp.lt.s32.totalorder %s543_s28, %s543_s28 }
  0xda   : > { %p5992_p0 = scmp.lt.s32.totalorder %s5990_s25, %s5983_s0 }
  0xdb   : > { %p5986_p11 = pnand %p5984_p10, %p6514_p8 }
  0xdc   : > { %p5993_p2 = por %p5992_p0, %p5991_p13 }
  0xdd   : > { %p5987_p12 = pneg %p5986_p11 }
  0xdf   : > { %p5994_p5 = pnand %p5993_p2, %p5987_p12 }
  0xe1   : > { %5997 = shalt.err (!%p5994_p5)
}
  0xe2   : > { %5333 = dma.hbm_to_vmem [thread:$0]  (!%p6500_p6), %s7428_s19, 16, %s543_s28, [#allocation7]  }
  0xe3   : > { %s7429_s7 = sld [smem:[#allocation47_spill]] }
  0xe9   : > { %s5998_s17 = scalar_lea.hbm %s7429_s7, 2048 }
  0xea   : > { %p5999_p7 = scmp.ne.s32.totalorder %s7429_s7, %s5998_s17  ;;  %p6005_p1 = scmp.lt.u32.totalorder %s5998_s17, %s7429_s7 }
  0xec   : > { %p6001_p9 = pnand %p5999_p7, %p6514_p8 }
  0xee   : > { %p6002_p4 = pneg %p6001_p9 }
  0xf0   : > { %p6007_p3 = pnand %p6005_p1, %p6002_p4 }
  0xf2   : > { %6010 = shalt.err (!%p6007_p3)
}
  0xf3   : > { %s6011_s28 = scalar_lea.vmem %s6649_s5, 2048  ;;  %p6019_p13 = scmp.lt.s32.totalorder %s6649_s5, %s6649_s5 }
  0xf4   : > { %p6012_p10 = scmp.ne.s32.totalorder %s6649_s5, %s6011_s28  ;;  %p6020_p0 = scmp.lt.s32.totalorder %s6011_s28, %s6011_s28 }
  0xf6   : > { %p6014_p11 = pnand %p6012_p10, %p6514_p8  ;;  %p6021_p2 = por %p6020_p0, %p6019_p13 }
  0xf8   : > { %p6015_p12 = pneg %p6014_p11 }
  0xfa   : > { %p6022_p5 = pnand %p6021_p2, %p6015_p12 }
  0xfc   : > { %6025 = shalt.err (!%p6022_p5)
}
  0xfd   : > { %s7430_s25 = smov 4   ;;  %s7431_s8 = smov 64  }
  0xfe   : > { %5339 = dma.hbm_to_vmem [thread:$0]  (!%p6500_p6), %s7429_s7, 2048, %s6649_s5, [#allocation10], %s7431_s8, %s7431_s8, %s7430_s25  }
  0xff   : > { %s6338_s30 = smov [#allocation14]   ;;  %s6339_s26 = smov [#allocation17]  }
 0x100   : > { %s594_s17 = sshll.u32 %s6338_s30, 4  ;;  %s620_s29 = sshll.u32 %s6339_s26, 4  ;;  %s595_s17 = int_to_ptr.vmem [resolvable:$true] %s594_s17  ;;  %s6695_s29 = int_to_ptr.vmem [resolvable:$true] %s620_s29 }
 0x101   : > { %s7432_s9 = sld [smem:[#allocation49_spill]] }
 0x107   : > { %s6026_s28 = scalar_lea.hbm %s7432_s9, 32 }
 0x108   : > { %p6027_p7 = scmp.ne.s32.totalorder %s7432_s9, %s6026_s28  ;;  %p6033_p1 = scmp.lt.u32.totalorder %s6026_s28, %s7432_s9 }
 0x10a   : > { %p6029_p9 = pnand %p6027_p7, %p6514_p8 }
 0x10c   : > { %p6030_p4 = pneg %p6029_p9 }
 0x10e   : > { %p6035_p3 = pnand %p6033_p1, %p6030_p4 }
 0x110   : > { %6038 = shalt.err (!%p6035_p3)
}
 0x111   : > { %s6039_s18 = scalar_lea.vmem %s595_s17, 32  ;;  %p6047_p13 = scmp.lt.s32.totalorder %s595_s17, %s595_s17 }
 0x112   : > { %p6040_p10 = scmp.ne.s32.totalorder %s595_s17, %s6039_s18  ;;  %p6048_p0 = scmp.lt.s32.totalorder %s6039_s18, %s6039_s18 }
 0x114   : > { %p6042_p11 = pnand %p6040_p10, %p6514_p8  ;;  %p6049_p2 = por %p6048_p0, %p6047_p13 }
 0x116   : > { %p6043_p12 = pneg %p6042_p11 }
 0x118   : > { %p6050_p5 = pnand %p6049_p2, %p6043_p12 }
 0x11a   : > { %6053 = shalt.err (!%p6050_p5)
}
 0x11b   : > { %s7433_s10 = smov 1   ;;  %s7434_s11 = sld [smem:[#allocation51_spill]] }
 0x11c   : > { %5345 = dma.hbm_to_vmem [thread:$0]  (!%p6500_p6), %s7432_s9, 32, %s595_s17, [#allocation13], %s7427_s6, %s7427_s6, %s7433_s10  }
 0x121   : > { %s6054_s0 = scalar_lea.hbm %s7434_s11, 8192 }
 0x122   : > { %p6055_p7 = scmp.ne.s32.totalorder %s7434_s11, %s6054_s0  ;;  %p6061_p1 = scmp.lt.u32.totalorder %s6054_s0, %s7434_s11 }
 0x124   : > { %p6057_p9 = pnand %p6055_p7, %p6514_p8 }
 0x126   : > { %p6058_p4 = pneg %p6057_p9 }
 0x128   : > { %p6063_p3 = pnand %p6061_p1, %p6058_p4 }
 0x12a   : > { %6066 = shalt.err (!%p6063_p3)
}
 0x12b   : > { %s6067_s17 = scalar_lea.vmem %s6695_s29, 8192  ;;  %p6075_p13 = scmp.lt.s32.totalorder %s6695_s29, %s6695_s29 }
 0x12c   : > { %p6068_p10 = scmp.ne.s32.totalorder %s6695_s29, %s6067_s17  ;;  %p6076_p0 = scmp.lt.s32.totalorder %s6067_s17, %s6067_s17 }
 0x12e   : > { %p6070_p11 = pnand %p6068_p10, %p6514_p8  ;;  %p6077_p2 = por %p6076_p0, %p6075_p13 }
 0x130   : > { %p6071_p12 = pneg %p6070_p11 }
 0x132   : > { %p6078_p5 = pnand %p6077_p2, %p6071_p12 }
 0x134   : > { %6081 = shalt.err (!%p6078_p5)
}
 0x135   : > { %s6340_s2 = smov 256   ;;  %s6341_s21 = smov [#allocation20]  }
 0x136   : > { %5351 = dma.hbm_to_vmem [thread:$0]  (!%p6500_p6), %s7434_s11, 8192, %s6695_s29, [#allocation16], %s6340_s2, %s6340_s2, %s7427_s6  }
 0x137   : > { %s646_s0 = sshll.u32 %s6341_s21, 4  ;;  %s6342_s28 = smov [#allocation23]   ;;  %s647_s0 = int_to_ptr.vmem [resolvable:$true] %s646_s0 }
 0x138   : > { %s672_s20 = sshll.u32 %s6342_s28, 4  ;;  %s6082_s17 = scalar_lea.hbm %s7372_s13, 8192  ;;  %s673_s20 = int_to_ptr.vmem [resolvable:$true] %s672_s20 }
 0x139   : > { %p6083_p7 = scmp.ne.s32.totalorder %s7372_s13, %s6082_s17  ;;  %p6089_p1 = scmp.lt.u32.totalorder %s6082_s17, %s7372_s13 }
 0x13b   : > { %p6085_p9 = pnand %p6083_p7, %p6514_p8 }
 0x13d   : > { %p6086_p4 = pneg %p6085_p9 }
 0x13f   : > { %p6091_p3 = pnand %p6089_p1, %p6086_p4 }
 0x141   : > { %6094 = shalt.err (!%p6091_p3)
}
 0x142   : > { %s6095_s29 = scalar_lea.vmem %s647_s0, 8192  ;;  %p6103_p13 = scmp.lt.s32.totalorder %s647_s0, %s647_s0 }
 0x143   : > { %p6096_p10 = scmp.ne.s32.totalorder %s647_s0, %s6095_s29  ;;  %p6104_p0 = scmp.lt.s32.totalorder %s6095_s29, %s6095_s29 }
 0x145   : > { %p6098_p11 = pnand %p6096_p10, %p6514_p8  ;;  %p6105_p2 = por %p6104_p0, %p6103_p13 }
 0x147   : > { %p6099_p12 = pneg %p6098_p11 }
 0x149   : > { %p6106_p5 = pnand %p6105_p2, %p6099_p12 }
 0x14b   : > { %6109 = shalt.err (!%p6106_p5)
}
 0x14c   : > { %5357 = dma.hbm_to_vmem [thread:$0]  (!%p6500_p6), %s7372_s13, 8192, %s647_s0, [#allocation19], %s7431_s8, %s7431_s8, %s7430_s25  }
 0x14d   : > { %s6110_s26 = scalar_lea.hbm %s7374_s15, 32 }
 0x14e   : > { %p6111_p7 = scmp.ne.s32.totalorder %s7374_s15, %s6110_s26  ;;  %p6117_p1 = scmp.lt.u32.totalorder %s6110_s26, %s7374_s15 }
 0x150   : > { %p6113_p9 = pnand %p6111_p7, %p6514_p8 }
 0x152   : > { %p6114_p4 = pneg %p6113_p9 }
 0x154   : > { %p6119_p3 = pnand %p6117_p1, %p6114_p4 }
 0x156   : > { %6122 = shalt.err (!%p6119_p3)
}
 0x157   : > { %s6123_s17 = scalar_lea.vmem %s673_s20, 32  ;;  %p6131_p13 = scmp.lt.s32.totalorder %s673_s20, %s673_s20 }
 0x158   : > { %p6124_p10 = scmp.ne.s32.totalorder %s673_s20, %s6123_s17  ;;  %p6132_p0 = scmp.lt.s32.totalorder %s6123_s17, %s6123_s17 }
 0x15a   : > { %p6126_p11 = pnand %p6124_p10, %p6514_p8  ;;  %p6133_p2 = por %p6132_p0, %p6131_p13 }
 0x15c   : > { %p6127_p12 = pneg %p6126_p11 }
 0x15e   : > { %p6134_p5 = pnand %p6133_p2, %p6127_p12 }
 0x160   : > { %6137 = shalt.err (!%p6134_p5)
}
 0x161   : > { %5363 = dma.hbm_to_vmem [thread:$0]  (!%p6500_p6), %s7374_s15, 32, %s673_s20, [#allocation22], %s7427_s6, %s7427_s6, %s7433_s10  }
 0x162   : > { %s6343_s0 = smov [#allocation24]   ;;  %s6138_s9 = scalar_lea.hbm %s7375_s16, 32 }
 0x163   : > { %s685_s30 = sshll.u32 %s6343_s0, 4  ;;  %p6139_p7 = scmp.ne.s32.totalorder %s7375_s16, %s6138_s9  ;;  %s686_s30 = int_to_ptr.vmem [resolvable:$true] %s685_s30 }
 0x164   : > { %p6145_p1 = scmp.lt.u32.totalorder %s6138_s9, %s7375_s16 }
 0x165   : > { %p6141_p9 = pnand %p6139_p7, %p6514_p8 }
 0x167   : > { %p6142_p4 = pneg %p6141_p9 }
 0x169   : > { %p6147_p3 = pnand %p6145_p1, %p6142_p4 }
 0x16b   : > { %6150 = shalt.err (!%p6147_p3)
}
 0x16c   : > { %s6151_s20 = scalar_lea.vmem %s686_s30, 32  ;;  %p6159_p13 = scmp.lt.s32.totalorder %s686_s30, %s686_s30 }
 0x16d   : > { %p6152_p10 = scmp.ne.s32.totalorder %s686_s30, %s6151_s20  ;;  %p6160_p0 = scmp.lt.s32.totalorder %s6151_s20, %s6151_s20 }
 0x16f   : > { %p6154_p11 = pnand %p6152_p10, %p6514_p8  ;;  %p6161_p2 = por %p6160_p0, %p6159_p13 }
 0x171   : > { %p6155_p12 = pneg %p6154_p11 }
 0x173   : > { %p6162_p5 = pnand %p6161_p2, %p6155_p12 }
 0x175   : > { %6165 = shalt.err (!%p6162_p5)
}
 0x176   : > { %5366 = dma.hbm_to_vmem [thread:$0]  (!%p6500_p6), %s7375_s16, 32, %s686_s30, [#allocation25], %s7427_s6, %s7427_s6, %s7433_s10  }
 0x177   : > { %s4618_s4 = sadd.s32 4294967294, %s6322_s24   ;;  %s6807_s27 = sadd.s32 1, %s6322_s24  }
 0x178   : > { %s103_s18 = ssub.s32 %s6322_s24, %s6807_s27  ;;  %s106_s17 = sadd.s32 1, %s6318_s23 }
 0x179   : > { %p104_p8 = scmp.eq.s32.totalorder %s103_s18, 0  ;;  %p113_p7 = scmp.ne.s32.totalorder %s6318_s23, %s6314_s22 }
 0x17a   : > { %p114_p9 = scmp.eq.s32.totalorder %s6322_s24, 0  ;;  %p119_p4 = scmp.ne.s32.totalorder %s6314_s22, %s6310_s1 }
 0x17b   : > { %s6818_s25 = scalar_select %p104_p8, %s6318_s23, %s106_s17  }
 0x17c   : > { %p6820_p1 = por %p114_p9, %p113_p7  ;;  %p7436_p3 = scmp.eq.s32.totalorder %s6484_s3, 0 }
 0x17d   : > { %p479_p10 = scmp.eq.s32.totalorder %s6484_s3, 1  ;;  %p485_p11 = scmp.eq.s32.totalorder %s4618_s4, 1 }
 0x17e   : > { %p6826_p6 = por %p7436_p3, %p119_p4  ;;  %p5391_p12 = scmp.lt.s32.totalorder %s6322_s24, 2 }
 0x17f   : > { %s721_s10 = sand.u32 1, %s6318_s23   ;;  %p6833_p13 = por %p479_p10, %p113_p7 }
 0x180   : > { %p6837_p0 = por %p485_p11, %p119_p4  ;;  %s4634_s29 = sshll.u32 %s6322_s24, 4 }
 0x181   : > { %s7438_s0 = scalar_select %p6833_p13, 1, 0 }
 0x182   : > { %s7439_s30 = scalar_select %p6837_p0, 1, 0 }
 0x183   : > { %s724_s7 = scalar_lea.vmem [#allocation3], %s721_s10  ;;  %s7440_s26 = sld [smem:[#allocation42_spill]] }
 0x184   : > { %s731_s9 = sshll.u32 %s724_s7, 4  ;;  %p6851_p2 = pnand %p5391_p12, %p6820_p1  ;;  %s6847_s9 = int_to_ptr.vmem [resolvable:$true] %s731_s9 }
 0x185   : > { %s722_s28 = scalar_lea.sflag [#allocation4], %s721_s10 }
 0x186   : > { %p6168_p8 = pneg %p6851_p2 }
 0x189   : > { %s6845_s21 = scalar_lea.hbm %s7440_s26, %s4634_s29  ;;  %s6171_s17 = scalar_lea.hbm %s7440_s26, 32 }
 0x18a   : > { %s6166_s5 = scalar_lea.hbm %s6845_s21, 16  ;;  %p6172_p4 = scmp.lt.u32.totalorder %s6845_s21, %s7440_s26 }
 0x18b   : > { %p6167_p5 = scmp.ne.s32.totalorder %s6845_s21, %s6166_s5  ;;  %p6173_p1 = scmp.lt.u32.totalorder %s6171_s17, %s6166_s5 }
 0x18c   : > { %p6175_p10 = scmp.lt.u32.totalorder %s6166_s5, %s6845_s21 }
 0x18d   : > { %p6169_p7 = pnand %p6168_p8, %p6167_p5  ;;  %p6174_p3 = por %p6173_p1, %p6172_p4 }
 0x18f   : > { %p6170_p9 = pneg %p6169_p7  ;;  %p6176_p11 = por %p6175_p10, %p6174_p3 }
 0x191   : > { %p6177_p12 = pnand %p6176_p11, %p6170_p9 }
 0x193   : > { %6180 = shalt.err (!%p6177_p12)
}
 0x194   : > { %s6181_s10 = scalar_lea.vmem %s6847_s9, 16  ;;  %s6344_s7 = smov [#allocation3]  }
 0x195   : > { %p6182_p5 = scmp.ne.s32.totalorder %s6847_s9, %s6181_s10  ;;  %s6186_s12 = sshll.u32 %s6344_s7, 4  ;;  %s6187_s12 = int_to_ptr.vmem [resolvable:$false] %s6186_s12 }
 0x196   : > { %s6188_s2 = scalar_lea.vmem %s6187_s12, 32  ;;  %p6189_p13 = scmp.lt.s32.totalorder %s6847_s9, %s6187_s12 }
 0x197   : > { %p6184_p7 = pnand %p6182_p5, %p6168_p8  ;;  %p6190_p4 = scmp.lt.s32.totalorder %s6188_s2, %s6181_s10 }
 0x199   : > { %p6185_p0 = pneg %p6184_p7  ;;  %p6191_p1 = por %p6190_p4, %p6189_p13 }
 0x19b   : > { %p6192_p3 = pnand %p6191_p1, %p6185_p0 }
 0x19d   : > { %6195 = shalt.err (!%p6192_p3)
}
 0x19e   : > { %5370 = dma.hbm_to_vmem [thread:$0]  (!%p6851_p2), %s6845_s21, 16, %s6847_s9, %s722_s28  }
 0x19f   : > { %s7442_s5 = sld [smem:[#allocation39_spill]] }
 0x1a5   : > { %p7443_p9 = scmp.ne.s32.totalorder %s7442_s5, 0 }
 0x1a6   : > { %s6883_s4 = sand.u32 (!%p7443_p9), 1, %s6314_s22  }
 0x1a7   : > { %740 = sbr.rel (%p7443_p9) target bundleno = 6360 (0x18d8), region = 96  ;;  %s743_s18 = scalar_lea.sflag (!%p7443_p9), [#allocation4], %s6883_s4 }
 0x1a8   : > { %s745_s17 = scalar_lea.vmem (!%p7443_p9), [#allocation3], %s6883_s4 }
 0x1ae   : > { %6269 = dma.done.wait (%p6826_p6), %s743_s18, 16  }
 0x1af   : > { %6271 = vsyncadd (%p6826_p6), %s743_s18, 4294967280  ;;  %p7444_p13 = scmp.eq.s32.totalorder %s6484_s3, 0 }
 0x1b1   : > { %6273 = dma.done.wait (%p7444_p13), [#allocation7], 80   ;;  %p7445_p0 = pmov %p7444_p13 }
 0x1b3   : > { %6275 = vsyncadd (%p7445_p0), [#allocation7], 4294967216  ;;  %p7446_p2 = pmov %p7445_p0 }
 0x1b4   : > { %p7447_p8 = pmov %p7445_p0 }
 0x1b5   : > { %6277 = dma.done.wait (%p7446_p2), [#allocation10], 8192  }
 0x1b6   : > { %6279 = vsyncadd (%p7447_p8), [#allocation10], 4294959104  ;;  %p7448_p10 = pmov %p7445_p0 }
 0x1b7   : > { %p7449_p11 = pmov %p7445_p0 }
 0x1b8   : > { %6281 = dma.done.wait (%p7448_p10), [#allocation13], 64  }
 0x1b9   : > { %6283 = vsyncadd (%p7449_p11), [#allocation13], 4294967232  ;;  %p7450_p6 = pmov %p7445_p0 }
 0x1ba   : > { %p7451_p12 = pmov %p7445_p0 }
 0x1bb   : > { %6285 = dma.done.wait (%p7450_p6), [#allocation16], 8224  }
 0x1bc   : > { %6287 = vsyncadd (%p7451_p12), [#allocation16], 4294959072  ;;  %p7452_p5 = pmov %p7445_p0 }
 0x1bd   : > { %p7453_p7 = pmov %p7445_p0 }
 0x1be   : > { %6289 = dma.done.wait (%p7452_p5), [#allocation19], 8320  }
 0x1bf   : > { %6291 = vsyncadd (%p7453_p7), [#allocation19], 4294958976  ;;  %p7454_p4 = pmov %p7445_p0 }
 0x1c0   : > { %p7455_p1 = pmov %p7445_p0 }
 0x1c1   : > { %6293 = dma.done.wait (%p7454_p4), [#allocation22], 64  }
 0x1c2   : > { %6295 = vsyncadd (%p7455_p1), [#allocation22], 4294967232  ;;  %p7456_p3 = pmov %p7445_p0 }
 0x1c3   : > { %p7457_p9 = pmov %p7445_p0 }
 0x1c4   : > { %6297 = dma.done.wait (%p7456_p3), [#allocation25], 32  }
 0x1c5   : > { %6299 = vsyncadd (%p7457_p9), [#allocation25], 4294967264  ;;  %p868_p13 = scmp.lt.s32.totalorder %s6484_s3, 1  ;;  %v6345_v0 = vmov 1   ;;  %v6346_v1 = vmov 0   ;;  %v6347_v2 = vmov 0.0   ;;  %v892_v30 = vlaneseq }
 0x1c6   : > { %5470 = vset.pattern.permute.xlu1 %v6345_v0  ;;  %5469 = vset.pattern.permute.xlu0 %v6346_v1  ;;  %s7458_s28 = sld [smem:[#allocation41_spill]]  ;;  %v5473_v5 = vld [vmem:[#allocation9 + $0x4] ss:$12 sps:$4 sm:$0xff]   ;;  %v5475_v6 = vld [vmem:[#allocation9] ss:$12 sps:$4 sm:$0xff]   ;;  %v6348_v12 = vmov 2  }
 0x1c7   : > { %s6922_s6 = scalar_select %p868_p13, %s6484_s3, 1  ;;  %5073 = vmatprep.subr.bf16.mxu1 %v6347_v2  ;;  %1154 = vmatprep.mubr.bf16.mxu0 %v6346_v1  ;;  %v5476_v7 = vld [vmem:[#allocation9 + $0x8] ss:$12 sps:$4 sm:$0xff]   ;;  %v5479_v9 = vld [vmem:[#allocation9 + $0x18] ss:$12 sps:$4 sm:$0xff]   ;;  %vm6349_vm0 = vmmov 0  }
 0x1c8   : > { %1122 = vmatprep.subr.bf16.mxu0 %v5473_v5  ;;  %v5477_v8 = vld [vmem:[#allocation9 + $0x1c] ss:$12 sps:$4 sm:$0xff]   ;;  %5074 = vmatpush3.bf16.msra.mxu1 %v5476_v7  ;;  %v5480_v10 = vld [vmem:[#allocation9 + $0x20] ss:$12 sps:$4 sm:$0xff]   ;;  %v5484_v14 = vld [vmem:[#allocation9 + $0x38] ss:$12 sps:$4 sm:$0xff]  }
 0x1c9   : > { %s4897_s9 = sshll.u32 %s6922_s6, 4  ;;  %1123 = vmatpush1.bf16.msra.mxu0 %v5475_v6  ;;  %5075 = vmatprep.subr.bf16.mxu1 %v6347_v2  ;;  %v5481_v11 = vld [vmem:[#allocation9 + $0x34] ss:$12 sps:$4 sm:$0xff]   ;;  %v5483_v13 = vld [vmem:[#allocation9 + $0x30] ss:$12 sps:$4 sm:$0xff]   ;;  %v6943_v31 = vshrl.u32 %v892_v30, 7 }
 0x1ca   : > { %1124 = vmatprep.subr.bf16.mxu0 %v5477_v8  ;;  %v5485_v15 = vld [vmem:[#allocation9 + $0x4c] ss:$12 sps:$4 sm:$0xff]   ;;  %v5487_v16 = vld [vmem:[#allocation9 + $0x48] ss:$12 sps:$4 sm:$0xff]   ;;  %v5488_v17 = vld [vmem:[#allocation9 + $0x50] ss:$12 sps:$4 sm:$0xff]   ;;  %5089 = vmatprep.mubr.msk.bf16.mxu1 %vm6349_vm0, %v6347_v2 }
 0x1cb   : > { %v5489_v18 = vld [vmem:[#allocation9 + $0x64] ss:$12 sps:$4 sm:$0xff]   ;;  %v5491_v19 = vld [vmem:[#allocation9 + $0x60] ss:$12 sps:$4 sm:$0xff]   ;;  %v5492_v20 = vld [vmem:[#allocation9 + $0x68] ss:$12 sps:$4 sm:$0xff]  }
 0x1cc   : > { %s877_s8 = scalar_lea.vmem %s7458_s28, %s4897_s9  ;;  %5076 = vmatpush3.bf16.msra.mxu1 %v5480_v10  ;;  %v5493_v21 = vld [vmem:[#allocation9 + $0x7c] ss:$12 sps:$4 sm:$0xff]   ;;  %v5495_v22 = vld [vmem:[#allocation9 + $0x78] ss:$12 sps:$4 sm:$0xff]   ;;  %v5496_v23 = vld [vmem:[#allocation9 + $0x80] ss:$12 sps:$4 sm:$0xff]  }
 0x1cd   : > { %v879_v3 = vld [vmem:[%s877_s8] sm:$0xff]  ;;  %v880_v4 = vld [vmem:[%s877_s8 + $0x8] sm:$0xff]  ;;  %1125 = vmatpush1.bf16.msra.mxu0 %v5479_v9  ;;  %5077 = vmatprep.subr.bf16.mxu1 %v6347_v2  ;;  %v6946_v32 = vsub.s32 1, %v6943_v31  ;;  %v6949_v33 = vsub.s32 0, %v6943_v31  ;;  %v6952_v37 = vsub.s32 2, %v6943_v31  ;;  %s7459_s7 = sld [smem:[#allocation40_spill]] }
 0x1ce   : > { %899 = vperm.xlu1 %5470, %v879_v3   ;;  %884 = vperm.xlu0 %5469, %v879_v3   ;;  %v5497_v24 = vld [vmem:[#allocation9 + $0x94] ss:$12 sps:$4 sm:$0xff]   ;;  %v5499_v25 = vld [vmem:[#allocation9 + $0x90] ss:$12 sps:$4 sm:$0xff]   ;;  %v5500_v26 = vld [vmem:[#allocation9 + $0x98] ss:$12 sps:$4 sm:$0xff]  }
 0x1cf   : > { %1126 = vmatprep.subr.bf16.mxu0 %v5481_v11  ;;  %v5501_v27 = vld [vmem:[#allocation9 + $0xac] ss:$12 sps:$4 sm:$0xff]   ;;  %v5503_v28 = vld [vmem:[#allocation9 + $0xa8] ss:$12 sps:$4 sm:$0xff]   ;;  %v5504_v29 = vld [vmem:[#allocation9 + $0xb0] ss:$12 sps:$4 sm:$0xff]  }
 0x1d0   : > { %5078 = vmatpush3.bf16.msra.mxu1 %v5484_v14  ;;  %v881_v34 = vld [vmem:[#allocation6] sm:$0x7]  ;;  %v4655_v53 = vld [vmem:[#allocation8] ss:$0 sm:$0xff]  ;;  %s7460_s18 = sld [smem:[#allocation46_spill]]  ;;  %vm1215_vm1 = vcmask 261120  }
 0x1d1   : > { %1127 = vmatpush1.bf16.msra.mxu0 %v5483_v13  ;;  %5079 = vmatprep.subr.bf16.mxu1 %v6347_v2  ;;  %v909_v38 = vrot.slane %v881_v34, %v6946_v32  ;;  %v895_v39 = vrot.slane %v881_v34, %v6949_v33  ;;  %v925_v42 = vrot.slane %v881_v34, %v6952_v37  ;;  %s6350_s6 = smov 96   ;;  %s6352_s21 = smov 32   ;;  %vm1263_vm2 = vcmask 130048  }
 0x1d2   : > { %903 = vperm.xlu1 %5470, %v880_v4   ;;  %889 = vperm.xlu0 %5469, %v880_v4   ;;  %vm1462_vm3 = vcmask 523520   ;;  %vm1590_vm4 = vcmask 785920   ;;  %vm1718_vm5 = vcmask 1048320   ;;  %s7461_s29 = sld [smem:[#allocation53_spill]]  ;;  %s4649_s2 = sshll.u32 %s6883_s4, 4 }
 0x1d3   : > { %1128 = vmatprep.subr.bf16.mxu0 %v5485_v15  ;;  %s872_s12 = scalar_lea.vmem %s7459_s7, %s4897_s9  ;;  %s7400_s9 = smov 64  }
 0x1d4   : > { %5080 = vmatpush3.bf16.msra.mxu1 %v5488_v17  ;;  %v939_v56 = vld [vmem:[%s872_s12] sm:$0xff]  ;;  %v940_v57 = vld [vmem:[%s872_s12 + $0x8] sm:$0xff]  ;;  %s860_s5 = scalar_lea.vmem [#allocation26], %s4649_s2  ;;  %s7462_s28 = sld [smem:[#allocation55_spill]] }
 0x1d5   : > { %1129 = vmatpush1.bf16.msra.mxu0 %v5487_v16  ;;  %5081 = vmatprep.subr.bf16.mxu1 %v6347_v2  ;;  %s4352_s8 = sshll.u32 %s860_s5, 4  ;;  %s4334_s10 = scalar_lea.sflag [#allocation5], %s6883_s4  ;;  %s7277_s8 = int_to_ptr.vmem [resolvable:$true] %s4352_s8 }
 0x1d6   : > { %5472 = vset.pattern.permute.xlu1 %v6348_v12  ;;  %5471 = vset.pattern.permute.xlu0 %v6348_v12  ;;  %v977_v63 = vld [vmem:[%s7460_s18] sm:$0x7]  ;;  %s6196_s7 = scalar_lea.vmem %s7277_s8, 256  ;;  %p7463_p2 = scmp.ne.s32.totalorder %s7438_s0, 0 }
 0x1d7   : > { %919 = vperm.xlu1 %5472, %v880_v4   ;;  %915 = vperm.xlu0 %5471, %v879_v3   ;;  %v982_v0 = vrot.slane %v977_v63, %v6949_v33  ;;  %v990_v3 = vrot.slane %v977_v63, %v6952_v37  ;;  %v986_v6 = vrot.slane %v977_v63, %v6946_v32  ;;  %p6197_p0 = scmp.ne.s32.totalorder %s7277_s8, %s6196_s7  ;;  %s6353_s12 = smov [#allocation26]  }
 0x1d8   : > { %1130 = vmatprep.subr.bf16.mxu0 %v5489_v18  ;;  %5082 = vmatpush3.bf16.msra.mxu1 %v5492_v20  ;;  %s6200_s2 = sshll.u32 %s6353_s12, 4  ;;  %s6201_s2 = int_to_ptr.vmem [resolvable:$false] %s6200_s2 }
 0x1d9   : > { %1131 = vmatpush1.bf16.msra.mxu0 %v5491_v19  ;;  %5083 = vmatprep.subr.bf16.mxu1 %v6347_v2  ;;  %p6198_p8 = pnand %p6197_p0, %p7463_p2  ;;  %p6203_p11 = scmp.lt.s32.totalorder %s7277_s8, %s6201_s2 }
 0x1da   : > { %1132 = vmatprep.subr.bf16.mxu0 %v5493_v21 }
 0x1db   : > { %p6199_p10 = pneg %p6198_p8 }
 0x1dc   : > { %5084 = vmatpush3.bf16.msra.mxu1 %v5496_v23 }
 0x1dd   : > { %1133 = vmatpush1.bf16.msra.mxu0 %v5495_v22  ;;  %5085 = vmatprep.subr.bf16.mxu1 %v6347_v2 }
 0x1de   : > { %1134 = vmatprep.subr.bf16.mxu0 %v5497_v24 }
 0x1e0   : > { %5086 = vmatpush3.bf16.msra.mxu1 %v5500_v26 }
 0x1e1   : > { %1135 = vmatpush1.bf16.msra.mxu0 %v5499_v25  ;;  %5087 = vmatprep.subr.bf16.mxu1 %v6347_v2 }
 0x1e2   : > { %1136 = vmatprep.subr.bf16.mxu0 %v5501_v27 }
 0x1e4   : > { %5088 = vmatpush3.bf16.msra.mxu1 %v5504_v29 }
 0x1e5   : > { %1137 = vmatpush1.bf16.msra.mxu0 %v5503_v28  ;;  %5099 = vmatprep.subr.bf16.mxu1 %v6347_v2 }
 0x1e6   : > { %5093 = vmatprep.subr.bf16.mxu0 %v6347_v2 }
 0x24d   : > { %v900_v35 = vpop.permute.xlu1 %899  ;;  %v885_v36 = vpop.permute.xlu0 %884 }
 0x24e   : > { %v910_v43 = vmul.f32 %v909_v38, %v900_v35  ;;  %v896_v44 = vmul.f32 %v895_v39, %v885_v36  ;;  %v4680_v35 = vld [vmem:[%s745_s17] ss:$0 sm:$0xff] }
 0x250   : > { %v912_v49 = vadd.f32 %v910_v43, %v896_v44 }
 0x251   : > { %v904_v40 = vpop.permute.xlu1 %903  ;;  %v890_v41 = vpop.permute.xlu0 %889 }
 0x252   : > { %v911_v45 = vmul.f32 %v909_v38, %v904_v40  ;;  %v897_v46 = vmul.f32 %v895_v39, %v890_v41 }
 0x254   : > { %v913_v50 = vadd.f32 %v911_v45, %v897_v46 }
 0x256   : > { %v920_v47 = vpop.permute.xlu1 %919  ;;  %v916_v48 = vpop.permute.xlu0 %915 }
 0x257   : > { %v927_v51 = vmul.f32 %v925_v42, %v920_v47  ;;  %v926_v52 = vmul.f32 %v925_v42, %v916_v48 }
 0x259   : > { %v929_v54 = vadd.f32 %v927_v51, %v913_v50  ;;  %v928_v55 = vadd.f32 %v926_v52, %v912_v49 }
 0x25b   : > { %v938_v58 = vadd.f32 %v4655_v53, %v929_v54  ;;  %v937_v59 = vadd.f32 %v4655_v53, %v928_v55 }
 0x25d   : > { %v6962_v60 = vadd.f32 %v939_v56, %v937_v59  ;;  %v6964_v61 = vadd.f32 %v940_v57, %v938_v58 }
 0x25f   : > { %v944_v62 = vpack.c.bf16 %v6964_v61, %v6962_v60 }
 0x261   : > { %1155 = vmatmul.mubr.bf16.vlgmr.msra.gmra.mrb[0].mxu0 %v944_v62  ;;  %5090 = vmatmul.mubr.bf16.vlgmr.msra.gmra.mrb[0].mxu1 %v944_v62 }
 0x262   : > { %5095 = vmatprep.mubr.msk.bf16.mxu0 %vm6349_vm0, %v6347_v2  ;;  %5101 = vmatprep.mubr.msk.bf16.mxu1 %vm6349_vm0, %v6347_v2 }
 0x334   : > { %v1156_v4 = vpop.f32.mrb[0].mxu0  ;;  %v1199_v5 = vpop.f32.mrb[0].mxu1 }
 0x335   : > { %v1158_v7 = vpop.f32.mrb[1].mxu0  ;;  %v5091_v8 = vpop.f32.mrb[1].mxu1  ;;  %v1157_v11 = vadd.f32 %v1156_v4, %v982_v0  ;;  %v1200_v12 = vadd.f32 %v1199_v5, %v990_v3 }
 0x336   : > { %v1160_v9 = vpop.f32.mrb[2].mxu0  ;;  %v1202_v10 = vpop.f32.mrb[2].mxu1  ;;  %v1159_v17 = vadd.f32 %v1158_v7, %v986_v6 }
 0x337   : > { %v1161_v13 = vadd.f32 %v1160_v9, %v982_v0  ;;  %v1203_v14 = vadd.f32 %v1202_v10, %v990_v3  ;;  %v1162_v15 = vpop.f32.mrb[3].mxu0  ;;  %v5092_v16 = vpop.f32.mrb[3].mxu1 }
 0x338   : > { %v1163_v18 = vadd.f32 %v1162_v15, %v986_v6 }
 0x339   : > { %v1206_v19 = vpack.c.bf16 %v1161_v13, %v1157_v11  ;;  %v6978_v20 = vpack.c.bf16 %v1203_v14, %v1200_v12 }
 0x33a   : > { %v1207_v21 = vpack.c.bf16 %v1163_v18, %v1159_v17 }
 0x33b   : > { %5100 = vmatpush3.bf16.msra.mxu1 %v6978_v20  ;;  %1334 = vrot.lane.b32.xlu0 %v1206_v19, %s6350_s6 }
 0x33c   : > { %1337 = vrot.lane.b32.xlu1 %v1207_v21, %s6350_s6  ;;  %v1220_v22 = vsel %vm1215_vm1, %v1207_v21, 0  ;;  %5111 = vmatprep.subr.bf16.mxu1 %v6347_v2 }
 0x33d   : > { %5094 = vmatpush3.bf16.xpose.msra.mxu0 %v1220_v22 }
 0x33e   : > { %5105 = vmatprep.subr.bf16.mxu0 %v6347_v2 }
 0x33f   : > { %1464 = vrot.lane.b32.xlu0 %v1206_v19, %s7400_s9 }
 0x340   : > { %1466 = vrot.lane.b32.xlu1 %v1207_v21, %s7400_s9 }
 0x343   : > { %1592 = vrot.lane.b32.xlu0 %v1206_v19, %s6352_s21 }
 0x344   : > { %1594 = vrot.lane.b32.xlu1 %v1207_v21, %s6352_s21  ;;  %5096 = vmatmul.mubr.msk.bf16.vlgmr.msra.gmra.mrb[4].mxu0 %vm1215_vm1, %v1206_v19 }
 0x345   : > { %5107 = vmatprep.mubr.msk.bf16.mxu0 %vm6349_vm0, %v6347_v2 }
 0x3ad   : > { %v1335_v26 = vpop.permute.xlu0 %1334 }
 0x3ae   : > { %v1338_v23 = vpop.permute.xlu1 %1337 }
 0x3af   : > { %v1343_v24 = vsel %vm1215_vm1, %v1338_v23, 0 }
 0x3b0   : > { %5106 = vmatpush3.bf16.xpose.msra.mxu0 %v1343_v24 }
 0x3b1   : > { %5117 = vmatprep.subr.bf16.mxu0 %v6347_v2  ;;  %v1465_v29 = vpop.permute.xlu0 %1464 }
 0x3b2   : > { %v1467_v25 = vpop.permute.xlu1 %1466 }
 0x3b3   : > { %v1472_v27 = vsel %vm1215_vm1, %v1467_v25, 0 }
 0x3b5   : > { %v1593_v34 = vpop.permute.xlu0 %1592 }
 0x3b6   : > { %v1595_v28 = vpop.permute.xlu1 %1594 }
 0x3b7   : > { %5108 = vmatmul.mubr.msk.bf16.vlgmr.msra.gmra.mrb[8].mxu0 %vm1215_vm1, %v1335_v26  ;;  %v1600_v30 = vsel %vm1215_vm1, %v1595_v28, 0 }
 0x3b8   : > { %5118 = vmatpush3.bf16.xpose.msra.mxu0 %v1472_v27  ;;  %5119 = vmatprep.mubr.msk.bf16.mxu0 %vm6349_vm0, %v6347_v2 }
 0x3b9   : > { %5129 = vmatprep.subr.bf16.mxu0 %v6347_v2 }
 0x3bf   : > { %5120 = vmatmul.mubr.msk.bf16.vlgmr.msra.gmra.mrb[12].mxu0 %vm1215_vm1, %v1465_v29 }
 0x3c0   : > { %5130 = vmatpush3.bf16.xpose.msra.mxu0 %v1600_v30  ;;  %5131 = vmatprep.mubr.msk.bf16.mxu0 %vm6349_vm0, %v6347_v2 }
 0x3c1   : > { %5141 = vmatprep.subr.bf16.mxu0 %v6347_v2 }
 0x3c7   : > { %5132 = vmatmul.mubr.msk.bf16.vlgmr.msra.gmra.mrb[16].mxu0 %vm1215_vm1, %v1593_v34 }
 0x3c8   : > { %5157 = vmatprep.mubr.msk.bf16.mxu0 %vm6349_vm0, %v6347_v2 }
 0x417   : > { %v1256_v36 = vpop.f32.mrb[4].mxu0 }
 0x418   : > { %v1257_v38 = vadd.f32 %v4680_v35, %v1256_v36  ;;  %v5097_v39 = vpop.f32.mrb[5].mxu0 }
 0x419   : > { %v1259_v40 = vpop.f32.mrb[6].mxu0 }
 0x41a   : > { %v1260_v41 = vadd.f32 %v4680_v35, %v1259_v40  ;;  %v5098_v42 = vpop.f32.mrb[7].mxu0  ;;  %v1264_v43 = vsel %vm1263_vm2, %v1257_v38, -inf }
 0x41b   : > { %1265 = vmax.xlane.f32.xlu1 %v1264_v43 }
 0x41c   : > { %v1267_v44 = vsel %vm1263_vm2, %v1260_v41, -inf }
 0x41d   : > { %1268 = vmax.xlane.f32.xlu0 %v1267_v44 }
 0x48a   : > { %v1379_v45 = vpop.f32.mrb[8].mxu0 }
 0x48b   : > { %v1380_v46 = vadd.f32 %v4680_v35, %v1379_v45  ;;  %v5109_v47 = vpop.f32.mrb[9].mxu0 }
 0x48c   : > { %v1382_v48 = vpop.f32.mrb[10].mxu0 }
 0x48d   : > { %v1383_v49 = vadd.f32 %v4680_v35, %v1382_v48  ;;  %v5110_v50 = vpop.f32.mrb[11].mxu0  ;;  %v1386_v51 = vsel %vm1263_vm2, %v1380_v46, -inf }
 0x48e   : > { %1387 = vmax.xlane.f32.xlu0 %v1386_v51 }
 0x48f   : > { %v1389_v52 = vsel %vm1263_vm2, %v1383_v49, -inf }
 0x490   : > { %1390 = vmax.xlane.f32.xlu1 %v1389_v52 }
 0x492   : > { %v1508_v53 = vpop.f32.mrb[12].mxu0 }
 0x493   : > { %v1509_v54 = vadd.f32 %v4680_v35, %v1508_v53  ;;  %v5121_v55 = vpop.f32.mrb[13].mxu0 }
 0x494   : > { %v1511_v56 = vpop.f32.mrb[14].mxu0 }
 0x495   : > { %v1512_v57 = vadd.f32 %v4680_v35, %v1511_v56  ;;  %v5122_v58 = vpop.f32.mrb[15].mxu0  ;;  %v1515_v59 = vsel %vm1263_vm2, %v1509_v54, -inf }
 0x496   : > { %1516 = vmax.xlane.f32.xlu0 %v1515_v59 }
 0x497   : > { %v1518_v62 = vsel %vm1263_vm2, %v1512_v57, -inf }
 0x498   : > { %1519 = vmax.xlane.f32.xlu1 %v1518_v62 }
 0x49a   : > { %v1636_v63 = vpop.f32.mrb[16].mxu0 }
 0x49b   : > { %v1637_v0 = vadd.f32 %v4680_v35, %v1636_v63  ;;  %v5133_v3 = vpop.f32.mrb[17].mxu0 }
 0x49c   : > { %v1639_v4 = vpop.f32.mrb[18].mxu0 }
 0x49d   : > { %v7016_v5 = vadd.f32 %v4680_v35, %v1639_v4  ;;  %v5134_v6 = vpop.f32.mrb[19].mxu0  ;;  %v1643_v7 = vsel %vm1263_vm2, %v1637_v0, -inf }
 0x49e   : > { %1644 = vmax.xlane.f32.xlu0 %v1643_v7 }
 0x49f   : > { %v1646_v8 = vsel %vm1263_vm2, %v7016_v5, -inf }
 0x4a0   : > { %1647 = vmax.xlane.f32.xlu1 %v1646_v8 }
 0x4a8   : > { %v1266_v9 = vpop.xlane.xlu1 %1265 }
 0x4a9   : > { %v1270_v10 = vsub.f32 %v1257_v38, %v1266_v9 }
 0x4aa   : > { %v1269_v11 = vpop.xlane.xlu0 %1268 }
 0x4ab   : > { %v1272_v12 = vmul.f32 1.442695, %v1270_v10  ;;  %v1271_v13 = vsub.f32 %v1260_v41, %v1269_v11 }
 0x4ad   : > { %5721 = vpow2.f32 %v1272_v12  ;;  %v1274_v14 = vmul.f32 1.442695, %v1271_v13 }
 0x4af   : > { %5723 = vpow2.f32 %v1274_v14 }
 0x4b7   : > { %v5722_v15 = vpop.eup %5721 }
 0x4b8   : > { %v1276_v16 = vsel %vm1263_vm2, %v5722_v15, 0.0 }
 0x4b9   : > { %v5724_v17 = vpop.eup %5723  ;;  %1277 = vadd.xlane.f32.xlu0 %v1276_v16 }
 0x4ba   : > { %v1279_v18 = vsel %vm1263_vm2, %v5724_v17, 0.0 }
 0x4bb   : > { %1280 = vadd.xlane.f32.xlu1 %v1279_v18 }
 0x51b   : > { %v1388_v19 = vpop.xlane.xlu0 %1387 }
 0x51c   : > { %v1392_v21 = vsub.f32 %v1380_v46, %v1388_v19 }
 0x51d   : > { %v1391_v22 = vpop.xlane.xlu1 %1390 }
 0x51e   : > { %v1394_v23 = vmul.f32 1.442695, %v1392_v21  ;;  %v1393_v24 = vsub.f32 %v1383_v49, %v1391_v22 }
 0x520   : > { %5725 = vpow2.f32 %v1394_v23  ;;  %v1396_v25 = vmul.f32 1.442695, %v1393_v24 }
 0x522   : > { %5727 = vpow2.f32 %v1396_v25 }
 0x523   : > { %v1517_v26 = vpop.xlane.xlu0 %1516 }
 0x524   : > { %v1521_v27 = vsub.f32 %v1509_v54, %v1517_v26 }
 0x525   : > { %v1520_v28 = vpop.xlane.xlu1 %1519 }
 0x526   : > { %v1523_v29 = vmul.f32 1.442695, %v1521_v27  ;;  %v1522_v30 = vsub.f32 %v1512_v57, %v1520_v28 }
 0x528   : > { %5729 = vpow2.f32 %v1523_v29  ;;  %v1525_v34 = vmul.f32 1.442695, %v1522_v30 }
 0x52a   : > { %v5726_v35 = vpop.eup %5725  ;;  %5731 = vpow2.f32 %v1525_v34  ;;  %v5505_v34 = vld [vmem:[#allocation11] sm:$0xff]  }
 0x52b   : > { %v1645_v36 = vpop.xlane.xlu0 %1644  ;;  %v1398_v38 = vsel %vm1263_vm2, %v5726_v35, 0.0  ;;  %5142 = vmatpush3.bf16.msra.mxu0 %v5505_v34  ;;  %v5534_v34 = vld [vmem:[#allocation17 + $0x68] ss:$16 sps:$4 sm:$0xff]  }
 0x52c   : > { %v5728_v39 = vpop.eup %5727  ;;  %v1649_v40 = vsub.f32 %v1637_v0, %v1645_v36  ;;  %1399 = vadd.xlane.f32.xlu0 %v1398_v38  ;;  %v5506_v38 = vld [vmem:[#allocation11 + $0x8] sm:$0xff]   ;;  %5143 = vmatprep.subr.bf16.mxu0 %v6347_v2 }
 0x52d   : > { %v1401_v41 = vsel %vm1263_vm2, %v5728_v39, 0.0  ;;  %v1648_v49 = vpop.xlane.xlu1 %1647 }
 0x52e   : > { %v1651_v42 = vmul.f32 1.442695, %v1649_v40  ;;  %1402 = vadd.xlane.f32.xlu1 %v1401_v41  ;;  %v1650_v56 = vsub.f32 %v7016_v5, %v1648_v49  ;;  %v5507_v41 = vld [vmem:[#allocation11 + $0x10] sm:$0xff]   ;;  %v5510_v49 = vld [vmem:[#allocation11 + $0x28] sm:$0xff]  }
 0x52f   : > { %5144 = vmatpush3.bf16.msra.mxu0 %v5506_v38  ;;  %v5537_v38 = vld [vmem:[#allocation17 + $0x80] ss:$16 sps:$4 sm:$0xff]  }
 0x530   : > { %5733 = vpow2.f32 %v1651_v42  ;;  %v1653_v58 = vmul.f32 1.442695, %v1650_v56  ;;  %5145 = vmatprep.subr.bf16.mxu0 %v6347_v2 }
 0x532   : > { %v5730_v43 = vpop.eup %5729 }
 0x533   : > { %v1527_v44 = vsel %vm1263_vm2, %v5730_v43, 0.0  ;;  %5146 = vmatpush3.bf16.msra.mxu0 %v5507_v41  ;;  %v5548_v41 = vld [vmem:[#allocation17 + $0xac] ss:$16 sps:$4 sm:$0xff]  }
 0x534   : > { %v5732_v45 = vpop.eup %5731  ;;  %1528 = vadd.xlane.f32.xlu0 %v1527_v44  ;;  %5147 = vmatprep.subr.bf16.mxu0 %v6347_v2 }
 0x535   : > { %v1530_v46 = vsel %vm1263_vm2, %v5732_v45, 0.0 }
 0x536   : > { %1531 = vadd.xlane.f32.xlu1 %v1530_v46 }
 0x53a   : > { %v5734_v47 = vpop.eup %5733 }
 0x53b   : > { %v1655_v48 = vsel %vm1263_vm2, %v5734_v47, 0.0 }
 0x53c   : > { %1656 = vadd.xlane.f32.xlu0 %v1655_v48  ;;  %v5509_v48 = vld [vmem:[#allocation11 + $0x20] sm:$0xff]  }
 0x546   : > { %v1278_v50 = vpop.xlane.xlu0 %1277 }
 0x547   : > { %5735 = vrcp.f32 %v1278_v50  ;;  %1538 = vrot.lane.b32.xlu1 %v6978_v20, %s7400_s9  ;;  %v5511_v50 = vld [vmem:[#allocation11 + $0x30] sm:$0xff]  }
 0x548   : > { %v1281_v51 = vpop.xlane.xlu1 %1280 }
 0x549   : > { %5737 = vrcp.f32 %v1281_v51  ;;  %v5512_v51 = vld [vmem:[#allocation11 + $0x38] sm:$0xff]  }
 0x54a   : > { %5739 = vpow2.f32 %v1653_v58 }
 0x551   : > { %v5736_v52 = vpop.eup %5735 }
 0x552   : > { %1410 = vrot.lane.b32.xlu0 %v6978_v20, %s6350_s6  ;;  %v1284_v54 = vmul.f32 %v5736_v52, %v5722_v15 }
 0x553   : > { %v5738_v53 = vpop.eup %5737 }
 0x554   : > { %v1285_v55 = vmul.f32 %v5738_v53, %v5724_v17  ;;  %v5740_v59 = vpop.eup %5739 }
 0x555   : > { %v1658_v62 = vsel %vm1263_vm2, %v5740_v59, 0.0 }
 0x556   : > { %v1286_v57 = vpack.c.bf16 %v1285_v55, %v1284_v54 }
 0x558   : > { %5102 = vmatmul.mubr.msk.bf16.vlgmr.msra.gmra.mrb[4].mxu1 %vm1263_vm2, %v1286_v57 }
 0x559   : > { %5113 = vmatprep.mubr.msk.bf16.mxu1 %vm6349_vm0, %v6347_v2 }
 0x56b   : > { %1659 = vadd.xlane.f32.xlu1 %v1658_v62 }
 0x57c   : > { %1666 = vrot.lane.b32.xlu1 %v6978_v20, %s6352_s21 }
 0x5b9   : > { %v1400_v0 = vpop.xlane.xlu0 %1399 }
 0x5bb   : > { %v1403_v63 = vpop.xlane.xlu1 %1402 }
 0x5bc   : > { %5741 = vrcp.f32 %v1403_v63  ;;  %v4689_v63 = vld [vmem:[#allocation12] ss:$0 sm:$0xff] }
 0x5bd   : > { %5743 = vrcp.f32 %v1400_v0 }
 0x5c1   : > { %v1529_v4 = vpop.xlane.xlu0 %1528 }
 0x5c3   : > { %v1532_v3 = vpop.xlane.xlu1 %1531 }
 0x5c4   : > { %5745 = vrcp.f32 %v1532_v3 }
 0x5c5   : > { %5747 = vrcp.f32 %v1529_v4 }
 0x5c6   : > { %v5742_v5 = vpop.eup %5741 }
 0x5c7   : > { %v5744_v7 = vpop.eup %5743  ;;  %v1407_v8 = vmul.f32 %v5742_v5, %v5728_v39  ;;  %v1539_v20 = vpop.permute.xlu1 %1538 }
 0x5c8   : > { %v1406_v9 = vmul.f32 %v5744_v7, %v5726_v35 }
 0x5c9   : > { %v1657_v6 = vpop.xlane.xlu0 %1656 }
 0x5ca   : > { %v1408_v11 = vpack.c.bf16 %v1407_v8, %v1406_v9  ;;  %5749 = vrcp.f32 %v1657_v6 }
 0x5cd   : > { %v1411_v10 = vpop.permute.xlu0 %1410 }
 0x5ce   : > { %5112 = vmatpush3.bf16.msra.mxu1 %v1411_v10  ;;  %v5746_v12 = vpop.eup %5745  ;;  %v5513_v10 = vld [vmem:[#allocation17] ss:$16 sps:$4 sm:$0xff]  }
 0x5cf   : > { %5123 = vmatprep.subr.bf16.mxu1 %v6347_v2  ;;  %v5748_v13 = vpop.eup %5747  ;;  %v1536_v14 = vmul.f32 %v5746_v12, %v5732_v45  ;;  %v5508_v45 = vld [vmem:[#allocation11 + $0x18] sm:$0xff]  }
 0x5d0   : > { %v1535_v15 = vmul.f32 %v5748_v13, %v5730_v43  ;;  %5148 = vmatpush3.bf16.msra.mxu0 %v5508_v45  ;;  %v5516_v12 = vld [vmem:[#allocation17 + $0x8] ss:$16 sps:$4 sm:$0xff]   ;;  %v5521_v13 = vld [vmem:[#allocation17 + $0x24] ss:$16 sps:$4 sm:$0xff]   ;;  %v5554_v45 = vld [vmem:[#allocation17 + $0xcc] ss:$16 sps:$4 sm:$0xff]  }
 0x5d1   : > { %5114 = vmatmul.mubr.msk.bf16.vlgmr.msra.gmra.mrb[8].mxu1 %vm1263_vm2, %v1408_v11  ;;  %5149 = vmatprep.subr.bf16.mxu0 %v6347_v2  ;;  %v5515_v11 = vld [vmem:[#allocation17 + $0x4] ss:$16 sps:$4 sm:$0xff]  }
 0x5d2   : > { %5124 = vmatpush3.bf16.msra.mxu1 %v1539_v20  ;;  %5125 = vmatprep.mubr.msk.bf16.mxu1 %vm6349_vm0, %v6347_v2  ;;  %v1537_v16 = vpack.c.bf16 %v1536_v14, %v1535_v15  ;;  %v5518_v20 = vld [vmem:[#allocation17 + $0xc] ss:$16 sps:$4 sm:$0xff]   ;;  %v5519_v15 = vld [vmem:[#allocation17 + $0x20] ss:$16 sps:$4 sm:$0xff]  }
 0x5d3   : > { %5135 = vmatprep.subr.bf16.mxu1 %v6347_v2  ;;  %v5524_v14 = vld [vmem:[#allocation17 + $0x2c] ss:$16 sps:$4 sm:$0xff]  }
 0x5d4   : > { %v5750_v19 = vpop.eup %5749  ;;  %5150 = vmatpush3.bf16.msra.mxu0 %v5509_v48  ;;  %v5557_v48 = vld [vmem:[#allocation17 + $0xe4] ss:$16 sps:$4 sm:$0xff]  }
 0x5d5   : > { %v1663_v22 = vmul.f32 %v5750_v19, %v5734_v47  ;;  %5151 = vmatprep.subr.bf16.mxu0 %v6347_v2 }
 0x5d8   : > { %5152 = vmatpush3.bf16.msra.mxu0 %v5510_v49  ;;  %v5555_v49 = vld [vmem:[#allocation17 + $0xe0] ss:$16 sps:$4 sm:$0xff]  }
 0x5d9   : > { %5126 = vmatmul.mubr.msk.bf16.vlgmr.msra.gmra.mrb[12].mxu1 %vm1263_vm2, %v1537_v16  ;;  %5153 = vmatprep.subr.bf16.mxu0 %v6347_v2  ;;  %v5522_v16 = vld [vmem:[#allocation17 + $0x28] ss:$16 sps:$4 sm:$0xff]  }
 0x5da   : > { %5137 = vmatprep.mubr.msk.bf16.mxu1 %vm6349_vm0, %v6347_v2 }
 0x5dc   : > { %5154 = vmatpush3.bf16.msra.mxu0 %v5511_v50  ;;  %v5558_v50 = vld [vmem:[#allocation17 + $0xe8] ss:$16 sps:$4 sm:$0xff]  }
 0x5dd   : > { %5155 = vmatprep.subr.bf16.mxu0 %v6347_v2 }
 0x5e0   : > { %5156 = vmatpush3.bf16.msra.mxu0 %v5512_v51  ;;  %v5560_v51 = vld [vmem:[#allocation17 + $0xec] ss:$16 sps:$4 sm:$0xff]  }
 0x5e1   : > { %2134 = vmatprep.subr.bf16.mxu0 %v5518_v20  ;;  %v5565_v20 = vld [vmem:[#allocation20 + $0x48] sm:$0xff]  }
 0x5f8   : > { %v1660_v17 = vpop.xlane.xlu1 %1659 }
 0x5f9   : > { %5751 = vrcp.f32 %v1660_v17 }
 0x5fc   : > { %v1667_v18 = vpop.permute.xlu1 %1666 }
 0x5fd   : > { %5136 = vmatpush3.bf16.msra.mxu1 %v1667_v18 }
 0x5fe   : > { %2091 = vmatprep.subr.bf16.mxu1 %v5515_v11  ;;  %v5564_v11 = vld [vmem:[#allocation20 + $0x80] sm:$0xff]  }
 0x603   : > { %v5752_v21 = vpop.eup %5751 }
 0x604   : > { %v1664_v23 = vmul.f32 %v5752_v21, %v5740_v59 }
 0x606   : > { %v1665_v24 = vpack.c.bf16 %v1664_v23, %v1663_v22 }
 0x608   : > { %5138 = vmatmul.mubr.msk.bf16.vlgmr.msra.gmra.mrb[16].mxu1 %vm1263_vm2, %v1665_v24  ;;  %v5527_v24 = vld [vmem:[#allocation17 + $0x44] ss:$16 sps:$4 sm:$0xff]  }
 0x609   : > { %2123 = vmatprep.mubr.bf16.mxu1 %v6346_v1  ;;  %2092 = vmatpush1.bf16.msra.mxu1 %v5513_v10  ;;  %v5563_v10 = vld [vmem:[#allocation20] sm:$0xff]  }
 0x60a   : > { %2093 = vmatprep.subr.bf16.mxu1 %v5521_v13  ;;  %v5566_v13 = vld [vmem:[#allocation20 + $0xc8] sm:$0xff]  }
 0x60d   : > { %2094 = vmatpush1.bf16.msra.mxu1 %v5519_v15  ;;  %v5568_v15 = vld [vmem:[#allocation20 + $0x88] sm:$0xff]  }
 0x60e   : > { %2095 = vmatprep.subr.bf16.mxu1 %v5527_v24  ;;  %v5578_v24 = vld [vmem:[#allocation20 + $0xe0] sm:$0xff]  }
 0x62b   : > { %v1324_v25 = vpop.f32.mrb[4].mxu1 }
 0x62c   : > { %v5103_v26 = vpop.f32.mrb[5].mxu1 }
 0x62d   : > { %v1327_v27 = vpop.f32.mrb[6].mxu1  ;;  %v5525_v26 = vld [vmem:[#allocation17 + $0x40] ss:$16 sps:$4 sm:$0xff]  }
 0x62e   : > { %v1331_v28 = vpack.c.bf16 %v1327_v27, %v1324_v25  ;;  %v5104_v29 = vpop.f32.mrb[7].mxu1  ;;  %v5530_v25 = vld [vmem:[#allocation17 + $0x4c] ss:$16 sps:$4 sm:$0xff]   ;;  %v5528_v27 = vld [vmem:[#allocation17 + $0x48] ss:$16 sps:$4 sm:$0xff]   ;;  %2096 = vmatpush1.bf16.msra.mxu1 %v5525_v26 }
 0x62f   : > { %v5536_v29 = vld [vmem:[#allocation17 + $0x6c] ss:$16 sps:$4 sm:$0xff]  }
 0x630   : > { %1332 = vst.msk [vmem:[#allocation2] sm:$0xff] %vm1215_vm1, %v1331_v28  ;;  %v5533_v28 = vld [vmem:[#allocation17 + $0x64] ss:$16 sps:$4 sm:$0xff]   ;;  %v5580_v26 = vld [vmem:[#allocation20 + $0xa0] sm:$0xff]  }
 0x631   : > { %2097 = vmatprep.subr.bf16.mxu1 %v5533_v28  ;;  %v5582_v28 = vld [vmem:[#allocation20 + $0xe8] sm:$0xff]  }
 0x6a4   : > { %v1450_v30 = vpop.f32.mrb[8].mxu1 }
 0x6a5   : > { %v5115_v35 = vpop.f32.mrb[9].mxu1 }
 0x6a6   : > { %v1453_v36 = vpop.f32.mrb[10].mxu1  ;;  %v5539_v35 = vld [vmem:[#allocation17 + $0x84] ss:$16 sps:$4 sm:$0xff]  }
 0x6a7   : > { %v1457_v39 = vpack.c.bf16 %v1453_v36, %v1450_v30  ;;  %v5116_v40 = vpop.f32.mrb[11].mxu1  ;;  %v5531_v30 = vld [vmem:[#allocation17 + $0x60] ss:$16 sps:$4 sm:$0xff]   ;;  %v5542_v36 = vld [vmem:[#allocation17 + $0x8c] ss:$16 sps:$4 sm:$0xff]  }
 0x6a8   : > { %2098 = vmatpush1.bf16.msra.mxu1 %v5531_v30  ;;  %v5545_v40 = vld [vmem:[#allocation17 + $0xa4] ss:$16 sps:$4 sm:$0xff]  }
 0x6a9   : > { %1459 = vrot.lane.b32.xlu0 %v1457_v39, %s6352_s21  ;;  %v5540_v39 = vld [vmem:[#allocation17 + $0x88] ss:$16 sps:$4 sm:$0xff]   ;;  %2099 = vmatprep.subr.bf16.mxu1 %v5539_v35  ;;  %v5584_v30 = vld [vmem:[#allocation20 + $0xa8] sm:$0xff]  }
 0x6aa   : > { %v5586_v35 = vld [vmem:[#allocation20 + $0xf0] sm:$0xff]  }
 0x6ac   : > { %v1578_v42 = vpop.f32.mrb[12].mxu1  ;;  %2100 = vmatpush1.bf16.msra.mxu1 %v5537_v38  ;;  %v5588_v38 = vld [vmem:[#allocation20 + $0xb0] sm:$0xff]  }
 0x6ad   : > { %v5127_v43 = vpop.f32.mrb[13].mxu1  ;;  %2101 = vmatprep.subr.bf16.mxu1 %v5545_v40  ;;  %v5590_v40 = vld [vmem:[#allocation20 + $0xf8] sm:$0xff]  }
 0x6ae   : > { %v1581_v44 = vpop.f32.mrb[14].mxu1  ;;  %v5546_v43 = vld [vmem:[#allocation17 + $0xa8] ss:$16 sps:$4 sm:$0xff]  }
 0x6af   : > { %v1585_v46 = vpack.c.bf16 %v1581_v44, %v1578_v42  ;;  %v5128_v47 = vpop.f32.mrb[15].mxu1  ;;  %v5543_v42 = vld [vmem:[#allocation17 + $0xa0] ss:$16 sps:$4 sm:$0xff]   ;;  %v5551_v44 = vld [vmem:[#allocation17 + $0xc4] ss:$16 sps:$4 sm:$0xff]  }
 0x6b0   : > { %2102 = vmatpush1.bf16.msra.mxu1 %v5543_v42  ;;  %v5552_v47 = vld [vmem:[#allocation17 + $0xc8] ss:$16 sps:$4 sm:$0xff]   ;;  %v5592_v42 = vld [vmem:[#allocation20 + $0xb8] sm:$0xff]  }
 0x6b1   : > { %1587 = vrot.lane.b32.xlu1 %v1585_v46, %s7400_s9  ;;  %v5549_v46 = vld [vmem:[#allocation17 + $0xc0] ss:$16 sps:$4 sm:$0xff]   ;;  %2103 = vmatprep.subr.bf16.mxu1 %v5551_v44  ;;  %v1925_v44 = vsub.s32 3, %v6943_v31 }
 0x6b4   : > { %2104 = vmatpush1.bf16.msra.mxu1 %v5549_v46 }
 0x6b5   : > { %2105 = vmatprep.subr.bf16.mxu1 %v5557_v48 }
 0x6b8   : > { %2106 = vmatpush1.bf16.msra.mxu1 %v5555_v49 }
 0x6db   : > { %v1706_v52 = vpop.f32.mrb[16].mxu1 }
 0x6dc   : > { %v5139_v53 = vpop.f32.mrb[17].mxu1 }
 0x6dd   : > { %v1709_v54 = vpop.f32.mrb[18].mxu1  ;;  %v5562_v53 = vld [vmem:[#allocation20 + $0xc0] sm:$0xff]  }
 0x6de   : > { %v1713_v55 = vpack.c.bf16 %v1709_v54, %v1706_v52  ;;  %v5140_v56 = vpop.f32.mrb[19].mxu1  ;;  %v5561_v52 = vld [vmem:[#allocation20 + $0x40] sm:$0xff]  }
 0x6df   : > { %4942 = vmatprep.subr.bf16.mxu1 %v5561_v52 }
 0x6e0   : > { %1715 = vrot.lane.b32.xlu0 %v1713_v55, %s6350_s6 }
 0x71b   : > { %v1460_v57 = vpop.permute.xlu0 %1459 }
 0x71c   : > { %1463 = vst.msk [vmem:[#allocation2] sm:$0xff] %vm1462_vm3, %v1460_v57 }
 0x723   : > { %v1588_v58 = vpop.permute.xlu1 %1587 }
 0x724   : > { %1591 = vst.msk [vmem:[#allocation2] sm:$0xff] %vm1590_vm4, %v1588_v58 }
 0x752   : > { %v1716_v59 = vpop.permute.xlu0 %1715 }
 0x753   : > { %1719 = vst.msk [vmem:[#allocation2] sm:$0xff] %vm1718_vm5, %v1716_v59 }
 0x75a   : > { %v1720_v62 = vld [vmem:[#allocation2] sm:$0xff] }
 0x75b   : > { %5158 = vmatmul.mubr.bf16.vlgmr.msra.gmra.mrb[20].mxu0 %v1720_v62 }
 0x75c   : > { %2166 = vmatprep.mubr.bf16.mxu0 %v6346_v1  ;;  %2135 = vmatpush1.bf16.msra.mxu0 %v5516_v12 }
 0x75d   : > { %2136 = vmatprep.subr.bf16.mxu0 %v5524_v14  ;;  %v5567_v14 = vld [vmem:[#allocation20 + $0x8] sm:$0xff]  }
 0x760   : > { %2137 = vmatpush1.bf16.msra.mxu0 %v5522_v16  ;;  %v5569_v16 = vld [vmem:[#allocation20 + $0x50] sm:$0xff]  }
 0x761   : > { %2138 = vmatprep.subr.bf16.mxu0 %v5530_v25  ;;  %v5579_v25 = vld [vmem:[#allocation20 + $0x20] sm:$0xff]  }
 0x764   : > { %2139 = vmatpush1.bf16.msra.mxu0 %v5528_v27  ;;  %v5581_v27 = vld [vmem:[#allocation20 + $0x68] sm:$0xff]  }
 0x765   : > { %2140 = vmatprep.subr.bf16.mxu0 %v5536_v29  ;;  %v5583_v29 = vld [vmem:[#allocation20 + $0x28] sm:$0xff]  }
 0x768   : > { %2141 = vmatpush1.bf16.msra.mxu0 %v5534_v34  ;;  %v5585_v34 = vld [vmem:[#allocation20 + $0x70] sm:$0xff]  }
 0x769   : > { %2142 = vmatprep.subr.bf16.mxu0 %v5542_v36  ;;  %v5587_v36 = vld [vmem:[#allocation20 + $0x30] sm:$0xff]  }
 0x76c   : > { %2143 = vmatpush1.bf16.msra.mxu0 %v5540_v39  ;;  %v5589_v39 = vld [vmem:[#allocation20 + $0x78] sm:$0xff]  }
 0x76d   : > { %2144 = vmatprep.subr.bf16.mxu0 %v5548_v41  ;;  %v5591_v41 = vld [vmem:[#allocation20 + $0x38] sm:$0xff]  }
 0x770   : > { %2145 = vmatpush1.bf16.msra.mxu0 %v5546_v43  ;;  %v1909_v43 = vld [vmem:[#allocation18] sm:$0xf] }
 0x771   : > { %2146 = vmatprep.subr.bf16.mxu0 %v5554_v45  ;;  %v1914_v45 = vrot.slane %v1909_v43, %v6949_v33  ;;  %v1922_v46 = vrot.slane %v1909_v43, %v6952_v37  ;;  %v1926_v48 = vrot.slane %v1909_v43, %v1925_v44 }
 0x774   : > { %2147 = vmatpush1.bf16.msra.mxu0 %v5552_v47  ;;  %v1918_v47 = vrot.slane %v1909_v43, %v6946_v32  ;;  %v5599_v43 = vld [vmem:[#allocation9 + $0xdc] ss:$12 sps:$4 sm:$0xff]  }
 0x775   : > { %2148 = vmatprep.subr.bf16.mxu0 %v5560_v51 }
 0x778   : > { %2149 = vmatpush1.bf16.msra.mxu0 %v5558_v50 }
 0x779   : > { %4964 = vmatprep.subr.bf16.mxu0 %v5562_v53 }
 0x82e   : > { %v1826_v0 = vpop.f32.mrb[20].mxu0 }
 0x82f   : > { %v1827_v3 = vadd.f32 %v4689_v63, %v1826_v0  ;;  %v5159_v4 = vpop.f32.mrb[21].mxu0 }
 0x830   : > { %v1829_v5 = vpop.f32.mrb[22].mxu0 }
 0x831   : > { %v1830_v6 = vadd.f32 %v4689_v63, %v1829_v5  ;;  %v5160_v7 = vpop.f32.mrb[23].mxu0  ;;  %v1833_v8 = vadd.f32 %v1827_v3, %v6962_v60  ;;  %v4698_v63 = vld [vmem:[#allocation14] ss:$0 sm:$0xff] }
 0x833   : > { %1837 = vadd.xlane.f32.xlu1 %v1833_v8  ;;  %v1834_v9 = vadd.f32 %v1830_v6, %v6964_v61  ;;  %v4699_v6 = vld [vmem:[#allocation15] ss:$0 sm:$0xff] }
 0x835   : > { %1839 = vadd.xlane.f32.xlu0 %v1834_v9 }
 0x8c0   : > { %v1838_v60 = vpop.xlane.xlu1 %1837 }
 0x8c1   : > { %v1842_v17 = vmul.f32 0.0078125, %v1838_v60  ;;  %v5570_v60 = vld [vmem:[#allocation20 + $0xd0] sm:$0xff]  }
 0x8c2   : > { %v1840_v61 = vpop.xlane.xlu0 %1839 }
 0x8c3   : > { %v7066_v18 = vsub.f32 %v1833_v8, %v1842_v17  ;;  %v1843_v19 = vmul.f32 0.0078125, %v1840_v61  ;;  %v5571_v17 = vld [vmem:[#allocation20 + $0x10] sm:$0xff]  }
 0x8c4   : > { %v5572_v61 = vld [vmem:[#allocation20 + $0x90] sm:$0xff]  }
 0x8c5   : > { %v7068_v21 = vsub.f32 %v1834_v9, %v1843_v19  ;;  %v1846_v22 = vmul.f32 %v7066_v18, %v7066_v18  ;;  %v5574_v19 = vld [vmem:[#allocation20 + $0xd8] sm:$0xff]  }
 0x8c7   : > { %1848 = vadd.xlane.f32.xlu0 %v1846_v22  ;;  %v1847_v23 = vmul.f32 %v7068_v21, %v7068_v21  ;;  %v5576_v22 = vld [vmem:[#allocation20 + $0x98] sm:$0xff]  }
 0x8c9   : > { %1850 = vadd.xlane.f32.xlu1 %v1847_v23  ;;  %v5577_v23 = vld [vmem:[#allocation20 + $0x60] sm:$0xff]  }
 0x954   : > { %v1849_v54 = vpop.xlane.xlu0 %1848 }
 0x955   : > { %v1852_v55 = vmul.f32 0.0078125, %v1849_v54 }
 0x956   : > { %v1851_v56 = vpop.xlane.xlu1 %1850 }
 0x957   : > { %v1854_v57 = vadd.f32 1e-05, %v1852_v55  ;;  %v1853_v58 = vmul.f32 0.0078125, %v1851_v56 }
 0x959   : > { %5753 = vrsqrt.f32 %v1854_v57  ;;  %v1855_v59 = vadd.f32 1e-05, %v1853_v58 }
 0x95b   : > { %5755 = vrsqrt.f32 %v1855_v59 }
 0x963   : > { %v5754_v62 = vpop.eup %5753 }
 0x964   : > { %v1858_v0 = vmul.f32 %v5754_v62, %v7066_v18  ;;  %v5573_v18 = vld [vmem:[#allocation20 + $0x58] sm:$0xff]  }
 0x965   : > { %v5756_v3 = vpop.eup %5755 }
 0x966   : > { %v1859_v4 = vmul.f32 %v5756_v3, %v7068_v21  ;;  %v1866_v5 = vmul.f32 %v4698_v63, %v1858_v0  ;;  %v5575_v21 = vld [vmem:[#allocation20 + $0x18] sm:$0xff]  }
 0x968   : > { %v1867_v7 = vmul.f32 %v4698_v63, %v1859_v4  ;;  %v7076_v8 = vadd.f32 %v4699_v6, %v1866_v5 }
 0x96a   : > { %v7078_v9 = vadd.f32 %v4699_v6, %v1867_v7 }
 0x96c   : > { %v1876_v12 = vpack.c.bf16 %v7078_v9, %v7076_v8 }
 0x96e   : > { %2124 = vmatmul.mubr.bf16.vlgmr.msra.gmra.mrb[20].mxu1 %v1876_v12  ;;  %2167 = vmatmul.mubr.bf16.vlgmr.msra.gmra.mrb[24].mxu0 %v1876_v12 }
 0x96f   : > { %4943 = vmatpush3.bf16.msra.mxu1 %v5563_v10  ;;  %4965 = vmatpush3.bf16.msra.mxu0 %v5564_v11 }
 0x970   : > { %4944 = vmatprep.subr.bf16.mxu1 %v5565_v20  ;;  %4966 = vmatprep.subr.bf16.mxu0 %v5566_v13 }
 0x973   : > { %4945 = vmatpush3.bf16.msra.mxu1 %v5567_v14  ;;  %4967 = vmatpush3.bf16.msra.mxu0 %v5568_v15 }
 0x974   : > { %4946 = vmatprep.subr.bf16.mxu1 %v5569_v16  ;;  %4968 = vmatprep.subr.bf16.mxu0 %v5570_v60 }
 0x977   : > { %4947 = vmatpush3.bf16.msra.mxu1 %v5571_v17  ;;  %4969 = vmatpush3.bf16.msra.mxu0 %v5572_v61 }
 0x978   : > { %4948 = vmatprep.subr.bf16.mxu1 %v5573_v18  ;;  %4970 = vmatprep.subr.bf16.mxu0 %v5574_v19  ;;  %v4732_v18 = vld [vmem:[#allocation21] ss:$0 sm:$0xff] }
 0x97b   : > { %4949 = vmatpush3.bf16.msra.mxu1 %v5575_v21  ;;  %4971 = vmatpush3.bf16.msra.mxu0 %v5576_v22 }
 0x97c   : > { %4950 = vmatprep.subr.bf16.mxu1 %v5577_v23  ;;  %4972 = vmatprep.subr.bf16.mxu0 %v5578_v24 }
 0x97f   : > { %4951 = vmatpush3.bf16.msra.mxu1 %v5579_v25  ;;  %4973 = vmatpush3.bf16.msra.mxu0 %v5580_v26 }
 0x980   : > { %4952 = vmatprep.subr.bf16.mxu1 %v5581_v27  ;;  %4974 = vmatprep.subr.bf16.mxu0 %v5582_v28 }
 0x983   : > { %4953 = vmatpush3.bf16.msra.mxu1 %v5583_v29  ;;  %4975 = vmatpush3.bf16.msra.mxu0 %v5584_v30 }
 0x984   : > { %4954 = vmatprep.subr.bf16.mxu1 %v5585_v34  ;;  %4976 = vmatprep.subr.bf16.mxu0 %v5586_v35 }
 0x987   : > { %4955 = vmatpush3.bf16.msra.mxu1 %v5587_v36  ;;  %4977 = vmatpush3.bf16.msra.mxu0 %v5588_v38 }
 0x988   : > { %4956 = vmatprep.subr.bf16.mxu1 %v5589_v39  ;;  %4978 = vmatprep.subr.bf16.mxu0 %v5590_v40  ;;  %v5593_v40 = vld [vmem:[#allocation9 + $0xc0] ss:$12 sps:$4 sm:$0xff]  }
 0x98b   : > { %4957 = vmatpush3.bf16.msra.mxu1 %v5591_v41  ;;  %4979 = vmatpush3.bf16.msra.mxu0 %v5592_v42  ;;  %v5595_v41 = vld [vmem:[#allocation9 + $0xc4] ss:$12 sps:$4 sm:$0xff]   ;;  %v5596_v42 = vld [vmem:[#allocation9 + $0xc8] ss:$12 sps:$4 sm:$0xff]  }
 0x98c   : > { %5161 = vmatprep.subr.bf16.mxu0 %v6347_v2  ;;  %2756 = vmatprep.subr.bf16.mxu1 %v5595_v41 }
 0xa41   : > { %v2125_v49 = vpop.f32.mrb[20].mxu1  ;;  %v2168_v50 = vpop.f32.mrb[24].mxu0 }
 0xa42   : > { %v2126_v51 = vadd.f32 %v2125_v49, %v1914_v45  ;;  %v2169_v52 = vadd.f32 %v2168_v50, %v1922_v46  ;;  %v2127_v53 = vpop.f32.mrb[21].mxu1  ;;  %v2170_v54 = vpop.f32.mrb[25].mxu0 }
 0xa43   : > { %v2128_v55 = vadd.f32 %v2127_v53, %v1918_v47  ;;  %v2171_v56 = vadd.f32 %v2170_v54, %v1926_v48  ;;  %v2129_v57 = vpop.f32.mrb[22].mxu1  ;;  %v2172_v58 = vpop.f32.mrb[26].mxu0  ;;  %v5603_v53 = vld [vmem:[#allocation9 + $0xf4] ss:$12 sps:$4 sm:$0xff]   ;;  %v5601_v54 = vld [vmem:[#allocation9 + $0xf0] ss:$12 sps:$4 sm:$0xff]  }
 0xa44   : > { %v2130_v59 = vadd.f32 %v2129_v57, %v1914_v45  ;;  %v2173_v62 = vadd.f32 %v2172_v58, %v1922_v46  ;;  %v2131_v63 = vpop.f32.mrb[23].mxu1  ;;  %v2174_v0 = vpop.f32.mrb[27].mxu0  ;;  %v2177_v5 = vmax.f32 %v2126_v51, 0.0  ;;  %v2179_v6 = vmax.f32 %v2169_v52, 0.0  ;;  %v5600_v45 = vld [vmem:[#allocation9 + $0xe0] ss:$12 sps:$4 sm:$0xff]  }
 0xa45   : > { %v2132_v3 = vadd.f32 %v2131_v63, %v1918_v47  ;;  %v2175_v4 = vadd.f32 %v2174_v0, %v1926_v48  ;;  %v2178_v11 = vmax.f32 %v2128_v55, 0.0  ;;  %v2180_v12 = vmax.f32 %v2171_v56, 0.0  ;;  %v5597_v46 = vld [vmem:[#allocation9 + $0xd8] ss:$12 sps:$4 sm:$0xff]   ;;  %v5605_v57 = vld [vmem:[#allocation9 + $0x108] ss:$12 sps:$4 sm:$0xff]  }
 0xa46   : > { %v2181_v7 = vmax.f32 %v2130_v59, 0.0  ;;  %v2183_v10 = vmax.f32 %v2173_v62, 0.0  ;;  %v5604_v55 = vld [vmem:[#allocation9 + $0xf8] ss:$12 sps:$4 sm:$0xff]   ;;  %v5608_v58 = vld [vmem:[#allocation9 + $0x110] ss:$12 sps:$4 sm:$0xff]  }
 0xa47   : > { %v2182_v20 = vmax.f32 %v2132_v3, 0.0  ;;  %v2184_v13 = vmax.f32 %v2175_v4, 0.0  ;;  %v5607_v56 = vld [vmem:[#allocation9 + $0x10c] ss:$12 sps:$4 sm:$0xff]   ;;  %v5611_v59 = vld [vmem:[#allocation9 + $0x124] ss:$12 sps:$4 sm:$0xff]  }
 0xa48   : > { %v2185_v14 = vpack.c.bf16 %v2181_v7, %v2177_v5  ;;  %v2187_v15 = vpack.c.bf16 %v2183_v10, %v2179_v6  ;;  %v5609_v62 = vld [vmem:[#allocation9 + $0x120] ss:$12 sps:$4 sm:$0xff]   ;;  %v5612_v63 = vld [vmem:[#allocation9 + $0x128] ss:$12 sps:$4 sm:$0xff]   ;;  %v5613_v3 = vld [vmem:[#allocation9 + $0x138] ss:$12 sps:$4 sm:$0xff]  }
 0xa49   : > { %v2186_v16 = vpack.c.bf16 %v2182_v20, %v2178_v11  ;;  %v2188_v60 = vpack.c.bf16 %v2184_v13, %v2180_v12  ;;  %v5615_v0 = vld [vmem:[#allocation9 + $0x13c] ss:$12 sps:$4 sm:$0xff]   ;;  %v5616_v4 = vld [vmem:[#allocation9 + $0x140] ss:$12 sps:$4 sm:$0xff]   ;;  %v5620_v7 = vld [vmem:[#allocation9 + $0x158] ss:$12 sps:$4 sm:$0xff]  }
 0xa4a   : > { %v5619_v5 = vld [vmem:[#allocation9 + $0x154] ss:$12 sps:$4 sm:$0xff]   ;;  %v5617_v6 = vld [vmem:[#allocation9 + $0x150] ss:$12 sps:$4 sm:$0xff]   ;;  %v5623_v10 = vld [vmem:[#allocation9 + $0x16c] ss:$12 sps:$4 sm:$0xff]  }
 0xa4b   : > { %2484 = vmatprep.mubr.bf16.mxu1 %v2186_v16  ;;  %2525 = vmatprep.mubr.bf16.mxu0 %v2188_v60  ;;  %v5621_v11 = vld [vmem:[#allocation9 + $0x168] ss:$12 sps:$4 sm:$0xff]   ;;  %v5624_v12 = vld [vmem:[#allocation9 + $0x170] ss:$12 sps:$4 sm:$0xff]  }
 0xa4c   : > { %2485 = vmatmul.mubr.bf16.vlgmr.msra.gmra.mrb[24].mxu1 %v2185_v14  ;;  %2526 = vmatmul.mubr.bf16.vlgmr.msra.gmra.mrb[28].mxu0 %v2187_v15 }
 0xa4d   : > { %2788 = vmatprep.mubr.bf16.mxu1 %v6346_v1  ;;  %5177 = vmatprep.mubr.msk.bf16.mxu0 %vm6349_vm0, %v6347_v2 }
 0xa4e   : > { %5162 = vmatpush3.bf16.msra.mxu0 %v5596_v42  ;;  %2757 = vmatpush1.bf16.msra.mxu1 %v5593_v40 }
 0xa4f   : > { %5163 = vmatprep.subr.bf16.mxu0 %v6347_v2  ;;  %2758 = vmatprep.subr.bf16.mxu1 %v5599_v43 }
 0xa52   : > { %5164 = vmatpush3.bf16.msra.mxu0 %v5600_v45  ;;  %2759 = vmatpush1.bf16.msra.mxu1 %v5597_v46 }
 0xa53   : > { %5165 = vmatprep.subr.bf16.mxu0 %v6347_v2  ;;  %2760 = vmatprep.subr.bf16.mxu1 %v5603_v53 }
 0xa56   : > { %2761 = vmatpush1.bf16.msra.mxu1 %v5601_v54  ;;  %5166 = vmatpush3.bf16.msra.mxu0 %v5604_v55  ;;  %v7130_v54 = vld [vmem:[%s745_s17] ss:$0 sm:$0xff] }
 0xa57   : > { %5167 = vmatprep.subr.bf16.mxu0 %v6347_v2  ;;  %2762 = vmatprep.subr.bf16.mxu1 %v5607_v56 }
 0xa5a   : > { %2763 = vmatpush1.bf16.msra.mxu1 %v5605_v57  ;;  %5168 = vmatpush3.bf16.msra.mxu0 %v5608_v58 }
 0xa5b   : > { %5169 = vmatprep.subr.bf16.mxu0 %v6347_v2  ;;  %2764 = vmatprep.subr.bf16.mxu1 %v5611_v59 }
 0xa5e   : > { %2765 = vmatpush1.bf16.msra.mxu1 %v5609_v62  ;;  %5170 = vmatpush3.bf16.msra.mxu0 %v5612_v63 }
 0xa5f   : > { %5171 = vmatprep.subr.bf16.mxu0 %v6347_v2  ;;  %2766 = vmatprep.subr.bf16.mxu1 %v5615_v0 }
 0xa62   : > { %2767 = vmatpush1.bf16.msra.mxu1 %v5613_v3  ;;  %5172 = vmatpush3.bf16.msra.mxu0 %v5616_v4 }
 0xa63   : > { %5173 = vmatprep.subr.bf16.mxu0 %v6347_v2  ;;  %2768 = vmatprep.subr.bf16.mxu1 %v5619_v5 }
 0xa66   : > { %2769 = vmatpush1.bf16.msra.mxu1 %v5617_v6  ;;  %5174 = vmatpush3.bf16.msra.mxu0 %v5620_v7 }
 0xa67   : > { %2770 = vmatprep.subr.bf16.mxu1 %v5623_v10  ;;  %5175 = vmatprep.subr.bf16.mxu0 %v6347_v2 }
 0xa6a   : > { %2771 = vmatpush1.bf16.msra.mxu1 %v5621_v11  ;;  %5176 = vmatpush3.bf16.msra.mxu0 %v5624_v12 }
 0xa6b   : > { %5181 = vmatprep.subr.bf16.mxu1 %v6347_v2  ;;  %5205 = vmatprep.subr.bf16.mxu0 %v6347_v2 }
 0xb1f   : > { %v4958_v17 = vpop.f32.mrb[24].mxu1  ;;  %v4980_v61 = vpop.f32.mrb[28].mxu0 }
 0xb20   : > { %v4959_v19 = vpop.f32.mrb[25].mxu1  ;;  %v4981_v21 = vpop.f32.mrb[29].mxu0 }
 0xb21   : > { %v4960_v22 = vadd.f32 %v4959_v19, %v4958_v17  ;;  %v4982_v23 = vadd.f32 %v4981_v21, %v4980_v61  ;;  %v4961_v24 = vpop.f32.mrb[26].mxu1  ;;  %v4983_v25 = vpop.f32.mrb[30].mxu0  ;;  %v4765_v61 = vld [vmem:[#allocation23] ss:$0 sm:$0xff] }
 0xb22   : > { %v4962_v26 = vpop.f32.mrb[27].mxu1  ;;  %v4984_v27 = vpop.f32.mrb[31].mxu0 }
 0xb23   : > { %v2487_v28 = vadd.f32 %v4960_v22, %v4732_v18  ;;  %v4963_v29 = vadd.f32 %v4962_v26, %v4961_v24  ;;  %v4985_v30 = vadd.f32 %v4984_v27, %v4983_v25 }
 0xb25   : > { %v2528_v34 = vadd.f32 %v4982_v23, %v2487_v28  ;;  %v2490_v35 = vadd.f32 %v4963_v29, %v4732_v18  ;;  %v4766_v23 = vld [vmem:[#allocation24] ss:$0 sm:$0xff]  ;;  %v4767_v28 = vld [vmem:[%s7460_s18 + $0x3] sm:$0x7] }
 0xb26   : > { %v2616_v29 = vrot.slane %v4767_v28, %v6949_v33 }
 0xb27   : > { %v2531_v36 = vadd.f32 %v4985_v30, %v2490_v35  ;;  %v2534_v38 = vadd.f32 %v2528_v34, %v7076_v8  ;;  %v2624_v30 = vrot.slane %v4767_v28, %v6952_v37 }
 0xb29   : > { %2538 = vadd.xlane.f32.xlu0 %v2534_v38  ;;  %v2535_v39 = vadd.f32 %v2531_v36, %v7078_v9  ;;  %v2620_v36 = vrot.slane %v4767_v28, %v6946_v32 }
 0xb2b   : > { %2540 = vadd.xlane.f32.xlu1 %v2535_v39 }
 0xbb6   : > { %v2539_v8 = vpop.xlane.xlu0 %2538 }
 0xbb7   : > { %v2542_v47 = vmul.f32 0.0078125, %v2539_v8 }
 0xbb8   : > { %v2541_v9 = vpop.xlane.xlu1 %2540 }
 0xbb9   : > { %v2544_v48 = vsub.f32 %v2534_v38, %v2542_v47  ;;  %v2543_v49 = vmul.f32 0.0078125, %v2541_v9 }
 0xbbb   : > { %v2545_v50 = vsub.f32 %v2535_v39, %v2543_v49  ;;  %v2546_v51 = vmul.f32 %v2544_v48, %v2544_v48 }
 0xbbd   : > { %2548 = vadd.xlane.f32.xlu0 %v2546_v51  ;;  %v2547_v52 = vmul.f32 %v2545_v50, %v2545_v50 }
 0xbbf   : > { %2550 = vadd.xlane.f32.xlu1 %v2547_v52 }
 0xc4a   : > { %v2549_v20 = vpop.xlane.xlu0 %2548 }
 0xc4b   : > { %v2552_v13 = vmul.f32 0.0078125, %v2549_v20 }
 0xc4c   : > { %v2551_v14 = vpop.xlane.xlu1 %2550 }
 0xc4d   : > { %v2554_v15 = vadd.f32 1e-05, %v2552_v13  ;;  %v2553_v16 = vmul.f32 0.0078125, %v2551_v14 }
 0xc4f   : > { %5757 = vrsqrt.f32 %v2554_v15  ;;  %v2555_v60 = vadd.f32 1e-05, %v2553_v16 }
 0xc51   : > { %5759 = vrsqrt.f32 %v2555_v60 }
 0xc59   : > { %v5758_v17 = vpop.eup %5757 }
 0xc5a   : > { %v2558_v18 = vmul.f32 %v5758_v17, %v2544_v48 }
 0xc5b   : > { %v5760_v19 = vpop.eup %5759 }
 0xc5c   : > { %v2559_v21 = vmul.f32 %v5760_v19, %v2545_v50  ;;  %v2566_v22 = vmul.f32 %v4765_v61, %v2558_v18 }
 0xc5e   : > { %v2567_v24 = vmul.f32 %v4765_v61, %v2559_v21  ;;  %v7103_v25 = vadd.f32 %v4766_v23, %v2566_v22 }
 0xc60   : > { %v7105_v26 = vadd.f32 %v4766_v23, %v2567_v24 }
 0xc62   : > { %v2576_v27 = vpack.c.bf16 %v7105_v26, %v7103_v25 }
 0xc64   : > { %2789 = vmatmul.mubr.bf16.vlgmr.msra.gmra.mrb[28].mxu1 %v2576_v27  ;;  %5178 = vmatmul.mubr.bf16.vlgmr.msra.gmra.mrb[32].mxu0 %v2576_v27 }
 0xc65   : > { %5183 = vmatprep.mubr.msk.bf16.mxu1 %vm6349_vm0, %v6347_v2  ;;  %5207 = vmatprep.mubr.msk.bf16.mxu0 %vm6349_vm0, %v6347_v2 }
 0xd37   : > { %v2790_v34 = vpop.f32.mrb[28].mxu1  ;;  %v2833_v35 = vpop.f32.mrb[32].mxu0 }
 0xd38   : > { %v2792_v38 = vpop.f32.mrb[29].mxu1  ;;  %v5179_v39 = vpop.f32.mrb[33].mxu0  ;;  %v2791_v42 = vadd.f32 %v2790_v34, %v2616_v29  ;;  %v2834_v43 = vadd.f32 %v2833_v35, %v2624_v30 }
 0xd39   : > { %v2794_v40 = vpop.f32.mrb[30].mxu1  ;;  %v2836_v41 = vpop.f32.mrb[34].mxu0  ;;  %v2793_v9 = vadd.f32 %v2792_v38, %v2620_v36 }
 0xd3a   : > { %v2795_v45 = vadd.f32 %v2794_v40, %v2616_v29  ;;  %v2837_v46 = vadd.f32 %v2836_v41, %v2624_v30  ;;  %v2796_v8 = vpop.f32.mrb[31].mxu1  ;;  %v5180_v47 = vpop.f32.mrb[35].mxu0 }
 0xd3b   : > { %v2797_v48 = vadd.f32 %v2796_v8, %v2620_v36 }
 0xd3c   : > { %v2840_v49 = vpack.c.bf16 %v2795_v45, %v2791_v42  ;;  %v7119_v50 = vpack.c.bf16 %v2837_v46, %v2834_v43 }
 0xd3d   : > { %v2841_v51 = vpack.c.bf16 %v2797_v48, %v2793_v9 }
 0xd3f   : > { %v2847_v52 = vsel %vm1215_vm1, %v2841_v51, 0 }
 0xd40   : > { %5182 = vmatpush3.bf16.xpose.msra.mxu1 %v2847_v52 }
 0xd41   : > { %5187 = vmatprep.subr.bf16.mxu1 %v6347_v2 }
 0xd47   : > { %5184 = vmatmul.mubr.msk.bf16.vlgmr.msra.gmra.mrb[32].mxu1 %vm1215_vm1, %v2840_v49 }
 0xd48   : > { %5188 = vmatpush3.bf16.msra.mxu1 %v7119_v50  ;;  %5189 = vmatprep.mubr.msk.bf16.mxu1 %vm6349_vm0, %v6347_v2 }
 0xd49   : > { %5193 = vmatprep.subr.bf16.mxu1 %v6347_v2 }
 0xe1a   : > { %v2883_v53 = vpop.f32.mrb[32].mxu1 }
 0xe1b   : > { %v2884_v55 = vadd.f32 %v7130_v54, %v2883_v53  ;;  %v5185_v56 = vpop.f32.mrb[33].mxu1 }
 0xe1c   : > { %v2886_v57 = vpop.f32.mrb[34].mxu1 }
 0xe1d   : > { %v2887_v58 = vadd.f32 %v7130_v54, %v2886_v57  ;;  %v5186_v59 = vpop.f32.mrb[35].mxu1  ;;  %v2890_v62 = vsel %vm1263_vm2, %v2884_v55, -inf }
 0xe1e   : > { %2891 = vmax.xlane.f32.xlu0 %v2890_v62 }
 0xe1f   : > { %v2893_v63 = vsel %vm1263_vm2, %v2887_v58, -inf }
 0xe20   : > { %2894 = vmax.xlane.f32.xlu1 %v2893_v63 }
 0xeab   : > { %v2892_v0 = vpop.xlane.xlu0 %2891 }
 0xeac   : > { %v2896_v3 = vsub.f32 %v2884_v55, %v2892_v0 }
 0xead   : > { %v2895_v4 = vpop.xlane.xlu1 %2894 }
 0xeae   : > { %v2898_v5 = vmul.f32 1.442695, %v2896_v3  ;;  %v2897_v6 = vsub.f32 %v2887_v58, %v2895_v4 }
 0xeb0   : > { %5761 = vpow2.f32 %v2898_v5  ;;  %v2900_v7 = vmul.f32 1.442695, %v2897_v6 }
 0xeb2   : > { %5763 = vpow2.f32 %v2900_v7 }
 0xeba   : > { %v5762_v10 = vpop.eup %5761 }
 0xebb   : > { %v2902_v11 = vsel %vm1263_vm2, %v5762_v10, 0.0 }
 0xebc   : > { %v5764_v12 = vpop.eup %5763  ;;  %2903 = vadd.xlane.f32.xlu0 %v2902_v11 }
 0xebd   : > { %v2905_v20 = vsel %vm1263_vm2, %v5764_v12, 0.0 }
 0xebe   : > { %2906 = vadd.xlane.f32.xlu1 %v2905_v20 }
 0xecf   : > { %2960 = vrot.lane.b32.xlu1 %v2840_v49, %s6350_s6 }
 0xed2   : > { %2963 = vrot.lane.b32.xlu0 %v2841_v51, %s6350_s6 }
 0xed3   : > { %3091 = vrot.lane.b32.xlu1 %v2841_v51, %s7400_s9 }
 0xed6   : > { %3089 = vrot.lane.b32.xlu0 %v2840_v49, %s7400_s9 }
 0xed7   : > { %3218 = vrot.lane.b32.xlu1 %v2841_v51, %s6352_s21 }
 0xeda   : > { %3216 = vrot.lane.b32.xlu0 %v2840_v49, %s6352_s21 }
 0xf49   : > { %v2904_v13 = vpop.xlane.xlu0 %2903 }
 0xf4a   : > { %5765 = vrcp.f32 %v2904_v13 }
 0xf4b   : > { %v2907_v14 = vpop.xlane.xlu1 %2906 }
 0xf4c   : > { %5767 = vrcp.f32 %v2907_v14 }
 0xf4d   : > { %v2964_v61 = vpop.permute.xlu0 %2963 }
 0xf4e   : > { %v2969_v24 = vsel %vm1215_vm1, %v2964_v61, 0 }
 0xf4f   : > { %v2961_v15 = vpop.permute.xlu1 %2960 }
 0xf51   : > { %v3090_v27 = vpop.permute.xlu0 %3089 }
 0xf53   : > { %v3092_v16 = vpop.permute.xlu1 %3091 }
 0xf54   : > { %v5766_v60 = vpop.eup %5765  ;;  %v3097_v17 = vsel %vm1215_vm1, %v3092_v16, 0 }
 0xf55   : > { %5206 = vmatpush3.bf16.xpose.msra.mxu0 %v3097_v17  ;;  %v2910_v19 = vmul.f32 %v5766_v60, %v5762_v10  ;;  %v3217_v29 = vpop.permute.xlu0 %3216 }
 0xf56   : > { %v5768_v18 = vpop.eup %5767  ;;  %5217 = vmatprep.subr.bf16.mxu0 %v6347_v2 }
 0xf57   : > { %v2911_v21 = vmul.f32 %v5768_v18, %v5764_v12  ;;  %v3219_v22 = vpop.permute.xlu1 %3218 }
 0xf58   : > { %v3224_v28 = vsel %vm1215_vm1, %v3219_v22, 0 }
 0xf59   : > { %v2912_v23 = vpack.c.bf16 %v2911_v21, %v2910_v19 }
 0xf5b   : > { %5190 = vmatmul.mubr.msk.bf16.vlgmr.msra.gmra.mrb[36].mxu1 %vm1263_vm2, %v2912_v23 }
 0xf5c   : > { %5194 = vmatpush3.bf16.xpose.msra.mxu1 %v2969_v24  ;;  %5208 = vmatmul.mubr.msk.bf16.vlgmr.msra.gmra.mrb[36].mxu0 %vm1215_vm1, %v3090_v27 }
 0xf5d   : > { %5218 = vmatpush3.bf16.xpose.msra.mxu0 %v3224_v28  ;;  %5195 = vmatprep.mubr.msk.bf16.mxu1 %vm6349_vm0, %v6347_v2 }
 0xf5e   : > { %5219 = vmatprep.mubr.msk.bf16.mxu0 %vm6349_vm0, %v6347_v2  ;;  %5199 = vmatprep.subr.bf16.mxu1 %v6347_v2 }
 0xf5f   : > { %5229 = vmatprep.subr.bf16.mxu0 %v6347_v2 }
 0xf63   : > { %5196 = vmatmul.mubr.msk.bf16.vlgmr.msra.gmra.mrb[40].mxu1 %vm1215_vm1, %v2961_v15 }
 0xf64   : > { %5220 = vmatmul.mubr.msk.bf16.vlgmr.msra.gmra.mrb[40].mxu0 %vm1215_vm1, %v3217_v29  ;;  %5201 = vmatprep.mubr.msk.bf16.mxu1 %vm6349_vm0, %v6347_v2 }
 0xf65   : > { %5245 = vmatprep.mubr.msk.bf16.mxu0 %vm6349_vm0, %v6347_v2 }
0x102e   : > { %v2950_v30 = vpop.f32.mrb[36].mxu1 }
0x102f   : > { %v5191_v34 = vpop.f32.mrb[37].mxu1  ;;  %v3133_v35 = vpop.f32.mrb[36].mxu0 }
0x1030   : > { %v2953_v36 = vpop.f32.mrb[38].mxu1  ;;  %v5209_v38 = vpop.f32.mrb[37].mxu0  ;;  %v3134_v56 = vadd.f32 %v7130_v54, %v3133_v35 }
0x1031   : > { %v2957_v39 = vpack.c.bf16 %v2953_v36, %v2950_v30  ;;  %v5192_v40 = vpop.f32.mrb[39].mxu1  ;;  %v3136_v41 = vpop.f32.mrb[38].mxu0 }
0x1032   : > { %v5210_v42 = vpop.f32.mrb[39].mxu0  ;;  %v3137_v48 = vadd.f32 %v7130_v54, %v3136_v41  ;;  %v3140_v63 = vsel %vm1263_vm2, %v3134_v56, -inf }
0x1033   : > { %2958 = vst.msk [vmem:[#allocation2] sm:$0xff] %vm1215_vm1, %v2957_v39 }
0x1034   : > { %v3143_v59 = vsel %vm1263_vm2, %v3137_v48, -inf }
0x1036   : > { %v3005_v43 = vpop.f32.mrb[40].mxu1 }
0x1037   : > { %v3006_v45 = vadd.f32 %v7130_v54, %v3005_v43  ;;  %v5197_v46 = vpop.f32.mrb[41].mxu1  ;;  %v3260_v8 = vpop.f32.mrb[40].mxu0 }
0x1038   : > { %v3008_v47 = vpop.f32.mrb[42].mxu1  ;;  %v5221_v9 = vpop.f32.mrb[41].mxu0  ;;  %v3261_v62 = vadd.f32 %v7130_v54, %v3260_v8 }
0x1039   : > { %v3009_v49 = vadd.f32 %v7130_v54, %v3008_v47  ;;  %v5198_v51 = vpop.f32.mrb[43].mxu1  ;;  %v3263_v52 = vpop.f32.mrb[42].mxu0  ;;  %v3012_v53 = vsel %vm1263_vm2, %v3006_v45, -inf }
0x103a   : > { %v5222_v55 = vpop.f32.mrb[43].mxu0  ;;  %3013 = vmax.xlane.f32.xlu1 %v3012_v53  ;;  %v3264_v58 = vadd.f32 %v7130_v54, %v3263_v52  ;;  %v3267_v3 = vsel %vm1263_vm2, %v3261_v62, -inf }
0x103b   : > { %v3015_v57 = vsel %vm1263_vm2, %v3009_v49, -inf }
0x103c   : > { %3016 = vmax.xlane.f32.xlu0 %v3015_v57  ;;  %v3270_v0 = vsel %vm1263_vm2, %v3264_v58, -inf }
0x103e   : > { %3144 = vmax.xlane.f32.xlu1 %v3143_v59 }
0x1040   : > { %3141 = vmax.xlane.f32.xlu0 %v3140_v63 }
0x1042   : > { %3271 = vmax.xlane.f32.xlu1 %v3270_v0 }
0x1044   : > { %3268 = vmax.xlane.f32.xlu0 %v3267_v3  ;;  %v5625_v3 = vld [vmem:[#allocation11 + $0x40] sm:$0xff]  }
0x1045   : > { %5230 = vmatpush3.bf16.msra.mxu0 %v5625_v3  ;;  %v5651_v3 = vld [vmem:[#allocation17 + $0x160] ss:$16 sps:$4 sm:$0xff]  }
0x1046   : > { %5231 = vmatprep.subr.bf16.mxu0 %v6347_v2 }
0x10c7   : > { %v3014_v4 = vpop.xlane.xlu1 %3013 }
0x10c8   : > { %v3018_v14 = vsub.f32 %v3006_v45, %v3014_v4  ;;  %v5626_v4 = vld [vmem:[#allocation11 + $0x48] sm:$0xff]  }
0x10c9   : > { %v3017_v5 = vpop.xlane.xlu0 %3016  ;;  %5232 = vmatpush3.bf16.msra.mxu0 %v5626_v4  ;;  %v5654_v4 = vld [vmem:[#allocation17 + $0x168] ss:$16 sps:$4 sm:$0xff]  }
0x10ca   : > { %v3019_v10 = vsub.f32 %v3009_v49, %v3017_v5  ;;  %v3020_v18 = vmul.f32 1.442695, %v3018_v14  ;;  %5233 = vmatprep.subr.bf16.mxu0 %v6347_v2  ;;  %v5627_v5 = vld [vmem:[#allocation11 + $0x50] sm:$0xff]  }
0x10cb   : > { %v3145_v6 = vpop.xlane.xlu1 %3144 }
0x10cc   : > { %v3147_v7 = vsub.f32 %v3137_v48, %v3145_v6  ;;  %v3022_v16 = vmul.f32 1.442695, %v3019_v10  ;;  %v5628_v6 = vld [vmem:[#allocation11 + $0x58] sm:$0xff]   ;;  %v5629_v10 = vld [vmem:[#allocation11 + $0x60] sm:$0xff]  }
0x10cd   : > { %v3142_v11 = vpop.xlane.xlu0 %3141  ;;  %5234 = vmatpush3.bf16.msra.mxu0 %v5627_v5  ;;  %v5659_v5 = vld [vmem:[#allocation17 + $0x184] ss:$16 sps:$4 sm:$0xff]  }
0x10ce   : > { %v3150_v12 = vmul.f32 1.442695, %v3147_v7  ;;  %v3146_v20 = vsub.f32 %v3134_v56, %v3142_v11  ;;  %5235 = vmatprep.subr.bf16.mxu0 %v6347_v2 }
0x10cf   : > { %v3272_v13 = vpop.xlane.xlu1 %3271 }
0x10d0   : > { %5769 = vpow2.f32 %v3150_v12  ;;  %v3148_v54 = vmul.f32 1.442695, %v3146_v20  ;;  %v3274_v15 = vsub.f32 %v3264_v58, %v3272_v13  ;;  %v5630_v20 = vld [vmem:[#allocation11 + $0x68] sm:$0xff]  }
0x10d1   : > { %v3269_v60 = vpop.xlane.xlu0 %3268  ;;  %5236 = vmatpush3.bf16.msra.mxu0 %v5628_v6  ;;  %v5662_v6 = vld [vmem:[#allocation17 + $0x18c] ss:$16 sps:$4 sm:$0xff]  }
0x10d2   : > { %5771 = vpow2.f32 %v3148_v54  ;;  %v3277_v17 = vmul.f32 1.442695, %v3274_v15  ;;  %v3273_v61 = vsub.f32 %v3261_v62, %v3269_v60  ;;  %5237 = vmatprep.subr.bf16.mxu0 %v6347_v2  ;;  %v5631_v15 = vld [vmem:[#allocation11 + $0x70] sm:$0xff]  }
0x10d4   : > { %5773 = vpow2.f32 %v3277_v17  ;;  %v3275_v19 = vmul.f32 1.442695, %v3273_v61  ;;  %v5632_v17 = vld [vmem:[#allocation11 + $0x78] sm:$0xff]  }
0x10d5   : > { %5775 = vpow2.f32 %v3022_v16  ;;  %5238 = vmatpush3.bf16.msra.mxu0 %v5629_v10  ;;  %v5660_v10 = vld [vmem:[#allocation17 + $0x188] ss:$16 sps:$4 sm:$0xff]  }
0x10d6   : > { %5777 = vpow2.f32 %v3275_v19  ;;  %5239 = vmatprep.subr.bf16.mxu0 %v6347_v2 }
0x10d7   : > { %5779 = vpow2.f32 %v3020_v18 }
0x10d9   : > { %5240 = vmatpush3.bf16.msra.mxu0 %v5630_v20  ;;  %v5663_v20 = vld [vmem:[#allocation17 + $0x1a0] ss:$16 sps:$4 sm:$0xff]  }
0x10da   : > { %v5770_v21 = vpop.eup %5769  ;;  %5241 = vmatprep.subr.bf16.mxu0 %v6347_v2 }
0x10db   : > { %v3155_v22 = vsel %vm1263_vm2, %v5770_v21, 0.0 }
0x10dc   : > { %v5772_v23 = vpop.eup %5771  ;;  %3156 = vadd.xlane.f32.xlu1 %v3155_v22 }
0x10dd   : > { %v3152_v24 = vsel %vm1263_vm2, %v5772_v23, 0.0  ;;  %5242 = vmatpush3.bf16.msra.mxu0 %v5631_v15  ;;  %v5669_v15 = vld [vmem:[#allocation17 + $0x1c0] ss:$16 sps:$4 sm:$0xff]  }
0x10de   : > { %v5774_v27 = vpop.eup %5773  ;;  %3153 = vadd.xlane.f32.xlu0 %v3152_v24  ;;  %5243 = vmatprep.subr.bf16.mxu0 %v6347_v2 }
0x10df   : > { %v5776_v28 = vpop.eup %5775  ;;  %v3282_v29 = vsel %vm1263_vm2, %v5774_v27, 0.0 }
0x10e0   : > { %v5778_v30 = vpop.eup %5777  ;;  %3283 = vadd.xlane.f32.xlu1 %v3282_v29  ;;  %v3027_v36 = vsel %vm1263_vm2, %v5776_v28, 0.0 }
0x10e1   : > { %v3279_v34 = vsel %vm1263_vm2, %v5778_v30, 0.0  ;;  %v5780_v35 = vpop.eup %5779  ;;  %5244 = vmatpush3.bf16.msra.mxu0 %v5632_v17  ;;  %v5680_v17 = vld [vmem:[#allocation17 + $0x1ec] ss:$16 sps:$4 sm:$0xff]  }
0x10e2   : > { %3280 = vadd.xlane.f32.xlu0 %v3279_v34  ;;  %v3024_v38 = vsel %vm1263_vm2, %v5780_v35, 0.0  ;;  %v4800_v34 = vld [vmem:[#allocation12 + $0x1] ss:$0 sm:$0xff] }
0x10e4   : > { %3028 = vadd.xlane.f32.xlu1 %v3027_v36 }
0x10e6   : > { %3025 = vadd.xlane.f32.xlu0 %v3024_v38 }
0x10f5   : > { %3163 = vrot.lane.b32.xlu1 %v7119_v50, %s7400_s9 }
0x10f9   : > { %3290 = vrot.lane.b32.xlu1 %v7119_v50, %s6352_s21 }
0x10fc   : > { %3036 = vrot.lane.b32.xlu0 %v7119_v50, %s6350_s6 }
0x1169   : > { %v3157_v39 = vpop.xlane.xlu1 %3156 }
0x116b   : > { %v3154_v40 = vpop.xlane.xlu0 %3153 }
0x116d   : > { %v3284_v41 = vpop.xlane.xlu1 %3283 }
0x116f   : > { %v3281_v42 = vpop.xlane.xlu0 %3280 }
0x1171   : > { %v3029_v43 = vpop.xlane.xlu1 %3028 }
0x1172   : > { %5781 = vrcp.f32 %v3029_v43 }
0x1173   : > { %v3026_v45 = vpop.xlane.xlu0 %3025 }
0x1174   : > { %5783 = vrcp.f32 %v3026_v45  ;;  %v5633_v45 = vld [vmem:[#allocation17 + $0x100] ss:$16 sps:$4 sm:$0xff]  }
0x1175   : > { %5785 = vrcp.f32 %v3154_v40  ;;  %v3164_v51 = vpop.permute.xlu1 %3163 }
0x1176   : > { %5787 = vrcp.f32 %v3157_v39 }
0x1177   : > { %v3037_v46 = vpop.permute.xlu0 %3036  ;;  %5789 = vrcp.f32 %v3281_v42 }
0x1178   : > { %5200 = vmatpush3.bf16.msra.mxu1 %v3037_v46  ;;  %5791 = vrcp.f32 %v3284_v41  ;;  %v5635_v46 = vld [vmem:[#allocation17 + $0x104] ss:$16 sps:$4 sm:$0xff]  }
0x1179   : > { %5211 = vmatprep.subr.bf16.mxu1 %v6347_v2  ;;  %v3291_v58 = vpop.permute.xlu1 %3290 }
0x117c   : > { %v5782_v8 = vpop.eup %5781 }
0x117d   : > { %v3033_v9 = vmul.f32 %v5782_v8, %v5776_v28  ;;  %v5636_v8 = vld [vmem:[#allocation17 + $0x108] ss:$16 sps:$4 sm:$0xff]  }
0x117e   : > { %v5784_v47 = vpop.eup %5783 }
0x117f   : > { %v3032_v48 = vmul.f32 %v5784_v47, %v5780_v35  ;;  %v5786_v49 = vpop.eup %5785  ;;  %v5638_v47 = vld [vmem:[#allocation17 + $0x10c] ss:$16 sps:$4 sm:$0xff]  }
0x1180   : > { %v5788_v52 = vpop.eup %5787  ;;  %v3160_v53 = vmul.f32 %v5786_v49, %v5772_v23  ;;  %3762 = vmatprep.subr.bf16.mxu0 %v5638_v47  ;;  %v5685_v47 = vld [vmem:[#allocation20 + $0x148] sm:$0xff]  }
0x1181   : > { %v3034_v50 = vpack.c.bf16 %v3033_v9, %v3032_v48  ;;  %v3161_v55 = vmul.f32 %v5788_v52, %v5770_v21  ;;  %v5790_v57 = vpop.eup %5789  ;;  %v5641_v9 = vld [vmem:[#allocation17 + $0x124] ss:$16 sps:$4 sm:$0xff]   ;;  %v5639_v48 = vld [vmem:[#allocation17 + $0x120] ss:$16 sps:$4 sm:$0xff]  }
0x1182   : > { %v5792_v59 = vpop.eup %5791  ;;  %v3287_v62 = vmul.f32 %v5790_v57, %v5778_v30  ;;  %v5647_v57 = vld [vmem:[#allocation17 + $0x144] ss:$16 sps:$4 sm:$0xff]  }
0x1183   : > { %5202 = vmatmul.mubr.msk.bf16.vlgmr.msra.gmra.mrb[44].mxu1 %vm1263_vm2, %v3034_v50  ;;  %v3162_v56 = vpack.c.bf16 %v3161_v55, %v3160_v53  ;;  %v3288_v63 = vmul.f32 %v5792_v59, %v5774_v27  ;;  %v5642_v50 = vld [vmem:[#allocation17 + $0x128] ss:$16 sps:$4 sm:$0xff]   ;;  %v5645_v59 = vld [vmem:[#allocation17 + $0x140] ss:$16 sps:$4 sm:$0xff]  }
0x1184   : > { %5212 = vmatpush3.bf16.msra.mxu1 %v3164_v51  ;;  %5213 = vmatprep.mubr.msk.bf16.mxu1 %vm6349_vm0, %v6347_v2 }
0x1185   : > { %5223 = vmatprep.subr.bf16.mxu1 %v6347_v2  ;;  %v3289_v0 = vpack.c.bf16 %v3288_v63, %v3287_v62  ;;  %v5648_v62 = vld [vmem:[#allocation17 + $0x148] ss:$16 sps:$4 sm:$0xff]   ;;  %v5653_v63 = vld [vmem:[#allocation17 + $0x164] ss:$16 sps:$4 sm:$0xff]  }
0x118b   : > { %5214 = vmatmul.mubr.msk.bf16.vlgmr.msra.gmra.mrb[48].mxu1 %vm1263_vm2, %v3162_v56 }
0x118c   : > { %5224 = vmatpush3.bf16.msra.mxu1 %v3291_v58  ;;  %5225 = vmatprep.mubr.msk.bf16.mxu1 %vm6349_vm0, %v6347_v2  ;;  %v5650_v58 = vld [vmem:[#allocation17 + $0x14c] ss:$16 sps:$4 sm:$0xff]  }
0x118d   : > { %3719 = vmatprep.subr.bf16.mxu1 %v5635_v46  ;;  %v5684_v46 = vld [vmem:[#allocation20 + $0x180] sm:$0xff]  }
0x1193   : > { %5226 = vmatmul.mubr.msk.bf16.vlgmr.msra.gmra.mrb[52].mxu1 %vm1263_vm2, %v3289_v0  ;;  %v5656_v0 = vld [vmem:[#allocation17 + $0x16c] ss:$16 sps:$4 sm:$0xff]  }
0x1194   : > { %3751 = vmatprep.mubr.bf16.mxu1 %v6346_v1  ;;  %3720 = vmatpush1.bf16.msra.mxu1 %v5633_v45  ;;  %v5683_v45 = vld [vmem:[#allocation20 + $0x100] sm:$0xff]  }
0x1195   : > { %3721 = vmatprep.subr.bf16.mxu1 %v5641_v9  ;;  %v5686_v9 = vld [vmem:[#allocation20 + $0x1c8] sm:$0xff]  }
0x1198   : > { %3722 = vmatpush1.bf16.msra.mxu1 %v5639_v48  ;;  %v5688_v48 = vld [vmem:[#allocation20 + $0x188] sm:$0xff]  }
0x1199   : > { %3723 = vmatprep.subr.bf16.mxu1 %v5647_v57  ;;  %v5698_v57 = vld [vmem:[#allocation20 + $0x1e0] sm:$0xff]  }
0x119c   : > { %3724 = vmatpush1.bf16.msra.mxu1 %v5645_v59  ;;  %v5700_v59 = vld [vmem:[#allocation20 + $0x1a0] sm:$0xff]  }
0x119d   : > { %3725 = vmatprep.subr.bf16.mxu1 %v5653_v63  ;;  %v5702_v63 = vld [vmem:[#allocation20 + $0x1e8] sm:$0xff]  }
0x11a0   : > { %3726 = vmatpush1.bf16.msra.mxu1 %v5651_v3  ;;  %v5704_v3 = vld [vmem:[#allocation20 + $0x1a8] sm:$0xff]  }
0x11a1   : > { %3727 = vmatprep.subr.bf16.mxu1 %v5659_v5  ;;  %v5706_v5 = vld [vmem:[#allocation20 + $0x1f0] sm:$0xff]  }
0x1256   : > { %v3076_v7 = vpop.f32.mrb[44].mxu1 }
0x1257   : > { %v5203_v11 = vpop.f32.mrb[45].mxu1 }
0x1258   : > { %v3079_v12 = vpop.f32.mrb[46].mxu1  ;;  %v5665_v11 = vld [vmem:[#allocation17 + $0x1a4] ss:$16 sps:$4 sm:$0xff]  }
0x1259   : > { %v3083_v13 = vpack.c.bf16 %v3079_v12, %v3076_v7  ;;  %v5204_v14 = vpop.f32.mrb[47].mxu1  ;;  %v5657_v7 = vld [vmem:[#allocation17 + $0x180] ss:$16 sps:$4 sm:$0xff]   ;;  %v5668_v12 = vld [vmem:[#allocation17 + $0x1ac] ss:$16 sps:$4 sm:$0xff]  }
0x125a   : > { %3728 = vmatpush1.bf16.msra.mxu1 %v5657_v7  ;;  %v5671_v14 = vld [vmem:[#allocation17 + $0x1c4] ss:$16 sps:$4 sm:$0xff]   ;;  %v5708_v7 = vld [vmem:[#allocation20 + $0x1b0] sm:$0xff]  }
0x125b   : > { %3085 = vrot.lane.b32.xlu0 %v3083_v13, %s6352_s21  ;;  %v5666_v13 = vld [vmem:[#allocation17 + $0x1a8] ss:$16 sps:$4 sm:$0xff]   ;;  %3729 = vmatprep.subr.bf16.mxu1 %v5665_v11  ;;  %v5710_v11 = vld [vmem:[#allocation20 + $0x1f8] sm:$0xff]  }
0x125e   : > { %v3203_v54 = vpop.f32.mrb[48].mxu1  ;;  %3730 = vmatpush1.bf16.msra.mxu1 %v5663_v20  ;;  %v5712_v20 = vld [vmem:[#allocation20 + $0x1b8] sm:$0xff]  }
0x125f   : > { %v5215_v16 = vpop.f32.mrb[49].mxu1  ;;  %3731 = vmatprep.subr.bf16.mxu1 %v5671_v14 }
0x1260   : > { %v3206_v60 = vpop.f32.mrb[50].mxu1  ;;  %v5672_v16 = vld [vmem:[#allocation17 + $0x1c8] ss:$16 sps:$4 sm:$0xff]  }
0x1261   : > { %v3210_v61 = vpack.c.bf16 %v3206_v60, %v3203_v54  ;;  %v5216_v18 = vpop.f32.mrb[51].mxu1  ;;  %v5674_v54 = vld [vmem:[#allocation17 + $0x1cc] ss:$16 sps:$4 sm:$0xff]   ;;  %v5677_v60 = vld [vmem:[#allocation17 + $0x1e4] ss:$16 sps:$4 sm:$0xff]  }
0x1262   : > { %3732 = vmatpush1.bf16.msra.mxu1 %v5669_v15  ;;  %v5678_v18 = vld [vmem:[#allocation17 + $0x1e8] ss:$16 sps:$4 sm:$0xff]  }
0x1263   : > { %3212 = vrot.lane.b32.xlu1 %v3210_v61, %s7400_s9  ;;  %v5675_v61 = vld [vmem:[#allocation17 + $0x1e0] ss:$16 sps:$4 sm:$0xff]   ;;  %3733 = vmatprep.subr.bf16.mxu1 %v5677_v60  ;;  %s6202_s9 = scalar_lea.vmem %s6201_s2, 512 }
0x1264   : > { %p6204_p6 = scmp.lt.s32.totalorder %s6202_s9, %s6196_s7 }
0x1266   : > { %v3330_v19 = vpop.f32.mrb[52].mxu1  ;;  %3734 = vmatpush1.bf16.msra.mxu1 %v5675_v61  ;;  %p6205_p12 = por %p6204_p6, %p6203_p11 }
0x1267   : > { %v5227_v21 = vpop.f32.mrb[53].mxu1 }
0x1268   : > { %v3333_v22 = vpop.f32.mrb[54].mxu1  ;;  %v5682_v21 = vld [vmem:[#allocation20 + $0x1c0] sm:$0xff]   ;;  %p6206_p5 = pnand %p6205_p12, %p6199_p10 }
0x1269   : > { %v3337_v23 = vpack.c.bf16 %v3333_v22, %v3330_v19  ;;  %v5228_v24 = vpop.f32.mrb[55].mxu1  ;;  %v5681_v19 = vld [vmem:[#allocation20 + $0x140] sm:$0xff]  }
0x126a   : > { %5020 = vmatprep.subr.bf16.mxu1 %v5681_v19 }
0x126b   : > { %3339 = vrot.lane.b32.xlu0 %v3337_v23, %s6350_s6  ;;  %s4901_s6 = sshll.u32 %s6484_s3, 8 }
0x126c   : > { %s7275_s17 = scalar_lea.hbm %s7462_s28, %s4901_s6 }
0x12cd   : > { %v3086_v27 = vpop.permute.xlu0 %3085 }
0x12ce   : > { %3088 = vst.msk [vmem:[#allocation2] sm:$0xff] %vm1462_vm3, %v3086_v27 }
0x12d5   : > { %v3213_v28 = vpop.permute.xlu1 %3212 }
0x12d6   : > { %3215 = vst.msk [vmem:[#allocation2] sm:$0xff] %vm1590_vm4, %v3213_v28 }
0x12dd   : > { %v3340_v29 = vpop.permute.xlu0 %3339 }
0x12de   : > { %3342 = vst.msk [vmem:[#allocation2] sm:$0xff] %vm1718_vm5, %v3340_v29 }
0x12e5   : > { %v3343_v30 = vld [vmem:[#allocation2] sm:$0xff] }
0x12e6   : > { %5246 = vmatmul.mubr.bf16.vlgmr.msra.gmra.mrb[44].mxu0 %v3343_v30 }
0x12e7   : > { %3794 = vmatprep.mubr.bf16.mxu0 %v6346_v1  ;;  %v5644_v1 = vld [vmem:[#allocation17 + $0x12c] ss:$16 sps:$4 sm:$0xff]   ;;  %3763 = vmatpush1.bf16.msra.mxu0 %v5636_v8 }
0x12e8   : > { %3764 = vmatprep.subr.bf16.mxu0 %v5644_v1  ;;  %v5687_v1 = vld [vmem:[#allocation20 + $0x108] sm:$0xff]  }
0x12eb   : > { %3765 = vmatpush1.bf16.msra.mxu0 %v5642_v50  ;;  %v5689_v50 = vld [vmem:[#allocation20 + $0x150] sm:$0xff]  }
0x12ec   : > { %3766 = vmatprep.subr.bf16.mxu0 %v5650_v58  ;;  %v5699_v58 = vld [vmem:[#allocation20 + $0x120] sm:$0xff]  }
0x12ef   : > { %3767 = vmatpush1.bf16.msra.mxu0 %v5648_v62  ;;  %v5701_v62 = vld [vmem:[#allocation20 + $0x168] sm:$0xff]  }
0x12f0   : > { %3768 = vmatprep.subr.bf16.mxu0 %v5656_v0  ;;  %v5703_v0 = vld [vmem:[#allocation20 + $0x128] sm:$0xff]  }
0x12f3   : > { %3769 = vmatpush1.bf16.msra.mxu0 %v5654_v4  ;;  %v5705_v4 = vld [vmem:[#allocation20 + $0x170] sm:$0xff]  }
0x12f4   : > { %3770 = vmatprep.subr.bf16.mxu0 %v5662_v6  ;;  %v5707_v6 = vld [vmem:[#allocation20 + $0x130] sm:$0xff]  }
0x12f7   : > { %3771 = vmatpush1.bf16.msra.mxu0 %v5660_v10  ;;  %v5709_v10 = vld [vmem:[#allocation20 + $0x178] sm:$0xff]  }
0x12f8   : > { %3772 = vmatprep.subr.bf16.mxu0 %v5668_v12  ;;  %v5711_v12 = vld [vmem:[#allocation20 + $0x138] sm:$0xff]  }
0x12fb   : > { %3773 = vmatpush1.bf16.msra.mxu0 %v5666_v13  ;;  %v3537_v13 = vld [vmem:[#allocation18 + $0x4] sm:$0xf] }
0x12fc   : > { %3774 = vmatprep.subr.bf16.mxu0 %v5674_v54  ;;  %v3542_v14 = vrot.slane %v3537_v13, %v6949_v33  ;;  %v3550_v54 = vrot.slane %v3537_v13, %v6952_v37  ;;  %v3546_v15 = vrot.slane %v3537_v13, %v6946_v32 }
0x12ff   : > { %3775 = vmatpush1.bf16.msra.mxu0 %v5672_v16  ;;  %v3554_v16 = vrot.slane %v3537_v13, %v1925_v44  ;;  %v5716_v13 = vld [vmem:[%s7461_s29 + $0x18] sm:$0xff]  }
0x1300   : > { %3776 = vmatprep.subr.bf16.mxu0 %v5680_v17 }
0x1303   : > { %3777 = vmatpush1.bf16.msra.mxu0 %v5678_v18 }
0x1304   : > { %5042 = vmatprep.subr.bf16.mxu0 %v5682_v21 }
0x13b9   : > { %v3451_v35 = vpop.f32.mrb[44].mxu0 }
0x13ba   : > { %v3452_v36 = vadd.f32 %v4800_v34, %v3451_v35  ;;  %v5247_v38 = vpop.f32.mrb[45].mxu0 }
0x13bb   : > { %v3454_v39 = vpop.f32.mrb[46].mxu0 }
0x13bc   : > { %v3455_v40 = vadd.f32 %v4800_v34, %v3454_v39  ;;  %v5248_v41 = vpop.f32.mrb[47].mxu0  ;;  %v3458_v42 = vadd.f32 %v3452_v36, %v7103_v25  ;;  %v4809_v34 = vld [vmem:[#allocation14 + $0x1] ss:$0 sm:$0xff] }
0x13be   : > { %3464 = vadd.xlane.f32.xlu1 %v3458_v42  ;;  %v3459_v43 = vadd.f32 %v3455_v40, %v7105_v26  ;;  %v4810_v40 = vld [vmem:[#allocation15 + $0x1] ss:$0 sm:$0xff] }
0x13c0   : > { %3466 = vadd.xlane.f32.xlu0 %v3459_v43 }
0x144b   : > { %v3465_v25 = vpop.xlane.xlu1 %3464 }
0x144c   : > { %v3468_v49 = vmul.f32 0.0078125, %v3465_v25  ;;  %v5690_v25 = vld [vmem:[#allocation20 + $0x1d0] sm:$0xff]  }
0x144d   : > { %v3467_v26 = vpop.xlane.xlu0 %3466 }
0x144e   : > { %v7213_v51 = vsub.f32 %v3458_v42, %v3468_v49  ;;  %v3469_v52 = vmul.f32 0.0078125, %v3467_v26  ;;  %v5691_v49 = vld [vmem:[#allocation20 + $0x110] sm:$0xff]  }
0x144f   : > { %v5692_v26 = vld [vmem:[#allocation20 + $0x190] sm:$0xff]  }
0x1450   : > { %v7215_v53 = vsub.f32 %v3459_v43, %v3469_v52  ;;  %v3472_v55 = vmul.f32 %v7213_v51, %v7213_v51  ;;  %v5694_v52 = vld [vmem:[#allocation20 + $0x1d8] sm:$0xff]  }
0x1452   : > { %3474 = vadd.xlane.f32.xlu0 %v3472_v55  ;;  %v3473_v56 = vmul.f32 %v7215_v53, %v7215_v53  ;;  %v5696_v55 = vld [vmem:[#allocation20 + $0x198] sm:$0xff]  }
0x1454   : > { %3476 = vadd.xlane.f32.xlu1 %v3473_v56  ;;  %v5697_v56 = vld [vmem:[#allocation20 + $0x160] sm:$0xff]  }
0x14df   : > { %v3475_v22 = vpop.xlane.xlu0 %3474 }
0x14e0   : > { %v3478_v23 = vmul.f32 0.0078125, %v3475_v22 }
0x14e1   : > { %v3477_v24 = vpop.xlane.xlu1 %3476 }
0x14e2   : > { %v3480_v27 = vadd.f32 1e-05, %v3478_v23  ;;  %v3479_v28 = vmul.f32 0.0078125, %v3477_v24 }
0x14e4   : > { %5793 = vrsqrt.f32 %v3480_v27  ;;  %v3481_v29 = vadd.f32 1e-05, %v3479_v28 }
0x14e6   : > { %5795 = vrsqrt.f32 %v3481_v29 }
0x14ee   : > { %v5794_v30 = vpop.eup %5793 }
0x14ef   : > { %v3484_v35 = vmul.f32 %v5794_v30, %v7213_v51  ;;  %v5693_v51 = vld [vmem:[#allocation20 + $0x158] sm:$0xff]  }
0x14f0   : > { %v5796_v36 = vpop.eup %5795 }
0x14f1   : > { %v3485_v38 = vmul.f32 %v5796_v36, %v7215_v53  ;;  %v3492_v39 = vmul.f32 %v4809_v34, %v3484_v35  ;;  %v5695_v53 = vld [vmem:[#allocation20 + $0x118] sm:$0xff]  }
0x14f3   : > { %v3493_v41 = vmul.f32 %v4809_v34, %v3485_v38  ;;  %v7223_v42 = vadd.f32 %v4810_v40, %v3492_v39 }
0x14f5   : > { %v7225_v43 = vadd.f32 %v4810_v40, %v3493_v41 }
0x14f7   : > { %v3502_v8 = vpack.c.bf16 %v7225_v43, %v7223_v42 }
0x14f9   : > { %3752 = vmatmul.mubr.bf16.vlgmr.msra.gmra.mrb[56].mxu1 %v3502_v8  ;;  %3795 = vmatmul.mubr.bf16.vlgmr.msra.gmra.mrb[48].mxu0 %v3502_v8 }
0x14fa   : > { %5021 = vmatpush3.bf16.msra.mxu1 %v5683_v45  ;;  %5043 = vmatpush3.bf16.msra.mxu0 %v5684_v46 }
0x14fb   : > { %5022 = vmatprep.subr.bf16.mxu1 %v5685_v47  ;;  %5044 = vmatprep.subr.bf16.mxu0 %v5686_v9 }
0x14fe   : > { %5023 = vmatpush3.bf16.msra.mxu1 %v5687_v1  ;;  %5045 = vmatpush3.bf16.msra.mxu0 %v5688_v48  ;;  %v4843_v1 = vld [vmem:[#allocation21 + $0x1] ss:$0 sm:$0xff] }
0x14ff   : > { %5024 = vmatprep.subr.bf16.mxu1 %v5689_v50  ;;  %5046 = vmatprep.subr.bf16.mxu0 %v5690_v25 }
0x1502   : > { %5025 = vmatpush3.bf16.msra.mxu1 %v5691_v49  ;;  %5047 = vmatpush3.bf16.msra.mxu0 %v5692_v26 }
0x1503   : > { %5026 = vmatprep.subr.bf16.mxu1 %v5693_v51  ;;  %5048 = vmatprep.subr.bf16.mxu0 %v5694_v52 }
0x1506   : > { %5027 = vmatpush3.bf16.msra.mxu1 %v5695_v53  ;;  %5049 = vmatpush3.bf16.msra.mxu0 %v5696_v55 }
0x1507   : > { %5028 = vmatprep.subr.bf16.mxu1 %v5697_v56  ;;  %5050 = vmatprep.subr.bf16.mxu0 %v5698_v57 }
0x150a   : > { %5029 = vmatpush3.bf16.msra.mxu1 %v5699_v58  ;;  %5051 = vmatpush3.bf16.msra.mxu0 %v5700_v59 }
0x150b   : > { %5030 = vmatprep.subr.bf16.mxu1 %v5701_v62  ;;  %5052 = vmatprep.subr.bf16.mxu0 %v5702_v63 }
0x150e   : > { %5031 = vmatpush3.bf16.msra.mxu1 %v5703_v0  ;;  %5053 = vmatpush3.bf16.msra.mxu0 %v5704_v3  ;;  %v5713_v3 = vld [vmem:[%s7461_s29] sm:$0xff]  }
0x150f   : > { %5032 = vmatprep.subr.bf16.mxu1 %v5705_v4  ;;  %5054 = vmatprep.subr.bf16.mxu0 %v5706_v5  ;;  %v5714_v4 = vld [vmem:[%s7461_s29 + $0x8] sm:$0xff]  }
0x1512   : > { %5033 = vmatpush3.bf16.msra.mxu1 %v5707_v6  ;;  %5055 = vmatpush3.bf16.msra.mxu0 %v5708_v7 }
0x1513   : > { %5034 = vmatprep.subr.bf16.mxu1 %v5709_v10  ;;  %5056 = vmatprep.subr.bf16.mxu0 %v5710_v11 }
0x1516   : > { %5035 = vmatpush3.bf16.msra.mxu1 %v5711_v12  ;;  %5057 = vmatpush3.bf16.msra.mxu0 %v5712_v20  ;;  %v5715_v20 = vld [vmem:[%s7461_s29 + $0x10] sm:$0xff]  }
0x1517   : > { %5249 = vmatprep.subr.bf16.mxu1 %v6347_v2 }
0x15cc   : > { %v3753_v60 = vpop.f32.mrb[56].mxu1  ;;  %v3796_v17 = vpop.f32.mrb[48].mxu0 }
0x15cd   : > { %v3754_v61 = vadd.f32 %v3753_v60, %v3542_v14  ;;  %v3797_v18 = vadd.f32 %v3796_v17, %v3550_v54  ;;  %v3755_v19 = vpop.f32.mrb[57].mxu1  ;;  %v3798_v21 = vpop.f32.mrb[49].mxu0 }
0x15ce   : > { %v3756_v22 = vadd.f32 %v3755_v19, %v3546_v15  ;;  %v3799_v23 = vadd.f32 %v3798_v21, %v3554_v16  ;;  %v3757_v24 = vpop.f32.mrb[58].mxu1  ;;  %v3800_v27 = vpop.f32.mrb[50].mxu0 }
0x15cf   : > { %v3758_v28 = vadd.f32 %v3757_v24, %v3542_v14  ;;  %v3801_v29 = vadd.f32 %v3800_v27, %v3550_v54  ;;  %v3759_v33 = vpop.f32.mrb[59].mxu1  ;;  %v3802_v30 = vpop.f32.mrb[51].mxu0  ;;  %v3805_v32 = vmax.f32 %v3754_v61, 0.0  ;;  %v3807_v35 = vmax.f32 %v3797_v18, 0.0  ;;  %v5717_v14 = vld [vmem:[%s7461_s29 + $0x20] sm:$0xff]   ;;  %v5718_v54 = vld [vmem:[%s7461_s29 + $0x28] sm:$0xff]  }
0x15d0   : > { %v3760_v37 = vadd.f32 %v3759_v33, %v3546_v15  ;;  %v3803_v34 = vadd.f32 %v3802_v30, %v3554_v16  ;;  %v3806_v36 = vmax.f32 %v3756_v22, 0.0  ;;  %v3808_v38 = vmax.f32 %v3799_v23, 0.0  ;;  %v5719_v15 = vld [vmem:[%s7461_s29 + $0x30] sm:$0xff]   ;;  %v5720_v16 = vld [vmem:[%s7461_s29 + $0x38] sm:$0xff]   ;;  %v4876_v23 = vld [vmem:[#allocation23 + $0x1] ss:$0 sm:$0xff] }
0x15d1   : > { %v3809_v31 = vmax.f32 %v3758_v28, 0.0  ;;  %v3811_v44 = vmax.f32 %v3801_v29, 0.0  ;;  %v4877_v28 = vld [vmem:[#allocation24 + $0x1] ss:$0 sm:$0xff] }
0x15d2   : > { %v3810_v39 = vmax.f32 %v3760_v37, 0.0  ;;  %v3812_v40 = vmax.f32 %v3803_v34, 0.0 }
0x15d3   : > { %v3813_v41 = vpack.c.bf16 %v3809_v31, %v3805_v32  ;;  %v3815_v45 = vpack.c.bf16 %v3811_v44, %v3807_v35 }
0x15d4   : > { %v3814_v46 = vpack.c.bf16 %v3810_v39, %v3806_v36  ;;  %v3816_v8 = vpack.c.bf16 %v3812_v40, %v3808_v38 }
0x15d6   : > { %4114 = vmatprep.mubr.bf16.mxu1 %v3814_v46  ;;  %4155 = vmatprep.mubr.bf16.mxu0 %v3816_v8 }
0x15d7   : > { %4115 = vmatmul.mubr.bf16.vlgmr.msra.gmra.mrb[60].mxu1 %v3813_v41  ;;  %4156 = vmatmul.mubr.bf16.vlgmr.msra.gmra.mrb[52].mxu0 %v3815_v45 }
0x15d8   : > { %5265 = vmatprep.mubr.msk.bf16.mxu1 %vm6349_vm0, %v6347_v2  ;;  %5250 = vmatpush3.bf16.msra.mxu1 %v5713_v3 }
0x15d9   : > { %5251 = vmatprep.subr.bf16.mxu1 %v6347_v2 }
0x15dc   : > { %5252 = vmatpush3.bf16.msra.mxu1 %v5714_v4 }
0x15dd   : > { %5253 = vmatprep.subr.bf16.mxu1 %v6347_v2 }
0x15e0   : > { %5254 = vmatpush3.bf16.msra.mxu1 %v5715_v20 }
0x15e1   : > { %5255 = vmatprep.subr.bf16.mxu1 %v6347_v2 }
0x15e4   : > { %5256 = vmatpush3.bf16.msra.mxu1 %v5716_v13 }
0x15e5   : > { %5257 = vmatprep.subr.bf16.mxu1 %v6347_v2 }
0x15e8   : > { %5258 = vmatpush3.bf16.msra.mxu1 %v5717_v14 }
0x15e9   : > { %5259 = vmatprep.subr.bf16.mxu1 %v6347_v2 }
0x15ec   : > { %5260 = vmatpush3.bf16.msra.mxu1 %v5718_v54 }
0x15ed   : > { %5261 = vmatprep.subr.bf16.mxu1 %v6347_v2 }
0x15f0   : > { %5262 = vmatpush3.bf16.msra.mxu1 %v5719_v15 }
0x15f1   : > { %5263 = vmatprep.subr.bf16.mxu1 %v6347_v2 }
0x15f4   : > { %5264 = vmatpush3.bf16.msra.mxu1 %v5720_v16 }
0x16aa   : > { %v5036_v47 = vpop.f32.mrb[60].mxu1  ;;  %v5058_v9 = vpop.f32.mrb[52].mxu0 }
0x16ab   : > { %v5037_v48 = vpop.f32.mrb[61].mxu1  ;;  %v5059_v50 = vpop.f32.mrb[53].mxu0 }
0x16ac   : > { %v5038_v25 = vadd.f32 %v5037_v48, %v5036_v47  ;;  %v5060_v49 = vadd.f32 %v5059_v50, %v5058_v9  ;;  %v5039_v26 = vpop.f32.mrb[62].mxu1  ;;  %v5061_v51 = vpop.f32.mrb[54].mxu0 }
0x16ad   : > { %v5040_v52 = vpop.f32.mrb[63].mxu1  ;;  %v5062_v53 = vpop.f32.mrb[55].mxu0 }
0x16ae   : > { %v4117_v55 = vadd.f32 %v5038_v25, %v4843_v1  ;;  %v5041_v56 = vadd.f32 %v5040_v52, %v5039_v26  ;;  %v5063_v57 = vadd.f32 %v5062_v53, %v5061_v51 }
0x16b0   : > { %v4158_v58 = vadd.f32 %v5060_v49, %v4117_v55  ;;  %v4120_v59 = vadd.f32 %v5041_v56, %v4843_v1 }
0x16b2   : > { %v4161_v62 = vadd.f32 %v5063_v57, %v4120_v59  ;;  %v4164_v63 = vadd.f32 %v4158_v58, %v7223_v42 }
0x16b4   : > { %4170 = vadd.xlane.f32.xlu0 %v4164_v63  ;;  %v4165_v0 = vadd.f32 %v4161_v62, %v7225_v43 }
0x16b6   : > { %4172 = vadd.xlane.f32.xlu1 %v4165_v0 }
0x1741   : > { %v4171_v5 = vpop.xlane.xlu0 %4170 }
0x1742   : > { %v4174_v42 = vmul.f32 0.0078125, %v4171_v5 }
0x1743   : > { %v4173_v6 = vpop.xlane.xlu1 %4172 }
0x1744   : > { %v4176_v7 = vsub.f32 %v4164_v63, %v4174_v42  ;;  %v4175_v43 = vmul.f32 0.0078125, %v4173_v6 }
0x1746   : > { %v4177_v10 = vsub.f32 %v4165_v0, %v4175_v43  ;;  %v4178_v11 = vmul.f32 %v4176_v7, %v4176_v7 }
0x1748   : > { %4180 = vadd.xlane.f32.xlu0 %v4178_v11  ;;  %v4179_v12 = vmul.f32 %v4177_v10, %v4177_v10 }
0x174a   : > { %4182 = vadd.xlane.f32.xlu1 %v4179_v12 }
0x17d5   : > { %v4181_v60 = vpop.xlane.xlu0 %4180 }
0x17d6   : > { %v4184_v17 = vmul.f32 0.0078125, %v4181_v60 }
0x17d7   : > { %v4183_v61 = vpop.xlane.xlu1 %4182 }
0x17d8   : > { %v4186_v18 = vadd.f32 1e-05, %v4184_v17  ;;  %v4185_v19 = vmul.f32 0.0078125, %v4183_v61 }
0x17da   : > { %5797 = vrsqrt.f32 %v4186_v18  ;;  %v4187_v21 = vadd.f32 1e-05, %v4185_v19 }
0x17dc   : > { %5799 = vrsqrt.f32 %v4187_v21 }
0x17e4   : > { %v5798_v22 = vpop.eup %5797 }
0x17e5   : > { %v4190_v24 = vmul.f32 %v5798_v22, %v4176_v7 }
0x17e6   : > { %v5800_v27 = vpop.eup %5799 }
0x17e7   : > { %v4191_v29 = vmul.f32 %v5800_v27, %v4177_v10  ;;  %v4198_v33 = vmul.f32 %v4876_v23, %v4190_v24 }
0x17e9   : > { %v4199_v2 = vmul.f32 %v4876_v23, %v4191_v29  ;;  %v4206_v30 = vadd.f32 %v4877_v28, %v4198_v33 }
0x17eb   : > { %v4207_v37 = vadd.f32 %v4877_v28, %v4199_v2  ;;  %4208 = vst [vmem:[%s860_s5] sm:$0xff] %v4206_v30 }
0x17ed   : > { %4209 = vst [vmem:[%s860_s5 + $0x8] sm:$0xff] %v4207_v37  ;;  %v4210_v34 = vpack.c.bf16 %v4207_v37, %v4206_v30 }
0x17ef   : > { %5266 = vmatmul.mubr.bf16.vlgmr.msra.gmra.mrb[64].mxu1 %v4210_v34 }
0x17f0   : > { %6209 = shalt.err (!%p6206_p5)
}
0x17f1   : > { %s6210_s5 = scalar_lea.hbm %s7275_s17, 256  ;;  %s6214_s20 = scalar_lea.hbm %s7462_s28, 512 }
0x17f2   : > { %p6211_p7 = scmp.ne.s32.totalorder %s7275_s17, %s6210_s5  ;;  %p6215_p3 = scmp.lt.u32.totalorder %s7275_s17, %s7462_s28 }
0x17f3   : > { %p6216_p9 = scmp.lt.u32.totalorder %s6214_s20, %s6210_s5  ;;  %p6218_p0 = scmp.lt.u32.totalorder %s6210_s5, %s7275_s17 }
0x17f4   : > { %p6212_p4 = pnand %p6211_p7, %p7463_p2 }
0x17f5   : > { %p6217_p13 = por %p6216_p9, %p6215_p3 }
0x17f6   : > { %p6213_p1 = pneg %p6212_p4 }
0x17f7   : > { %p6219_p8 = por %p6218_p0, %p6217_p13 }
0x17f9   : > { %p6220_p10 = pnand %p6219_p8, %p6213_p1 }
0x17fb   : > { %6223 = shalt.err (!%p6220_p10)
}
0x17fc   : > { %s6354_s9 = smov 128   ;;  %s6355_s7 = smov 8  }
0x17fd   : > { %5323 = dma.vmem_to_hbm [thread:$0]  (%p7463_p2), %s7277_s8, 256, %s7275_s17, %s4334_s10, %s6354_s9, %s6354_s9, %s6355_s7  }
0x17fe   : > { %s4650_s6 = sshll.u32 %s6883_s4, 3  ;;  %s7464_s12 = sld [smem:[#allocation54_spill]] }
0x17ff   : > { %s867_s5 = scalar_lea.vmem [#allocation27], %s4650_s6  ;;  %s4902_s11 = sshll.u32 %s6484_s3, 7 }
0x1800   : > { %s4368_s2 = sshll.u32 %s867_s5, 4  ;;  %s7465_s10 = sld [smem:[#allocation56_spill]]  ;;  %s7308_s2 = int_to_ptr.vmem [resolvable:$true] %s4368_s2 }
0x1801   : > { %s4339_s7 = scalar_lea.sflag [#allocation28], %s6883_s4  ;;  %s6224_s6 = scalar_lea.vmem %s7308_s2, 128 }
0x1802   : > { %p6225_p11 = scmp.ne.s32.totalorder %s7308_s2, %s6224_s6  ;;  %s6356_s3 = smov [#allocation27]  }
0x1803   : > { %s6228_s21 = sshll.u32 %s6356_s3, 4  ;;  %s6229_s21 = int_to_ptr.vmem [resolvable:$false] %s6228_s21 }
0x1804   : > { %v4878_v32 = vld [vmem:[%s7464_s12] ss:$0 sm:$0xff]  ;;  %p6226_p6 = pnand %p6225_p11, %p7463_p2  ;;  %s6230_s20 = scalar_lea.vmem %s6229_s21, 256 }
0x1805   : > { %p6231_p5 = scmp.lt.s32.totalorder %s7308_s2, %s6229_s21  ;;  %p6232_p7 = scmp.lt.s32.totalorder %s6230_s20, %s6224_s6 }
0x1806   : > { %s7313_s9 = scalar_lea.hbm %s7465_s10, %s4902_s11  ;;  %p6227_p12 = pneg %p6226_p6 }
0x1807   : > { %p6233_p4 = por %p6232_p7, %p6231_p5 }
0x1809   : > { %p6234_p1 = pnand %p6233_p4, %p6227_p12 }
0x18c2   : > { %v4316_v35 = vpop.f32.mrb[64].mxu1 }
0x18c3   : > { %v5267_v31 = vpop.f32.mrb[65].mxu1  ;;  %v4317_v36 = vadd.f32 %v4878_v32, %v4316_v35 }
0x18c4   : > { %v4319_v44 = vpop.f32.mrb[66].mxu1 }
0x18c5   : > { %v4320_v38 = vadd.f32 %v4878_v32, %v4319_v44  ;;  %v5268_v39 = vpop.f32.mrb[67].mxu1 }
0x18c7   : > { %v4906_v40 = vpack.c.bf16 %v4320_v38, %v4317_v36 }
0x18c9   : > { %4907 = vst [vmem:[%s867_s5] sm:$0xff] %v4906_v40  }
0x18ca   : > { %6237 = shalt.err (!%p6234_p1)
}
0x18cb   : > { %s6238_s11 = scalar_lea.hbm %s7313_s9, 128  ;;  %s6242_s17 = scalar_lea.hbm %s7465_s10, 256 }
0x18cc   : > { %p6239_p3 = scmp.ne.s32.totalorder %s7313_s9, %s6238_s11  ;;  %p6243_p0 = scmp.lt.u32.totalorder %s7313_s9, %s7465_s10 }
0x18cd   : > { %p6244_p8 = scmp.lt.u32.totalorder %s6242_s17, %s6238_s11  ;;  %p6246_p11 = scmp.lt.u32.totalorder %s6238_s11, %s7313_s9 }
0x18ce   : > { %p6240_p9 = pnand %p6239_p3, %p7463_p2 }
0x18cf   : > { %p6245_p10 = por %p6244_p8, %p6243_p0 }
0x18d0   : > { %p6241_p13 = pneg %p6240_p9 }
0x18d1   : > { %p6247_p6 = por %p6246_p11, %p6245_p10 }
0x18d3   : > { %p6248_p12 = pnand %p6247_p6, %p6241_p13 }
0x18d5   : > { %6251 = shalt.err (!%p6248_p12)
}
0x18d6   : > { %s6357_s6 = smov 4   ;;  %s7466_s21 = smov 64  }
0x18d7   : > { %5324 = dma.vmem_to_hbm [thread:$0]  (%p7463_p2), %s7308_s2, 128, %s7313_s9, %s4339_s7, %s7466_s21, %s7466_s21, %s6357_s6  }
0x18d8 PF: > { %s4383_s20 = sand.u32 1, %s6310_s1   ;;  %p7467_p5 = scmp.ne.s32.totalorder %s7439_s30, 0 }
0x18d9   : > { %p7468_p7 = scmp.ge.s32.totalorder %s6322_s24, 2  ;;  %s4384_s11 = scalar_lea.sflag [#allocation5], %s4383_s20 }
0x18db   : > { %p5372_p4 = pnand %p7468_p7, %p7467_p5 }
0x18dd   : > { %6301 = dma.done.wait (!%p5372_p4), %s4384_s11, 256  }
0x18de   : > { %6303 = vsyncadd (!%p5372_p4), %s4384_s11, 4294967040  ;;  %s4393_s12 = scalar_lea.sflag [#allocation28], %s4383_s20 }
0x18df   : > { %6305 = dma.done.wait (!%p5372_p4), %s4393_s12, 128  }
0x18e0   : > { %6307 = vsyncadd (!%p5372_p4), %s4393_s12, 4294967168  ;;  %p44_p2 = scmp.ge.s32.totalorder %s6807_s27, 4   ;;  %s7469_s1 = smov %s6314_s22 }
0x18e1   : > { %s7470_s22 = smov %s6318_s23  ;;  %s7471_s23 = smov %s6818_s25 }
0x18e2   : > { %s7472_s24 = smov %s6807_s27  ;;  %46 = sbr.rel (!%p44_p2) target bundleno = 32 (0x20), region = 228 }
0x18e9   :  { %4398 = vsyncpa [#allocation4], 1 }
0x18ea   :  { %4400 = vsyncpa [#allocation4 + $0x1], 1 }
0x18eb   :  { %4401 = vsyncpa [#allocation7], 1 }
0x18ec   :  { %4402 = vsyncpa [#allocation10], 1 }
0x18ed   :  { %4403 = vsyncpa [#allocation13], 1 }
0x18ee   :  { %4404 = vsyncpa [#allocation16], 1 }
0x18ef   :  { %4405 = vsyncpa [#allocation19], 1 }
0x18f0   :  { %4406 = vsyncpa [#allocation22], 1 }
0x18f1   :  { %4407 = vsyncpa [#allocation25], 1 }
0x18f2   :  { %4408 = vsyncpa [#allocation5], 1 }
0x18f3   :  { %4410 = vsyncpa [#allocation5 + $0x1], 1 }
0x18f4   :  { %4411 = vsyncpa [#allocation28], 1 }
0x18f5   :  { %4413 = vsyncpa [#allocation28 + $0x1], 1 }

</bundles_post_ra>
